<compile_context>
chip_gen: v7x
topology: tpu7x:2x2x1
jax: 0.10.0
libtpu: 0.0.40
codegen_flags: <defaults>
</compile_context>

<pallas_src>
import functools

import numpy as np
import jax
import jax.numpy as jnp
from jax import lax
from jax.experimental import pallas as pl
from jax.experimental.pallas import tpu as pltpu

# ----------------------------------------------------------------------------
# Model hyper-parameters (CNNLassoNetModel defaults)
# ----------------------------------------------------------------------------
BATCH = 2
SEQ_LEN = 58
NUM_RESIDUES = 20
CONV_DEPTH = 12
CONV_WIDTH = 7
POOL = 2
CONV2_DEPTH = CONV_DEPTH * 2          # 24
FC1_SIZE = 128
FC2_SIZE = 64
PAD = (CONV_WIDTH - 1) // 2           # 3
L1 = SEQ_LEN // POOL                  # 29
L2 = L1 // POOL                       # 14 (floor mode: position 28 dropped)
FLAT = CONV2_DEPTH * L2               # 336, matches hard-coded nn.Linear(336, 128)
assert FLAT == 336
BN_EPS = 1e-5

# ----------------------------------------------------------------------------
# Packed-parameter layout (all offsets static; slabs built once in fold_params)
# ----------------------------------------------------------------------------
# Small slab: (16, 128) f32, one logical vector per row.
ROW_E = 0          # aa_embedding / ||aa_embedding||        lanes 0:20
ROW_C1B = 1        # conv1 bias                             lanes 0:12
ROW_C1S = 2        # conv1 BN scale                         lanes 0:12
ROW_C1T = 3        # conv1 BN shift                         lanes 0:12
ROW_C2B = 4        # conv2 bias                             lanes 0:24
ROW_C2S = 5        # conv2 BN scale                         lanes 0:24
ROW_C2T = 6        # conv2 BN shift                         lanes 0:24
ROW_FB1 = 7        # fc1 bias                               lanes 0:128
ROW_FB2 = 8        # fc2 bias (bn_fc1 folded in)            lanes 0:64
ROW_OW0 = 9        # output-layer weight rows (bn_fc2 folded), rows 9,10  lanes 0:64
ROW_SK0 = 11       # skip weight rows, rows 11,12           lanes 0:58
ROW_OB = 13        # final bias (out_b + bn fold + skip_b)  lanes 0:2
PROWS = 16

# Weight slab: (760, 128) f32, row-block offsets (all 8-aligned).
OFF_W1C = 0        # conv1 im2col weight (140, 12)  row = k*20 + c_in
OFF_W2C = 144      # conv2 im2col weight (84, 24)   row = k*12 + c_in
OFF_FW1 = 232      # fc1 weight (336, 128), rows permuted to (l*24 + c) order
OFF_FW2 = 568      # fc2 weight (128, 64), bn_fc1 folded in
OFF_D = 696        # diag(layers[0].weight) as a (58, 1) column in lane 0
WROWS = 760
assert OFF_W2C >= OFF_W1C + CONV_WIDTH * NUM_RESIDUES
assert OFF_FW1 >= OFF_W2C + CONV_WIDTH * CONV_DEPTH
assert OFF_FW2 >= OFF_FW1 + FLAT
assert OFF_D >= OFF_FW2 + FC1_SIZE
assert WROWS >= OFF_D + SEQ_LEN


# ----------------------------------------------------------------------------
# Kernel factory: one fused kernel per (static) batch-block size BB
# ----------------------------------------------------------------------------
def make_kernel(BB):
    # Batch-stacked row layout used inside the kernel.
    LP0 = SEQ_LEN + 2 * PAD                  # 64 padded rows / sample for conv1
    R1 = BB * LP0                            # conv1 output rows (row = b*LP0 + l)
    S1 = R1 + 8                              # conv1 input rows (8-row zero tail for tap reads)
    SP2 = ((L1 + 2 * PAD + 7) // 8) * 8      # 40 padded rows / sample for conv2
    R2 = (BB - 1) * SP2 + 32                 # conv2 output rows actually computed
    S2 = BB * SP2                            # conv2 input rows
    P1S = LP0 // POOL                        # 32: pooled-1 row stride per sample
    P2S = SP2 // POOL                        # 20: pooled-2 row stride per sample
    NP2 = R2 // POOL                         # pooled-2 rows stored

    # --- static invariants: junk rows produced by the batch-stacked layout are
    # provably never consumed (review correctness concern #2) -----------------
    assert SEQ_LEN + 2 * PAD <= LP0              # conv1 reads stay inside own slab
    assert R1 + CONV_WIDTH - 1 <= S1             # conv1 tap loads stay inside xp1
    assert POOL * L1 <= SEQ_LEN                  # pool1 never touches junk conv1 rows
    assert POOL * L2 + CONV_WIDTH - 2 <= L1 + 2 * PAD - 1   # conv2 reads stay in-slab
    assert (BB - 1) * SP2 + POOL * L2 <= R2      # all consumed conv2 rows computed
    assert R2 + CONV_WIDTH - 1 <= S2             # conv2 tap loads stay inside xp2
    assert (BB - 1) * P2S + L2 <= NP2            # all consumed pooled-2 rows stored

    def kernel(x_ref, p_ref, w_ref, o_ref,
               xp1_ref, y1_ref, xp2_ref, y2_ref, p2_ref):
        f32 = jnp.float32
        x = x_ref[...]                                            # (BB, 58, 20)

        # ---- skip-path projection z = x @ aa_hat (VPU mul + XLU lane reduce) ----
        e = p_ref[ROW_E:ROW_E + 1, :NUM_RESIDUES]                 # (1, 20)
        z = jnp.sum(x * e, axis=-1)                               # (BB, 58)

        # ---- LassoNet diag scaling + 'same' padding; one aligned (64,20) store
        #      per sample covers leading pad, data and trailing pad rows --------
        d = jnp.broadcast_to(w_ref[pl.ds(OFF_D, SEQ_LEN), 0:1],
                             (SEQ_LEN, NUM_RESIDUES))             # hoisted broadcast
        zrow1 = jnp.zeros((PAD, NUM_RESIDUES), f32)
        for b in range(BB):
            xp1_ref[b * LP0:(b + 1) * LP0, :] = jnp.concatenate(
                [zrow1, x[b] * d, zrow1], axis=0)                 # (64, 20)
        # Tail rows are read by the deeper conv taps (feed junk outputs only) but
        # are zeroed every step: with "parallel" grid sharding another core may
        # never run step 0, so this must NOT be gated on program_id == 0.
        xp1_ref[R1:S1, :] = jnp.zeros((S1 - R1, NUM_RESIDUES), f32)

        # ---- conv1: 7-tap accumulating matmul (no im2col materialization) ----
        y1 = jnp.zeros((R1, CONV_DEPTH), f32)
        for k in range(CONV_WIDTH):
            y1 = y1 + jnp.dot(
                xp1_ref[pl.ds(k, R1), :],
                w_ref[pl.ds(OFF_W1C + k * NUM_RESIDUES, NUM_RESIDUES), :CONV_DEPTH],
                preferred_element_type=f32)
        y1 = jnp.maximum(y1 + p_ref[ROW_C1B:ROW_C1B + 1, :CONV_DEPTH], 0.0)
        y1_ref[...] = (y1 * p_ref[ROW_C1S:ROW_C1S + 1, :CONV_DEPTH]
                       + p_ref[ROW_C1T:ROW_C1T + 1, :CONV_DEPTH])

        # ---- max-pool 2x via sublane-strided ref loads -------------------------
        p1 = jnp.maximum(y1_ref[pl.ds(0, R1 // POOL, stride=POOL), :],
                         y1_ref[pl.ds(1, R1 // POOL, stride=POOL), :])   # (BB*32, 12)

        # ---- conv2 input: ONE aligned (40,12) store per sample (pad|data|gap) --
        zrow2a = jnp.zeros((PAD, CONV_DEPTH), f32)
        zrow2b = jnp.zeros((SP2 - L1 - PAD, CONV_DEPTH), f32)
        for b in range(BB):
            xp2_ref[b * SP2:(b + 1) * SP2, :] = jnp.concatenate(
                [zrow2a, p1[b * P1S:b * P1S + L1, :], zrow2b], axis=0)   # (40, 12)

        # ---- conv2: 7-tap accumulating matmul ----------------------------------
        y2 = jnp.zeros((R2, CONV2_DEPTH), f32)
        for k in range(CONV_WIDTH):
            y2 = y2 + jnp.dot(
                xp2_ref[pl.ds(k, R2), :],
                w_ref[pl.ds(OFF_W2C + k * CONV_DEPTH, CONV_DEPTH), :CONV2_DEPTH],
                preferred_element_type=f32)
        y2 = jnp.maximum(y2 + p_ref[ROW_C2B:ROW_C2B + 1, :CONV2_DEPTH], 0.0)
        y2_ref[...] = (y2 * p_ref[ROW_C2S:ROW_C2S + 1, :CONV2_DEPTH]
                       + p_ref[ROW_C2T:ROW_C2T + 1, :CONV2_DEPTH])

        # ---- max-pool 2x (floor mode: odd last position dropped) ---------------
        p2_ref[...] = jnp.maximum(y2_ref[pl.ds(0, NP2, stride=POOL), :],
                                  y2_ref[pl.ds(1, NP2, stride=POOL), :])  # (NP2, 24)

        # ---- fc1 with the flatten folded in: 14-tap accumulating dot over the
        #      pooled positions (fc1 weight rows pre-permuted to (l*24+c) order) -
        h1 = jnp.zeros((BB, FC1_SIZE), f32)
        for l in range(L2):
            rows = jnp.concatenate(
                [p2_ref[pl.ds(b * P2S + l, 1), :] for b in range(BB)], axis=0)
            h1 = h1 + jnp.dot(
                rows, w_ref[pl.ds(OFF_FW1 + l * CONV2_DEPTH, CONV2_DEPTH), :],
                preferred_element_type=f32)
        h1 = jnp.maximum(h1 + p_ref[ROW_FB1:ROW_FB1 + 1, :], 0.0)        # (BB, 128)

        # ---- fc2 (bn_fc1 folded into weights/bias) ------------------------------
        h2 = jnp.dot(h1, w_ref[pl.ds(OFF_FW2, FC1_SIZE), :FC2_SIZE],
                     preferred_element_type=f32)
        h2 = jnp.maximum(h2 + p_ref[ROW_FB2:ROW_FB2 + 1, :FC2_SIZE], 0.0)  # (BB, 64)

        # ---- output layer + skip path, off the MXU (VPU mul + lane reductions) -
        cols = []
        for j in range(2):
            cj = (jnp.sum(h2 * p_ref[ROW_OW0 + j:ROW_OW0 + j + 1, :FC2_SIZE],
                          axis=-1, keepdims=True)
                  + jnp.sum(z * p_ref[ROW_SK0 + j:ROW_SK0 + j + 1, :SEQ_LEN],
                            axis=-1, keepdims=True))
            cols.append(cj)
        o_ref[...] = jnp.concatenate(cols, axis=1) + p_ref[ROW_OB:ROW_OB + 1, 0:2]

    scratch_shapes = [
        pltpu.VMEM((S1, NUM_RESIDUES), jnp.float32),   # padded conv1 input
        pltpu.VMEM((R1, CONV_DEPTH), jnp.float32),     # conv1 activations
        pltpu.VMEM((S2, CONV_DEPTH), jnp.float32),     # padded conv2 input
        pltpu.VMEM((R2, CONV2_DEPTH), jnp.float32),    # conv2 activations
        pltpu.VMEM((NP2, CONV2_DEPTH), jnp.float32),   # pooled conv2 activations
    ]
    return kernel, scratch_shapes


# ----------------------------------------------------------------------------
# One-time parameter folding / packing (parameter-only; done eagerly once)
# ----------------------------------------------------------------------------
def bn_affine(bn):
    scale = bn["gamma"] * lax.rsqrt(bn["var"] + BN_EPS)
    shift = bn["beta"] - bn["mean"] * scale
    return scale, shift


def fold_params(p):
    e = p["aa_embedding"] / jnp.linalg.norm(p["aa_embedding"])
    d = jnp.diagonal(p["theta_w"])

    # conv weights -> im2col layout: row index k*Cin + c_in
    w1c = jnp.transpose(p["conv1_w"], (2, 1, 0)).reshape(
        CONV_WIDTH * NUM_RESIDUES, CONV_DEPTH)                          # (140, 12)
    s1, t1 = bn_affine(p["bn1"])
    w2c = jnp.transpose(p["conv2_w"], (2, 1, 0)).reshape(
        CONV_WIDTH * CONV_DEPTH, CONV2_DEPTH)                           # (84, 24)
    s2, t2 = bn_affine(p["bn2"])

    # fc1 weight: (128, 336) -> (336, 128), rows re-ordered from torch's
    # channel-major flatten (c*L2 + l) to the kernel's (l*C2 + c) order.
    fw1 = (p["fc1_w"].T.reshape(CONV2_DEPTH, L2, FC1_SIZE)
           .transpose(1, 0, 2).reshape(FLAT, FC1_SIZE))

    # Fold post-ReLU BatchNorms into the following Linear (exact identity).
    sf1, tf1 = bn_affine(p["bn_fc1"])
    fw2 = sf1[:, None] * p["fc2_w"].T                                   # (128, 64)
    fb2 = p["fc2_b"] + tf1 @ p["fc2_w"].T                               # (64,)
    sf2, tf2 = bn_affine(p["bn_fc2"])
    owT = p["out_w"] * sf2[None, :]                                     # (2, 64)
    ob = p["out_b"] + tf2 @ p["out_w"].T + p["skip_b"]                  # (2,) + skip bias

    pslab = jnp.zeros((PROWS, 128), jnp.float32)
    pslab = pslab.at[ROW_E, :NUM_RESIDUES].set(e)
    pslab = pslab.at[ROW_C1B, :CONV_DEPTH].set(p["conv1_b"])
    pslab = pslab.at[ROW_C1S, :CONV_DEPTH].set(s1)
    pslab = pslab.at[ROW_C1T, :CONV_DEPTH].set(t1)
    pslab = pslab.at[ROW_C2B, :CONV2_DEPTH].set(p["conv2_b"])
    pslab = pslab.at[ROW_C2S, :CONV2_DEPTH].set(s2)
    pslab = pslab.at[ROW_C2T, :CONV2_DEPTH].set(t2)
    pslab = pslab.at[ROW_FB1, :FC1_SIZE].set(p["fc1_b"])
    pslab = pslab.at[ROW_FB2, :FC2_SIZE].set(fb2)
    pslab = pslab.at[ROW_OW0, :FC2_SIZE].set(owT[0])
    pslab = pslab.at[ROW_OW0 + 1, :FC2_SIZE].set(owT[1])
    pslab = pslab.at[ROW_SK0, :SEQ_LEN].set(p["skip_w"][0])
    pslab = pslab.at[ROW_SK0 + 1, :SEQ_LEN].set(p["skip_w"][1])
    pslab = pslab.at[ROW_OB, :2].set(ob)

    wslab = jnp.zeros((WROWS, 128), jnp.float32)
    wslab = wslab.at[OFF_W1C:OFF_W1C + w1c.shape[0], :CONV_DEPTH].set(w1c)
    wslab = wslab.at[OFF_W2C:OFF_W2C + w2c.shape[0], :CONV2_DEPTH].set(w2c)
    wslab = wslab.at[OFF_FW1:OFF_FW1 + FLAT, :FC1_SIZE].set(fw1)
    wslab = wslab.at[OFF_FW2:OFF_FW2 + FC1_SIZE, :FC2_SIZE].set(fw2)
    wslab = wslab.at[OFF_D:OFF_D + SEQ_LEN, 0].set(d)

    return dict(pslab=pslab, wslab=wslab)


# ----------------------------------------------------------------------------
# Wrapper: batch grid (parallel across TensorCores), 3 input DMAs total
# ----------------------------------------------------------------------------
@functools.partial(jax.jit, static_argnames=("batch_block",))
def cnn_lassonet_forward(x, folded, batch_block=None):
    """x: (B, 58, 20) (or flattened (B, 58*20)) -> (B, 2)."""
    x = x.reshape(-1, SEQ_LEN, NUM_RESIDUES).astype(jnp.float32)
    B = x.shape[0]
    # Small batches: a single grid step (block == batch).  Large batches: blocks
    # of 8 (multiple of 8 keeps the (BB, 2) output block layout legal) sharded
    # across cores via the "parallel" grid axis.
    BB = batch_block if batch_block is not None else (B if B <= 8 else 8)
    B_pad = -(-B // BB) * BB
    if B_pad // BB > 1:
        assert BB % 8 == 0, "batch block must be a multiple of 8 when grid > 1"
    if B_pad != B:
        x = jnp.pad(x, ((0, B_pad - B), (0, 0), (0, 0)))

    kernel, scratch_shapes = make_kernel(BB)
    out = pl.pallas_call(
        kernel,
        out_shape=jax.ShapeDtypeStruct((B_pad, 2), jnp.float32),
        grid_spec=pltpu.PrefetchScalarGridSpec(
            num_scalar_prefetch=0,
            grid=(B_pad // BB,),
            in_specs=[
                pl.BlockSpec((BB, SEQ_LEN, NUM_RESIDUES), lambda i: (i, 0, 0)),
                # constant index maps -> parameter slabs stay VMEM resident
                pl.BlockSpec((PROWS, 128), lambda i: (0, 0)),
                pl.BlockSpec((WROWS, 128), lambda i: (0, 0)),
            ],
            out_specs=pl.BlockSpec((BB, 2), lambda i: (i, 0)),
            scratch_shapes=scratch_shapes),
        compiler_params=pltpu.CompilerParams(
            dimension_semantics=("parallel",)),
    )(x, folded["pslab"], folded["wslab"])
    return out[:B]


# ----------------------------------------------------------------------------
# Deterministic synthetic parameters (matching module __init__ shapes)
# ----------------------------------------------------------------------------
def init_params(key):
    ks = iter(jax.random.split(key, 40))

    def nrm(shape, scale=0.1):
        return scale * jax.random.normal(next(ks), shape, jnp.float32)

    def bn(c):
        return dict(
            gamma=1.0 + 0.1 * jax.random.normal(next(ks), (c,), jnp.float32),
            beta=0.1 * jax.random.normal(next(ks), (c,), jnp.float32),
            mean=0.1 * jax.random.normal(next(ks), (c,), jnp.float32),
            var=jax.random.uniform(next(ks), (c,), jnp.float32, 0.5, 1.5),
        )

    return dict(
        aa_embedding=jax.random.normal(next(ks), (NUM_RESIDUES,), jnp.float32)
        / np.sqrt(NUM_RESIDUES),
        skip_w=nrm((2, SEQ_LEN)),
        skip_b=nrm((2,)),
        theta_w=nrm((SEQ_LEN, SEQ_LEN), 0.3),
        conv1_w=nrm((CONV_DEPTH, NUM_RESIDUES, CONV_WIDTH), 0.2),
        conv1_b=nrm((CONV_DEPTH,)),
        bn1=bn(CONV_DEPTH),
        conv2_w=nrm((CONV2_DEPTH, CONV_DEPTH, CONV_WIDTH), 0.2),
        conv2_b=nrm((CONV2_DEPTH,)),
        bn2=bn(CONV2_DEPTH),
        fc1_w=nrm((FC1_SIZE, FLAT), 0.05),
        fc1_b=nrm((FC1_SIZE,)),
        bn_fc1=bn(FC1_SIZE),
        fc2_w=nrm((FC2_SIZE, FC1_SIZE), 0.05),
        fc2_b=nrm((FC2_SIZE,)),
        bn_fc2=bn(FC2_SIZE),
        out_w=nrm((2, FC2_SIZE), 0.1),
        out_b=nrm((2,)),
    )


# ----------------------------------------------------------------------------
# Pure-JAX/XLA reference (mirrors the torch module op-for-op) for validation
# ----------------------------------------------------------------------------
def reference_forward(x, p):
    hp = lax.Precision.HIGHEST
    x = x.reshape(-1, SEQ_LEN, NUM_RESIDUES)

    e = p["aa_embedding"] / jnp.linalg.norm(p["aa_embedding"])
    z = jnp.einsum("blc,c->bl", x, e, precision=hp)
    skip = jnp.dot(z, p["skip_w"].T, precision=hp) + p["skip_b"]

    d = jnp.diagonal(p["theta_w"])
    h = jnp.transpose(x * d[None, :, None], (0, 2, 1))        # (B, 20, 58)

    def conv_block(h, w, b, bnp):
        y = lax.conv_general_dilated(h, w, (1,), [(PAD, PAD)],
                                     dimension_numbers=("NCH", "OIH", "NCH"),
                                     precision=hp)
        y = jnp.maximum(y + b[None, :, None], 0.0)
        s, t = bn_affine(bnp)
        y = y * s[None, :, None] + t[None, :, None]
        Bn, C, L = y.shape
        Lo = L // POOL
        return y[:, :, :Lo * POOL].reshape(Bn, C, Lo, POOL).max(axis=-1)

    h = conv_block(h, p["conv1_w"], p["conv1_b"], p["bn1"])   # (B, 12, 29)
    h = conv_block(h, p["conv2_w"], p["conv2_b"], p["bn2"])   # (B, 24, 14)
    h = h.reshape(h.shape[0], -1)                             # (B, 336) channel-major

    def lin_relu_bn(h, w, b, bnp):
        h = jnp.maximum(jnp.dot(h, w.T, precision=hp) + b, 0.0)
        s, t = bn_affine(bnp)
        return h * s + t

    h = lin_relu_bn(h, p["fc1_w"], p["fc1_b"], p["bn_fc1"])
    h = lin_relu_bn(h, p["fc2_w"], p["fc2_b"], p["bn_fc2"])
    cnn_out = jnp.dot(h, p["out_w"].T, precision=hp) + p["out_b"]
    return skip + cnn_out


# ----------------------------------------------------------------------------
if __name__ == "__main__":
    key = jax.random.PRNGKey(0)
    pkey, xkey = jax.random.split(key)
    params = init_params(pkey)
    x = jax.random.normal(xkey, (BATCH, SEQ_LEN, NUM_RESIDUES), jnp.float32)

    folded = fold_params(params)                 # one-time parameter packing

    out = cnn_lassonet_forward(x, folded)
    out = jax.block_until_ready(out)
    assert out.shape == (BATCH, 2)

    ref = reference_forward(x, params)
    np.testing.assert_allclose(np.asarray(out), np.asarray(ref),
                               rtol=2e-2, atol=2e-2)

    print("KERNEL_OK")
</pallas_src>

<mosaic_0001>
module attributes {stable_mosaic.version = 11 : i64} {
  func.func @kernel(%arg0: i32, %arg1: memref<2x58x20xf32, #tpu.memory_space<vmem>>, %arg2: memref<16x128xf32, #tpu.memory_space<vmem>>, %arg3: memref<760x128xf32, #tpu.memory_space<vmem>>, %arg4: memref<2x2xf32, #tpu.memory_space<vmem>>, %arg5: memref<136x20xf32, #tpu.memory_space<vmem>>, %arg6: memref<128x12xf32, #tpu.memory_space<vmem>>, %arg7: memref<80x12xf32, #tpu.memory_space<vmem>>, %arg8: memref<72x24xf32, #tpu.memory_space<vmem>>, %arg9: memref<36x24xf32, #tpu.memory_space<vmem>>) attributes {dimension_semantics = [#tpu.dimension_semantics<parallel>], iteration_bounds = array<i64: 1>, scalar_prefetch = 0 : i64, scratch_operands = 5 : i64, tpu.core_type = #tpu.core_type<tc>, window_params = [{transform_indices = @transform_0, window_bounds = array<i64: 2, 58, 20>}, {pipeline_mode = #tpu.pipeline_mode<synchronous>, transform_indices = @transform_1, window_bounds = array<i64: 16, 128>}, {pipeline_mode = #tpu.pipeline_mode<synchronous>, transform_indices = @transform_2, window_bounds = array<i64: 760, 128>}, {transform_indices = @transform_3, window_bounds = array<i64: 2, 2>}]} {
    %c0 = arith.constant 0 : index
    %c0_0 = arith.constant 0 : index
    %c0_1 = arith.constant 0 : index
    %0 = vector.load %arg1[%c0, %c0_0, %c0_1] : memref<2x58x20xf32, #tpu.memory_space<vmem>>, vector<2x58x20xf32>
    %c0_2 = arith.constant 0 : index
    %c0_3 = arith.constant 0 : index
    %1 = vector.load %arg2[%c0_2, %c0_3] : memref<16x128xf32, #tpu.memory_space<vmem>>, vector<1x20xf32>
    %2 = vector.shape_cast %1 : vector<1x20xf32> to vector<1x1x20xf32>
    %3 = vector.broadcast %2 : vector<1x1x20xf32> to vector<2x58x20xf32>
    %4 = arith.mulf %0, %3 : vector<2x58x20xf32>
    %cst = arith.constant dense<0.000000e+00> : vector<2x58xf32>
    %5 = vector.multi_reduction <add>, %4, %cst [2] : vector<2x58x20xf32> to vector<2x58xf32>
    %c696 = arith.constant 696 : index
    %c0_4 = arith.constant 0 : index
    %6 = vector.load %arg3[%c696, %c0_4] : memref<760x128xf32, #tpu.memory_space<vmem>>, vector<58x1xf32>
    %7 = vector.shape_cast %6 : vector<58x1xf32> to vector<58x1xf32>
    %8 = vector.broadcast %7 : vector<58x1xf32> to vector<58x20xf32>
    %cst_5 = arith.constant 0.000000e+00 : f32
    %9 = vector.broadcast %cst_5 : f32 to vector<3x20xf32>
    %10 = vector.extract_strided_slice %0 {offsets = [0, 0, 0], sizes = [1, 58, 20], strides = [1, 1, 1]} : vector<2x58x20xf32> to vector<1x58x20xf32>
    %11 = vector.shape_cast %10 : vector<1x58x20xf32> to vector<58x20xf32>
    %12 = arith.mulf %11, %8 : vector<58x20xf32>
    %13 = tpu.concatenate %9, %12, %9 in 0 : vector<3x20xf32>, vector<58x20xf32>, vector<3x20xf32> -> vector<64x20xf32>
    %c0_6 = arith.constant 0 : index
    %c0_7 = arith.constant 0 : index
    %14 = vector.load %arg5[%c0_6, %c0_7] : memref<136x20xf32, #tpu.memory_space<vmem>>, vector<64x20xf32>
    tpu.vector_store %arg5[%c0_6, %c0_7], %13 {strides = array<i32>} : memref<136x20xf32, #tpu.memory_space<vmem>>, vector<64x20xf32>,
    %15 = vector.extract_strided_slice %0 {offsets = [1, 0, 0], sizes = [1, 58, 20], strides = [1, 1, 1]} : vector<2x58x20xf32> to vector<1x58x20xf32>
    %16 = vector.shape_cast %15 : vector<1x58x20xf32> to vector<58x20xf32>
    %17 = arith.mulf %16, %8 : vector<58x20xf32>
    %18 = tpu.concatenate %9, %17, %9 in 0 : vector<3x20xf32>, vector<58x20xf32>, vector<3x20xf32> -> vector<64x20xf32>
    %c64 = arith.constant 64 : index
    %c0_8 = arith.constant 0 : index
    %19 = vector.load %arg5[%c64, %c0_8] : memref<136x20xf32, #tpu.memory_space<vmem>>, vector<64x20xf32>
    tpu.vector_store %arg5[%c64, %c0_8], %18 {strides = array<i32>} : memref<136x20xf32, #tpu.memory_space<vmem>>, vector<64x20xf32>,
    %cst_9 = arith.constant 0.000000e+00 : f32
    %20 = vector.broadcast %cst_9 : f32 to vector<8x20xf32>
    %c128 = arith.constant 128 : index
    %c0_10 = arith.constant 0 : index
    %21 = vector.load %arg5[%c128, %c0_10] : memref<136x20xf32, #tpu.memory_space<vmem>>, vector<8x20xf32>
    tpu.vector_store %arg5[%c128, %c0_10], %20 {strides = array<i32>} : memref<136x20xf32, #tpu.memory_space<vmem>>, vector<8x20xf32>,
    %cst_11 = arith.constant 0.000000e+00 : f32
    %22 = vector.broadcast %cst_11 : f32 to vector<128x12xf32>
    %c0_12 = arith.constant 0 : index
    %c0_13 = arith.constant 0 : index
    %23 = vector.load %arg5[%c0_12, %c0_13] : memref<136x20xf32, #tpu.memory_space<vmem>>, vector<128x20xf32>
    %c0_14 = arith.constant 0 : index
    %c0_15 = arith.constant 0 : index
    %24 = vector.load %arg3[%c0_14, %c0_15] : memref<760x128xf32, #tpu.memory_space<vmem>>, vector<20x12xf32>
    %cst_16 = arith.constant dense<0.000000e+00> : vector<128x12xf32>
    %25 = tpu.matmul %23, %24, %cst_16 {dimension_numbers = #tpu.dot_dimension_numbers<[1], [0], [0], [1], [0, 0, 1, 1], [], []>} : vector<128x20xf32>, vector<20x12xf32>, vector<128x12xf32> -> vector<128x12xf32>
    %26 = arith.addf %22, %25 : vector<128x12xf32>
    %c1 = arith.constant 1 : index
    %c0_17 = arith.constant 0 : index
    %27 = vector.load %arg5[%c1, %c0_17] : memref<136x20xf32, #tpu.memory_space<vmem>>, vector<128x20xf32>
    %c20 = arith.constant 20 : index
    %c0_18 = arith.constant 0 : index
    %28 = vector.load %arg3[%c20, %c0_18] : memref<760x128xf32, #tpu.memory_space<vmem>>, vector<20x12xf32>
    %cst_19 = arith.constant dense<0.000000e+00> : vector<128x12xf32>
    %29 = tpu.matmul %27, %28, %cst_19 {dimension_numbers = #tpu.dot_dimension_numbers<[1], [0], [0], [1], [0, 0, 1, 1], [], []>} : vector<128x20xf32>, vector<20x12xf32>, vector<128x12xf32> -> vector<128x12xf32>
    %30 = arith.addf %26, %29 : vector<128x12xf32>
    %c2 = arith.constant 2 : index
    %c0_20 = arith.constant 0 : index
    %31 = vector.load %arg5[%c2, %c0_20] : memref<136x20xf32, #tpu.memory_space<vmem>>, vector<128x20xf32>
    %c40 = arith.constant 40 : index
    %c0_21 = arith.constant 0 : index
    %32 = vector.load %arg3[%c40, %c0_21] : memref<760x128xf32, #tpu.memory_space<vmem>>, vector<20x12xf32>
    %cst_22 = arith.constant dense<0.000000e+00> : vector<128x12xf32>
    %33 = tpu.matmul %31, %32, %cst_22 {dimension_numbers = #tpu.dot_dimension_numbers<[1], [0], [0], [1], [0, 0, 1, 1], [], []>} : vector<128x20xf32>, vector<20x12xf32>, vector<128x12xf32> -> vector<128x12xf32>
    %34 = arith.addf %30, %33 : vector<128x12xf32>
    %c3 = arith.constant 3 : index
    %c0_23 = arith.constant 0 : index
    %35 = vector.load %arg5[%c3, %c0_23] : memref<136x20xf32, #tpu.memory_space<vmem>>, vector<128x20xf32>
    %c60 = arith.constant 60 : index
    %c0_24 = arith.constant 0 : index
    %36 = vector.load %arg3[%c60, %c0_24] : memref<760x128xf32, #tpu.memory_space<vmem>>, vector<20x12xf32>
    %cst_25 = arith.constant dense<0.000000e+00> : vector<128x12xf32>
    %37 = tpu.matmul %35, %36, %cst_25 {dimension_numbers = #tpu.dot_dimension_numbers<[1], [0], [0], [1], [0, 0, 1, 1], [], []>} : vector<128x20xf32>, vector<20x12xf32>, vector<128x12xf32> -> vector<128x12xf32>
    %38 = arith.addf %34, %37 : vector<128x12xf32>
    %c4 = arith.constant 4 : index
    %c0_26 = arith.constant 0 : index
    %39 = vector.load %arg5[%c4, %c0_26] : memref<136x20xf32, #tpu.memory_space<vmem>>, vector<128x20xf32>
    %c80 = arith.constant 80 : index
    %c0_27 = arith.constant 0 : index
    %40 = vector.load %arg3[%c80, %c0_27] : memref<760x128xf32, #tpu.memory_space<vmem>>, vector<20x12xf32>
    %cst_28 = arith.constant dense<0.000000e+00> : vector<128x12xf32>
    %41 = tpu.matmul %39, %40, %cst_28 {dimension_numbers = #tpu.dot_dimension_numbers<[1], [0], [0], [1], [0, 0, 1, 1], [], []>} : vector<128x20xf32>, vector<20x12xf32>, vector<128x12xf32> -> vector<128x12xf32>
    %42 = arith.addf %38, %41 : vector<128x12xf32>
    %c5 = arith.constant 5 : index
    %c0_29 = arith.constant 0 : index
    %43 = vector.load %arg5[%c5, %c0_29] : memref<136x20xf32, #tpu.memory_space<vmem>>, vector<128x20xf32>
    %c100 = arith.constant 100 : index
    %c0_30 = arith.constant 0 : index
    %44 = vector.load %arg3[%c100, %c0_30] : memref<760x128xf32, #tpu.memory_space<vmem>>, vector<20x12xf32>
    %cst_31 = arith.constant dense<0.000000e+00> : vector<128x12xf32>
    %45 = tpu.matmul %43, %44, %cst_31 {dimension_numbers = #tpu.dot_dimension_numbers<[1], [0], [0], [1], [0, 0, 1, 1], [], []>} : vector<128x20xf32>, vector<20x12xf32>, vector<128x12xf32> -> vector<128x12xf32>
    %46 = arith.addf %42, %45 : vector<128x12xf32>
    %c6 = arith.constant 6 : index
    %c0_32 = arith.constant 0 : index
    %47 = vector.load %arg5[%c6, %c0_32] : memref<136x20xf32, #tpu.memory_space<vmem>>, vector<128x20xf32>
    %c120 = arith.constant 120 : index
    %c0_33 = arith.constant 0 : index
    %48 = vector.load %arg3[%c120, %c0_33] : memref<760x128xf32, #tpu.memory_space<vmem>>, vector<20x12xf32>
    %cst_34 = arith.constant dense<0.000000e+00> : vector<128x12xf32>
    %49 = tpu.matmul %47, %48, %cst_34 {dimension_numbers = #tpu.dot_dimension_numbers<[1], [0], [0], [1], [0, 0, 1, 1], [], []>} : vector<128x20xf32>, vector<20x12xf32>, vector<128x12xf32> -> vector<128x12xf32>
    %50 = arith.addf %46, %49 : vector<128x12xf32>
    %c1_35 = arith.constant 1 : index
    %c0_36 = arith.constant 0 : index
    %51 = vector.load %arg2[%c1_35, %c0_36] : memref<16x128xf32, #tpu.memory_space<vmem>>, vector<1x12xf32>
    %52 = vector.broadcast %51 : vector<1x12xf32> to vector<128x12xf32>
    %53 = arith.addf %50, %52 : vector<128x12xf32>
    %cst_37 = arith.constant 0.000000e+00 : f32
    %54 = vector.broadcast %cst_37 : f32 to vector<128x12xf32>
    %55 = arith.maximumf %53, %54 : vector<128x12xf32>
    %c2_38 = arith.constant 2 : index
    %c0_39 = arith.constant 0 : index
    %56 = vector.load %arg2[%c2_38, %c0_39] : memref<16x128xf32, #tpu.memory_space<vmem>>, vector<1x12xf32>
    %57 = vector.broadcast %56 : vector<1x12xf32> to vector<128x12xf32>
    %58 = arith.mulf %55, %57 : vector<128x12xf32>
    %c3_40 = arith.constant 3 : index
    %c0_41 = arith.constant 0 : index
    %59 = vector.load %arg2[%c3_40, %c0_41] : memref<16x128xf32, #tpu.memory_space<vmem>>, vector<1x12xf32>
    %60 = vector.broadcast %59 : vector<1x12xf32> to vector<128x12xf32>
    %61 = arith.addf %58, %60 : vector<128x12xf32>
    %c0_42 = arith.constant 0 : index
    %c0_43 = arith.constant 0 : index
    %62 = vector.load %arg6[%c0_42, %c0_43] : memref<128x12xf32, #tpu.memory_space<vmem>>, vector<128x12xf32>
    tpu.vector_store %arg6[%c0_42, %c0_43], %61 {strides = array<i32>} : memref<128x12xf32, #tpu.memory_space<vmem>>, vector<128x12xf32>,
    %c0_44 = arith.constant 0 : index
    %c0_45 = arith.constant 0 : index
    %63 = tpu.strided_load %arg6[%c0_44, %c0_45] {strides = array<i32: 2, 1>} : memref<128x12xf32, #tpu.memory_space<vmem>>, vector<64x12xf32>
    %c1_46 = arith.constant 1 : index
    %c0_47 = arith.constant 0 : index
    %64 = tpu.strided_load %arg6[%c1_46, %c0_47] {strides = array<i32: 2, 1>} : memref<128x12xf32, #tpu.memory_space<vmem>>, vector<64x12xf32>
    %65 = arith.maximumf %63, %64 : vector<64x12xf32>
    %cst_48 = arith.constant 0.000000e+00 : f32
    %66 = vector.broadcast %cst_48 : f32 to vector<3x12xf32>
    %cst_49 = arith.constant 0.000000e+00 : f32
    %67 = vector.broadcast %cst_49 : f32 to vector<8x12xf32>
    %68 = vector.extract_strided_slice %65 {offsets = [0, 0], sizes = [29, 12], strides = [1, 1]} : vector<64x12xf32> to vector<29x12xf32>
    %69 = tpu.concatenate %66, %68, %67 in 0 : vector<3x12xf32>, vector<29x12xf32>, vector<8x12xf32> -> vector<40x12xf32>
    %c0_50 = arith.constant 0 : index
    %c0_51 = arith.constant 0 : index
    %70 = vector.load %arg7[%c0_50, %c0_51] : memref<80x12xf32, #tpu.memory_space<vmem>>, vector<40x12xf32>
    tpu.vector_store %arg7[%c0_50, %c0_51], %69 {strides = array<i32>} : memref<80x12xf32, #tpu.memory_space<vmem>>, vector<40x12xf32>,
    %71 = vector.extract_strided_slice %65 {offsets = [32, 0], sizes = [29, 12], strides = [1, 1]} : vector<64x12xf32> to vector<29x12xf32>
    %72 = tpu.concatenate %66, %71, %67 in 0 : vector<3x12xf32>, vector<29x12xf32>, vector<8x12xf32> -> vector<40x12xf32>
    %c40_52 = arith.constant 40 : index
    %c0_53 = arith.constant 0 : index
    %73 = vector.load %arg7[%c40_52, %c0_53] : memref<80x12xf32, #tpu.memory_space<vmem>>, vector<40x12xf32>
    tpu.vector_store %arg7[%c40_52, %c0_53], %72 {strides = array<i32>} : memref<80x12xf32, #tpu.memory_space<vmem>>, vector<40x12xf32>,
    %cst_54 = arith.constant 0.000000e+00 : f32
    %74 = vector.broadcast %cst_54 : f32 to vector<72x24xf32>
    %c0_55 = arith.constant 0 : index
    %c0_56 = arith.constant 0 : index
    %75 = vector.load %arg7[%c0_55, %c0_56] : memref<80x12xf32, #tpu.memory_space<vmem>>, vector<72x12xf32>
    %c144 = arith.constant 144 : index
    %c0_57 = arith.constant 0 : index
    %76 = vector.load %arg3[%c144, %c0_57] : memref<760x128xf32, #tpu.memory_space<vmem>>, vector<12x24xf32>
    %cst_58 = arith.constant dense<0.000000e+00> : vector<72x24xf32>
    %77 = tpu.matmul %75, %76, %cst_58 {dimension_numbers = #tpu.dot_dimension_numbers<[1], [0], [0], [1], [0, 0, 1, 1], [], []>} : vector<72x12xf32>, vector<12x24xf32>, vector<72x24xf32> -> vector<72x24xf32>
    %78 = arith.addf %74, %77 : vector<72x24xf32>
    %c1_59 = arith.constant 1 : index
    %c0_60 = arith.constant 0 : index
    %79 = vector.load %arg7[%c1_59, %c0_60] : memref<80x12xf32, #tpu.memory_space<vmem>>, vector<72x12xf32>
    %c156 = arith.constant 156 : index
    %c0_61 = arith.constant 0 : index
    %80 = vector.load %arg3[%c156, %c0_61] : memref<760x128xf32, #tpu.memory_space<vmem>>, vector<12x24xf32>
    %cst_62 = arith.constant dense<0.000000e+00> : vector<72x24xf32>
    %81 = tpu.matmul %79, %80, %cst_62 {dimension_numbers = #tpu.dot_dimension_numbers<[1], [0], [0], [1], [0, 0, 1, 1], [], []>} : vector<72x12xf32>, vector<12x24xf32>, vector<72x24xf32> -> vector<72x24xf32>
    %82 = arith.addf %78, %81 : vector<72x24xf32>
    %c2_63 = arith.constant 2 : index
    %c0_64 = arith.constant 0 : index
    %83 = vector.load %arg7[%c2_63, %c0_64] : memref<80x12xf32, #tpu.memory_space<vmem>>, vector<72x12xf32>
    %c168 = arith.constant 168 : index
    %c0_65 = arith.constant 0 : index
    %84 = vector.load %arg3[%c168, %c0_65] : memref<760x128xf32, #tpu.memory_space<vmem>>, vector<12x24xf32>
    %cst_66 = arith.constant dense<0.000000e+00> : vector<72x24xf32>
    %85 = tpu.matmul %83, %84, %cst_66 {dimension_numbers = #tpu.dot_dimension_numbers<[1], [0], [0], [1], [0, 0, 1, 1], [], []>} : vector<72x12xf32>, vector<12x24xf32>, vector<72x24xf32> -> vector<72x24xf32>
    %86 = arith.addf %82, %85 : vector<72x24xf32>
    %c3_67 = arith.constant 3 : index
    %c0_68 = arith.constant 0 : index
    %87 = vector.load %arg7[%c3_67, %c0_68] : memref<80x12xf32, #tpu.memory_space<vmem>>, vector<72x12xf32>
    %c180 = arith.constant 180 : index
    %c0_69 = arith.constant 0 : index
    %88 = vector.load %arg3[%c180, %c0_69] : memref<760x128xf32, #tpu.memory_space<vmem>>, vector<12x24xf32>
    %cst_70 = arith.constant dense<0.000000e+00> : vector<72x24xf32>
    %89 = tpu.matmul %87, %88, %cst_70 {dimension_numbers = #tpu.dot_dimension_numbers<[1], [0], [0], [1], [0, 0, 1, 1], [], []>} : vector<72x12xf32>, vector<12x24xf32>, vector<72x24xf32> -> vector<72x24xf32>
    %90 = arith.addf %86, %89 : vector<72x24xf32>
    %c4_71 = arith.constant 4 : index
    %c0_72 = arith.constant 0 : index
    %91 = vector.load %arg7[%c4_71, %c0_72] : memref<80x12xf32, #tpu.memory_space<vmem>>, vector<72x12xf32>
    %c192 = arith.constant 192 : index
    %c0_73 = arith.constant 0 : index
    %92 = vector.load %arg3[%c192, %c0_73] : memref<760x128xf32, #tpu.memory_space<vmem>>, vector<12x24xf32>
    %cst_74 = arith.constant dense<0.000000e+00> : vector<72x24xf32>
    %93 = tpu.matmul %91, %92, %cst_74 {dimension_numbers = #tpu.dot_dimension_numbers<[1], [0], [0], [1], [0, 0, 1, 1], [], []>} : vector<72x12xf32>, vector<12x24xf32>, vector<72x24xf32> -> vector<72x24xf32>
    %94 = arith.addf %90, %93 : vector<72x24xf32>
    %c5_75 = arith.constant 5 : index
    %c0_76 = arith.constant 0 : index
    %95 = vector.load %arg7[%c5_75, %c0_76] : memref<80x12xf32, #tpu.memory_space<vmem>>, vector<72x12xf32>
    %c204 = arith.constant 204 : index
    %c0_77 = arith.constant 0 : index
    %96 = vector.load %arg3[%c204, %c0_77] : memref<760x128xf32, #tpu.memory_space<vmem>>, vector<12x24xf32>
    %cst_78 = arith.constant dense<0.000000e+00> : vector<72x24xf32>
    %97 = tpu.matmul %95, %96, %cst_78 {dimension_numbers = #tpu.dot_dimension_numbers<[1], [0], [0], [1], [0, 0, 1, 1], [], []>} : vector<72x12xf32>, vector<12x24xf32>, vector<72x24xf32> -> vector<72x24xf32>
    %98 = arith.addf %94, %97 : vector<72x24xf32>
    %c6_79 = arith.constant 6 : index
    %c0_80 = arith.constant 0 : index
    %99 = vector.load %arg7[%c6_79, %c0_80] : memref<80x12xf32, #tpu.memory_space<vmem>>, vector<72x12xf32>
    %c216 = arith.constant 216 : index
    %c0_81 = arith.constant 0 : index
    %100 = vector.load %arg3[%c216, %c0_81] : memref<760x128xf32, #tpu.memory_space<vmem>>, vector<12x24xf32>
    %cst_82 = arith.constant dense<0.000000e+00> : vector<72x24xf32>
    %101 = tpu.matmul %99, %100, %cst_82 {dimension_numbers = #tpu.dot_dimension_numbers<[1], [0], [0], [1], [0, 0, 1, 1], [], []>} : vector<72x12xf32>, vector<12x24xf32>, vector<72x24xf32> -> vector<72x24xf32>
    %102 = arith.addf %98, %101 : vector<72x24xf32>
    %c4_83 = arith.constant 4 : index
    %c0_84 = arith.constant 0 : index
    %103 = vector.load %arg2[%c4_83, %c0_84] : memref<16x128xf32, #tpu.memory_space<vmem>>, vector<1x24xf32>
    %104 = vector.broadcast %103 : vector<1x24xf32> to vector<72x24xf32>
    %105 = arith.addf %102, %104 : vector<72x24xf32>
    %cst_85 = arith.constant 0.000000e+00 : f32
    %106 = vector.broadcast %cst_85 : f32 to vector<72x24xf32>
    %107 = arith.maximumf %105, %106 : vector<72x24xf32>
    %c5_86 = arith.constant 5 : index
    %c0_87 = arith.constant 0 : index
    %108 = vector.load %arg2[%c5_86, %c0_87] : memref<16x128xf32, #tpu.memory_space<vmem>>, vector<1x24xf32>
    %109 = vector.broadcast %108 : vector<1x24xf32> to vector<72x24xf32>
    %110 = arith.mulf %107, %109 : vector<72x24xf32>
    %c6_88 = arith.constant 6 : index
    %c0_89 = arith.constant 0 : index
    %111 = vector.load %arg2[%c6_88, %c0_89] : memref<16x128xf32, #tpu.memory_space<vmem>>, vector<1x24xf32>
    %112 = vector.broadcast %111 : vector<1x24xf32> to vector<72x24xf32>
    %113 = arith.addf %110, %112 : vector<72x24xf32>
    %c0_90 = arith.constant 0 : index
    %c0_91 = arith.constant 0 : index
    %114 = vector.load %arg8[%c0_90, %c0_91] : memref<72x24xf32, #tpu.memory_space<vmem>>, vector<72x24xf32>
    tpu.vector_store %arg8[%c0_90, %c0_91], %113 {strides = array<i32>} : memref<72x24xf32, #tpu.memory_space<vmem>>, vector<72x24xf32>,
    %c0_92 = arith.constant 0 : index
    %c0_93 = arith.constant 0 : index
    %115 = tpu.strided_load %arg8[%c0_92, %c0_93] {strides = array<i32: 2, 1>} : memref<72x24xf32, #tpu.memory_space<vmem>>, vector<36x24xf32>
    %c1_94 = arith.constant 1 : index
    %c0_95 = arith.constant 0 : index
    %116 = tpu.strided_load %arg8[%c1_94, %c0_95] {strides = array<i32: 2, 1>} : memref<72x24xf32, #tpu.memory_space<vmem>>, vector<36x24xf32>
    %117 = arith.maximumf %115, %116 : vector<36x24xf32>
    %c0_96 = arith.constant 0 : index
    %c0_97 = arith.constant 0 : index
    %118 = vector.load %arg9[%c0_96, %c0_97] : memref<36x24xf32, #tpu.memory_space<vmem>>, vector<36x24xf32>
    tpu.vector_store %arg9[%c0_96, %c0_97], %117 {strides = array<i32>} : memref<36x24xf32, #tpu.memory_space<vmem>>, vector<36x24xf32>,
    %cst_98 = arith.constant 0.000000e+00 : f32
    %119 = vector.broadcast %cst_98 : f32 to vector<2x128xf32>
    %c0_99 = arith.constant 0 : index
    %c0_100 = arith.constant 0 : index
    %120 = vector.load %arg9[%c0_99, %c0_100] : memref<36x24xf32, #tpu.memory_space<vmem>>, vector<1x24xf32>
    %c20_101 = arith.constant 20 : index
    %c0_102 = arith.constant 0 : index
    %121 = vector.load %arg9[%c20_101, %c0_102] : memref<36x24xf32, #tpu.memory_space<vmem>>, vector<1x24xf32>
    %122 = tpu.concatenate %120, %121 in 0 : vector<1x24xf32>, vector<1x24xf32> -> vector<2x24xf32>
    %c232 = arith.constant 232 : index
    %c0_103 = arith.constant 0 : index
    %123 = vector.load %arg3[%c232, %c0_103] : memref<760x128xf32, #tpu.memory_space<vmem>>, vector<24x128xf32>
    %cst_104 = arith.constant dense<0.000000e+00> : vector<2x128xf32>
    %124 = tpu.matmul %122, %123, %cst_104 {dimension_numbers = #tpu.dot_dimension_numbers<[1], [0], [0], [1], [0, 0, 1, 1], [], []>} : vector<2x24xf32>, vector<24x128xf32>, vector<2x128xf32> -> vector<2x128xf32>
    %125 = arith.addf %119, %124 : vector<2x128xf32>
    %c1_105 = arith.constant 1 : index
    %c0_106 = arith.constant 0 : index
    %126 = vector.load %arg9[%c1_105, %c0_106] : memref<36x24xf32, #tpu.memory_space<vmem>>, vector<1x24xf32>
    %c21 = arith.constant 21 : index
    %c0_107 = arith.constant 0 : index
    %127 = vector.load %arg9[%c21, %c0_107] : memref<36x24xf32, #tpu.memory_space<vmem>>, vector<1x24xf32>
    %128 = tpu.concatenate %126, %127 in 0 : vector<1x24xf32>, vector<1x24xf32> -> vector<2x24xf32>
    %c256 = arith.constant 256 : index
    %c0_108 = arith.constant 0 : index
    %129 = vector.load %arg3[%c256, %c0_108] : memref<760x128xf32, #tpu.memory_space<vmem>>, vector<24x128xf32>
    %cst_109 = arith.constant dense<0.000000e+00> : vector<2x128xf32>
    %130 = tpu.matmul %128, %129, %cst_109 {dimension_numbers = #tpu.dot_dimension_numbers<[1], [0], [0], [1], [0, 0, 1, 1], [], []>} : vector<2x24xf32>, vector<24x128xf32>, vector<2x128xf32> -> vector<2x128xf32>
    %131 = arith.addf %125, %130 : vector<2x128xf32>
    %c2_110 = arith.constant 2 : index
    %c0_111 = arith.constant 0 : index
    %132 = vector.load %arg9[%c2_110, %c0_111] : memref<36x24xf32, #tpu.memory_space<vmem>>, vector<1x24xf32>
    %c22 = arith.constant 22 : index
    %c0_112 = arith.constant 0 : index
    %133 = vector.load %arg9[%c22, %c0_112] : memref<36x24xf32, #tpu.memory_space<vmem>>, vector<1x24xf32>
    %134 = tpu.concatenate %132, %133 in 0 : vector<1x24xf32>, vector<1x24xf32> -> vector<2x24xf32>
    %c280 = arith.constant 280 : index
    %c0_113 = arith.constant 0 : index
    %135 = vector.load %arg3[%c280, %c0_113] : memref<760x128xf32, #tpu.memory_space<vmem>>, vector<24x128xf32>
    %cst_114 = arith.constant dense<0.000000e+00> : vector<2x128xf32>
    %136 = tpu.matmul %134, %135, %cst_114 {dimension_numbers = #tpu.dot_dimension_numbers<[1], [0], [0], [1], [0, 0, 1, 1], [], []>} : vector<2x24xf32>, vector<24x128xf32>, vector<2x128xf32> -> vector<2x128xf32>
    %137 = arith.addf %131, %136 : vector<2x128xf32>
    %c3_115 = arith.constant 3 : index
    %c0_116 = arith.constant 0 : index
    %138 = vector.load %arg9[%c3_115, %c0_116] : memref<36x24xf32, #tpu.memory_space<vmem>>, vector<1x24xf32>
    %c23 = arith.constant 23 : index
    %c0_117 = arith.constant 0 : index
    %139 = vector.load %arg9[%c23, %c0_117] : memref<36x24xf32, #tpu.memory_space<vmem>>, vector<1x24xf32>
    %140 = tpu.concatenate %138, %139 in 0 : vector<1x24xf32>, vector<1x24xf32> -> vector<2x24xf32>
    %c304 = arith.constant 304 : index
    %c0_118 = arith.constant 0 : index
    %141 = vector.load %arg3[%c304, %c0_118] : memref<760x128xf32, #tpu.memory_space<vmem>>, vector<24x128xf32>
    %cst_119 = arith.constant dense<0.000000e+00> : vector<2x128xf32>
    %142 = tpu.matmul %140, %141, %cst_119 {dimension_numbers = #tpu.dot_dimension_numbers<[1], [0], [0], [1], [0, 0, 1, 1], [], []>} : vector<2x24xf32>, vector<24x128xf32>, vector<2x128xf32> -> vector<2x128xf32>
    %143 = arith.addf %137, %142 : vector<2x128xf32>
    %c4_120 = arith.constant 4 : index
    %c0_121 = arith.constant 0 : index
    %144 = vector.load %arg9[%c4_120, %c0_121] : memref<36x24xf32, #tpu.memory_space<vmem>>, vector<1x24xf32>
    %c24 = arith.constant 24 : index
    %c0_122 = arith.constant 0 : index
    %145 = vector.load %arg9[%c24, %c0_122] : memref<36x24xf32, #tpu.memory_space<vmem>>, vector<1x24xf32>
    %146 = tpu.concatenate %144, %145 in 0 : vector<1x24xf32>, vector<1x24xf32> -> vector<2x24xf32>
    %c328 = arith.constant 328 : index
    %c0_123 = arith.constant 0 : index
    %147 = vector.load %arg3[%c328, %c0_123] : memref<760x128xf32, #tpu.memory_space<vmem>>, vector<24x128xf32>
    %cst_124 = arith.constant dense<0.000000e+00> : vector<2x128xf32>
    %148 = tpu.matmul %146, %147, %cst_124 {dimension_numbers = #tpu.dot_dimension_numbers<[1], [0], [0], [1], [0, 0, 1, 1], [], []>} : vector<2x24xf32>, vector<24x128xf32>, vector<2x128xf32> -> vector<2x128xf32>
    %149 = arith.addf %143, %148 : vector<2x128xf32>
    %c5_125 = arith.constant 5 : index
    %c0_126 = arith.constant 0 : index
    %150 = vector.load %arg9[%c5_125, %c0_126] : memref<36x24xf32, #tpu.memory_space<vmem>>, vector<1x24xf32>
    %c25 = arith.constant 25 : index
    %c0_127 = arith.constant 0 : index
    %151 = vector.load %arg9[%c25, %c0_127] : memref<36x24xf32, #tpu.memory_space<vmem>>, vector<1x24xf32>
    %152 = tpu.concatenate %150, %151 in 0 : vector<1x24xf32>, vector<1x24xf32> -> vector<2x24xf32>
    %c352 = arith.constant 352 : index
    %c0_128 = arith.constant 0 : index
    %153 = vector.load %arg3[%c352, %c0_128] : memref<760x128xf32, #tpu.memory_space<vmem>>, vector<24x128xf32>
    %cst_129 = arith.constant dense<0.000000e+00> : vector<2x128xf32>
    %154 = tpu.matmul %152, %153, %cst_129 {dimension_numbers = #tpu.dot_dimension_numbers<[1], [0], [0], [1], [0, 0, 1, 1], [], []>} : vector<2x24xf32>, vector<24x128xf32>, vector<2x128xf32> -> vector<2x128xf32>
    %155 = arith.addf %149, %154 : vector<2x128xf32>
    %c6_130 = arith.constant 6 : index
    %c0_131 = arith.constant 0 : index
    %156 = vector.load %arg9[%c6_130, %c0_131] : memref<36x24xf32, #tpu.memory_space<vmem>>, vector<1x24xf32>
    %c26 = arith.constant 26 : index
    %c0_132 = arith.constant 0 : index
    %157 = vector.load %arg9[%c26, %c0_132] : memref<36x24xf32, #tpu.memory_space<vmem>>, vector<1x24xf32>
    %158 = tpu.concatenate %156, %157 in 0 : vector<1x24xf32>, vector<1x24xf32> -> vector<2x24xf32>
    %c376 = arith.constant 376 : index
    %c0_133 = arith.constant 0 : index
    %159 = vector.load %arg3[%c376, %c0_133] : memref<760x128xf32, #tpu.memory_space<vmem>>, vector<24x128xf32>
    %cst_134 = arith.constant dense<0.000000e+00> : vector<2x128xf32>
    %160 = tpu.matmul %158, %159, %cst_134 {dimension_numbers = #tpu.dot_dimension_numbers<[1], [0], [0], [1], [0, 0, 1, 1], [], []>} : vector<2x24xf32>, vector<24x128xf32>, vector<2x128xf32> -> vector<2x128xf32>
    %161 = arith.addf %155, %160 : vector<2x128xf32>
    %c7 = arith.constant 7 : index
    %c0_135 = arith.constant 0 : index
    %162 = vector.load %arg9[%c7, %c0_135] : memref<36x24xf32, #tpu.memory_space<vmem>>, vector<1x24xf32>
    %c27 = arith.constant 27 : index
    %c0_136 = arith.constant 0 : index
    %163 = vector.load %arg9[%c27, %c0_136] : memref<36x24xf32, #tpu.memory_space<vmem>>, vector<1x24xf32>
    %164 = tpu.concatenate %162, %163 in 0 : vector<1x24xf32>, vector<1x24xf32> -> vector<2x24xf32>
    %c400 = arith.constant 400 : index
    %c0_137 = arith.constant 0 : index
    %165 = vector.load %arg3[%c400, %c0_137] : memref<760x128xf32, #tpu.memory_space<vmem>>, vector<24x128xf32>
    %cst_138 = arith.constant dense<0.000000e+00> : vector<2x128xf32>
    %166 = tpu.matmul %164, %165, %cst_138 {dimension_numbers = #tpu.dot_dimension_numbers<[1], [0], [0], [1], [0, 0, 1, 1], [], []>} : vector<2x24xf32>, vector<24x128xf32>, vector<2x128xf32> -> vector<2x128xf32>
    %167 = arith.addf %161, %166 : vector<2x128xf32>
    %c8 = arith.constant 8 : index
    %c0_139 = arith.constant 0 : index
    %168 = vector.load %arg9[%c8, %c0_139] : memref<36x24xf32, #tpu.memory_space<vmem>>, vector<1x24xf32>
    %c28 = arith.constant 28 : index
    %c0_140 = arith.constant 0 : index
    %169 = vector.load %arg9[%c28, %c0_140] : memref<36x24xf32, #tpu.memory_space<vmem>>, vector<1x24xf32>
    %170 = tpu.concatenate %168, %169 in 0 : vector<1x24xf32>, vector<1x24xf32> -> vector<2x24xf32>
    %c424 = arith.constant 424 : index
    %c0_141 = arith.constant 0 : index
    %171 = vector.load %arg3[%c424, %c0_141] : memref<760x128xf32, #tpu.memory_space<vmem>>, vector<24x128xf32>
    %cst_142 = arith.constant dense<0.000000e+00> : vector<2x128xf32>
    %172 = tpu.matmul %170, %171, %cst_142 {dimension_numbers = #tpu.dot_dimension_numbers<[1], [0], [0], [1], [0, 0, 1, 1], [], []>} : vector<2x24xf32>, vector<24x128xf32>, vector<2x128xf32> -> vector<2x128xf32>
    %173 = arith.addf %167, %172 : vector<2x128xf32>
    %c9 = arith.constant 9 : index
    %c0_143 = arith.constant 0 : index
    %174 = vector.load %arg9[%c9, %c0_143] : memref<36x24xf32, #tpu.memory_space<vmem>>, vector<1x24xf32>
    %c29 = arith.constant 29 : index
    %c0_144 = arith.constant 0 : index
    %175 = vector.load %arg9[%c29, %c0_144] : memref<36x24xf32, #tpu.memory_space<vmem>>, vector<1x24xf32>
    %176 = tpu.concatenate %174, %175 in 0 : vector<1x24xf32>, vector<1x24xf32> -> vector<2x24xf32>
    %c448 = arith.constant 448 : index
    %c0_145 = arith.constant 0 : index
    %177 = vector.load %arg3[%c448, %c0_145] : memref<760x128xf32, #tpu.memory_space<vmem>>, vector<24x128xf32>
    %cst_146 = arith.constant dense<0.000000e+00> : vector<2x128xf32>
    %178 = tpu.matmul %176, %177, %cst_146 {dimension_numbers = #tpu.dot_dimension_numbers<[1], [0], [0], [1], [0, 0, 1, 1], [], []>} : vector<2x24xf32>, vector<24x128xf32>, vector<2x128xf32> -> vector<2x128xf32>
    %179 = arith.addf %173, %178 : vector<2x128xf32>
    %c10 = arith.constant 10 : index
    %c0_147 = arith.constant 0 : index
    %180 = vector.load %arg9[%c10, %c0_147] : memref<36x24xf32, #tpu.memory_space<vmem>>, vector<1x24xf32>
    %c30 = arith.constant 30 : index
    %c0_148 = arith.constant 0 : index
    %181 = vector.load %arg9[%c30, %c0_148] : memref<36x24xf32, #tpu.memory_space<vmem>>, vector<1x24xf32>
    %182 = tpu.concatenate %180, %181 in 0 : vector<1x24xf32>, vector<1x24xf32> -> vector<2x24xf32>
    %c472 = arith.constant 472 : index
    %c0_149 = arith.constant 0 : index
    %183 = vector.load %arg3[%c472, %c0_149] : memref<760x128xf32, #tpu.memory_space<vmem>>, vector<24x128xf32>
    %cst_150 = arith.constant dense<0.000000e+00> : vector<2x128xf32>
    %184 = tpu.matmul %182, %183, %cst_150 {dimension_numbers = #tpu.dot_dimension_numbers<[1], [0], [0], [1], [0, 0, 1, 1], [], []>} : vector<2x24xf32>, vector<24x128xf32>, vector<2x128xf32> -> vector<2x128xf32>
    %185 = arith.addf %179, %184 : vector<2x128xf32>
    %c11 = arith.constant 11 : index
    %c0_151 = arith.constant 0 : index
    %186 = vector.load %arg9[%c11, %c0_151] : memref<36x24xf32, #tpu.memory_space<vmem>>, vector<1x24xf32>
    %c31 = arith.constant 31 : index
    %c0_152 = arith.constant 0 : index
    %187 = vector.load %arg9[%c31, %c0_152] : memref<36x24xf32, #tpu.memory_space<vmem>>, vector<1x24xf32>
    %188 = tpu.concatenate %186, %187 in 0 : vector<1x24xf32>, vector<1x24xf32> -> vector<2x24xf32>
    %c496 = arith.constant 496 : index
    %c0_153 = arith.constant 0 : index
    %189 = vector.load %arg3[%c496, %c0_153] : memref<760x128xf32, #tpu.memory_space<vmem>>, vector<24x128xf32>
    %cst_154 = arith.constant dense<0.000000e+00> : vector<2x128xf32>
    %190 = tpu.matmul %188, %189, %cst_154 {dimension_numbers = #tpu.dot_dimension_numbers<[1], [0], [0], [1], [0, 0, 1, 1], [], []>} : vector<2x24xf32>, vector<24x128xf32>, vector<2x128xf32> -> vector<2x128xf32>
    %191 = arith.addf %185, %190 : vector<2x128xf32>
    %c12 = arith.constant 12 : index
    %c0_155 = arith.constant 0 : index
    %192 = vector.load %arg9[%c12, %c0_155] : memref<36x24xf32, #tpu.memory_space<vmem>>, vector<1x24xf32>
    %c32 = arith.constant 32 : index
    %c0_156 = arith.constant 0 : index
    %193 = vector.load %arg9[%c32, %c0_156] : memref<36x24xf32, #tpu.memory_space<vmem>>, vector<1x24xf32>
    %194 = tpu.concatenate %192, %193 in 0 : vector<1x24xf32>, vector<1x24xf32> -> vector<2x24xf32>
    %c520 = arith.constant 520 : index
    %c0_157 = arith.constant 0 : index
    %195 = vector.load %arg3[%c520, %c0_157] : memref<760x128xf32, #tpu.memory_space<vmem>>, vector<24x128xf32>
    %cst_158 = arith.constant dense<0.000000e+00> : vector<2x128xf32>
    %196 = tpu.matmul %194, %195, %cst_158 {dimension_numbers = #tpu.dot_dimension_numbers<[1], [0], [0], [1], [0, 0, 1, 1], [], []>} : vector<2x24xf32>, vector<24x128xf32>, vector<2x128xf32> -> vector<2x128xf32>
    %197 = arith.addf %191, %196 : vector<2x128xf32>
    %c13 = arith.constant 13 : index
    %c0_159 = arith.constant 0 : index
    %198 = vector.load %arg9[%c13, %c0_159] : memref<36x24xf32, #tpu.memory_space<vmem>>, vector<1x24xf32>
    %c33 = arith.constant 33 : index
    %c0_160 = arith.constant 0 : index
    %199 = vector.load %arg9[%c33, %c0_160] : memref<36x24xf32, #tpu.memory_space<vmem>>, vector<1x24xf32>
    %200 = tpu.concatenate %198, %199 in 0 : vector<1x24xf32>, vector<1x24xf32> -> vector<2x24xf32>
    %c544 = arith.constant 544 : index
    %c0_161 = arith.constant 0 : index
    %201 = vector.load %arg3[%c544, %c0_161] : memref<760x128xf32, #tpu.memory_space<vmem>>, vector<24x128xf32>
    %cst_162 = arith.constant dense<0.000000e+00> : vector<2x128xf32>
    %202 = tpu.matmul %200, %201, %cst_162 {dimension_numbers = #tpu.dot_dimension_numbers<[1], [0], [0], [1], [0, 0, 1, 1], [], []>} : vector<2x24xf32>, vector<24x128xf32>, vector<2x128xf32> -> vector<2x128xf32>
    %203 = arith.addf %197, %202 : vector<2x128xf32>
    %c7_163 = arith.constant 7 : index
    %c0_164 = arith.constant 0 : index
    %204 = vector.load %arg2[%c7_163, %c0_164] : memref<16x128xf32, #tpu.memory_space<vmem>>, vector<1x128xf32>
    %205 = vector.broadcast %204 : vector<1x128xf32> to vector<2x128xf32>
    %206 = arith.addf %203, %205 : vector<2x128xf32>
    %cst_165 = arith.constant 0.000000e+00 : f32
    %207 = vector.broadcast %cst_165 : f32 to vector<2x128xf32>
    %208 = arith.maximumf %206, %207 : vector<2x128xf32>
    %c568 = arith.constant 568 : index
    %c0_166 = arith.constant 0 : index
    %209 = vector.load %arg3[%c568, %c0_166] : memref<760x128xf32, #tpu.memory_space<vmem>>, vector<128x64xf32>
    %cst_167 = arith.constant dense<0.000000e+00> : vector<2x64xf32>
    %210 = tpu.matmul %208, %209, %cst_167 {dimension_numbers = #tpu.dot_dimension_numbers<[1], [0], [0], [1], [0, 0, 1, 1], [], []>} : vector<2x128xf32>, vector<128x64xf32>, vector<2x64xf32> -> vector<2x64xf32>
    %c8_168 = arith.constant 8 : index
    %c0_169 = arith.constant 0 : index
    %211 = vector.load %arg2[%c8_168, %c0_169] : memref<16x128xf32, #tpu.memory_space<vmem>>, vector<1x64xf32>
    %212 = vector.broadcast %211 : vector<1x64xf32> to vector<2x64xf32>
    %213 = arith.addf %210, %212 : vector<2x64xf32>
    %cst_170 = arith.constant 0.000000e+00 : f32
    %214 = vector.broadcast %cst_170 : f32 to vector<2x64xf32>
    %215 = arith.maximumf %213, %214 : vector<2x64xf32>
    %c9_171 = arith.constant 9 : index
    %c0_172 = arith.constant 0 : index
    %216 = vector.load %arg2[%c9_171, %c0_172] : memref<16x128xf32, #tpu.memory_space<vmem>>, vector<1x64xf32>
    %217 = vector.broadcast %216 : vector<1x64xf32> to vector<2x64xf32>
    %218 = arith.mulf %215, %217 : vector<2x64xf32>
    %cst_173 = arith.constant dense<0.000000e+00> : vector<2xf32>
    %219 = vector.multi_reduction <add>, %218, %cst_173 [1] : vector<2x64xf32> to vector<2xf32>
    %220 = vector.shape_cast %219 : vector<2xf32> to vector<2x1xf32>
    %c11_174 = arith.constant 11 : index
    %c0_175 = arith.constant 0 : index
    %221 = vector.load %arg2[%c11_174, %c0_175] : memref<16x128xf32, #tpu.memory_space<vmem>>, vector<1x58xf32>
    %222 = vector.broadcast %221 : vector<1x58xf32> to vector<2x58xf32>
    %223 = arith.mulf %5, %222 : vector<2x58xf32>
    %cst_176 = arith.constant dense<0.000000e+00> : vector<2xf32>
    %224 = vector.multi_reduction <add>, %223, %cst_176 [1] : vector<2x58xf32> to vector<2xf32>
    %225 = vector.shape_cast %224 : vector<2xf32> to vector<2x1xf32>
    %226 = arith.addf %220, %225 : vector<2x1xf32>
    %c10_177 = arith.constant 10 : index
    %c0_178 = arith.constant 0 : index
    %227 = vector.load %arg2[%c10_177, %c0_178] : memref<16x128xf32, #tpu.memory_space<vmem>>, vector<1x64xf32>
    %228 = vector.broadcast %227 : vector<1x64xf32> to vector<2x64xf32>
    %229 = arith.mulf %215, %228 : vector<2x64xf32>
    %cst_179 = arith.constant dense<0.000000e+00> : vector<2xf32>
    %230 = vector.multi_reduction <add>, %229, %cst_179 [1] : vector<2x64xf32> to vector<2xf32>
    %231 = vector.shape_cast %230 : vector<2xf32> to vector<2x1xf32>
    %c12_180 = arith.constant 12 : index
    %c0_181 = arith.constant 0 : index
    %232 = vector.load %arg2[%c12_180, %c0_181] : memref<16x128xf32, #tpu.memory_space<vmem>>, vector<1x58xf32>
    %233 = vector.broadcast %232 : vector<1x58xf32> to vector<2x58xf32>
    %234 = arith.mulf %5, %233 : vector<2x58xf32>
    %cst_182 = arith.constant dense<0.000000e+00> : vector<2xf32>
    %235 = vector.multi_reduction <add>, %234, %cst_182 [1] : vector<2x58xf32> to vector<2xf32>
    %236 = vector.shape_cast %235 : vector<2xf32> to vector<2x1xf32>
    %237 = arith.addf %231, %236 : vector<2x1xf32>
    %238 = tpu.concatenate %226, %237 in 1 : vector<2x1xf32>, vector<2x1xf32> -> vector<2x2xf32>
    %c13_183 = arith.constant 13 : index
    %c0_184 = arith.constant 0 : index
    %239 = vector.load %arg2[%c13_183, %c0_184] : memref<16x128xf32, #tpu.memory_space<vmem>>, vector<1x2xf32>
    %240 = vector.broadcast %239 : vector<1x2xf32> to vector<2x2xf32>
    %241 = arith.addf %238, %240 : vector<2x2xf32>
    %c0_185 = arith.constant 0 : index
    %c0_186 = arith.constant 0 : index
    %242 = vector.load %arg4[%c0_185, %c0_186] : memref<2x2xf32, #tpu.memory_space<vmem>>, vector<2x2xf32>
    tpu.vector_store %arg4[%c0_185, %c0_186], %241 {strides = array<i32>} : memref<2x2xf32, #tpu.memory_space<vmem>>, vector<2x2xf32>,
    return
  }
  func.func @transform_0(%arg0: i32) -> (i32, i32, i32) {
    %c0_i32 = arith.constant 0 : i32
    %c0_i32_0 = arith.constant 0 : i32
    %c0_i32_1 = arith.constant 0 : i32
    return %arg0, %c0_i32, %c0_i32_0 : i32, i32, i32
  }
  func.func @transform_1(%arg0: i32) -> (i32, i32) {
    %c0_i32 = arith.constant 0 : i32
    %c0_i32_0 = arith.constant 0 : i32
    %c0_i32_1 = arith.constant 0 : i32
    return %c0_i32, %c0_i32_0 : i32, i32
  }
  func.func @transform_2(%arg0: i32) -> (i32, i32) {
    %c0_i32 = arith.constant 0 : i32
    %c0_i32_0 = arith.constant 0 : i32
    %c0_i32_1 = arith.constant 0 : i32
    return %c0_i32, %c0_i32_0 : i32, i32
  }
  func.func @transform_3(%arg0: i32) -> (i32, i32) {
    %c0_i32 = arith.constant 0 : i32
    %c0_i32_0 = arith.constant 0 : i32
    return %arg0, %c0_i32 : i32, i32
  }
}

</mosaic_0001>

<bundles_post_ra>
// kernel: cnn_lassonet_forward.1
= control target key start
LH: loop header
LB: loop body
LE: loop exit
PB: predicated region body
PF: predicated region fallthrough
CT: control target
= control target key end

     0   :  { %8 = vsyncpa [#allocation8], 0  ;;  %s7418_s0 = inlined_call_operand.vmem [shape: f32[2,58,20], index: 0, kind: input, shape index: {}]   ;;  %s7419_s1 = inlined_call_operand.vmem [shape: f32[16,128], index: 1, kind: input, shape index: {}]   ;;  %s7420_s2 = inlined_call_operand.hbm [shape: f32[760,128], index: 2, kind: input, shape index: {}]   ;;  %s7421_s3 = inlined_call_operand.hbm [shape: f32[2,2], index: 3, kind: output, shape index: {}]  }
   0x1   :  { %9 = vsyncpa [#allocation9], 0  ;;  %s6330_s12 = smov [#allocation7]   ;;  %s6282_s16 = scalar_lea.hbm %s7420_s2, 12160 }
   0x2   :  { %s19_s13 = sshll.u32 %s6330_s12, 4  ;;  %p6283_p0 = scmp.ne.s32.totalorder %s7420_s2, %s6282_s16  ;;  %s20_s13 = int_to_ptr.vmem [resolvable:$true] %s19_s13 }
   0x3   :  { %p6286_p1 = scmp.lt.u32.totalorder %s6282_s16, %s7420_s2 }
   0x5   :  { %p6288_p2 = pnand %p6286_p1, %p6283_p0 }
   0x7   :  { %6291 = shalt.err (!%p6288_p2)
}
   0x8   :  { %s6292_s21 = scalar_lea.vmem %s20_s13, 12160  ;;  %p6297_p4 = scmp.lt.s32.totalorder %s20_s13, %s20_s13 }
   0x9   :  { %p6293_p3 = scmp.ne.s32.totalorder %s20_s13, %s6292_s21  ;;  %p6298_p5 = scmp.lt.s32.totalorder %s6292_s21, %s6292_s21 }
   0xb   :  { %p6299_p6 = por %p6298_p5, %p6297_p4 }
   0xd   :  { %p6300_p7 = pnand %p6299_p6, %p6293_p3 }
   0xf   :  { %6303 = shalt.err (!%p6300_p7)
}
  0x10   :  { %s6331_s22 = smov 128   ;;  %s6332_s23 = smov 8  }
  0x11   :  { %25 = dma.hbm_to_vmem [thread:$0]  %s7420_s2, 12160, %s20_s13, [#allocation8], %s6331_s22, %s6331_s22, %s6332_s23  }
  0x12   :  { %6326 = dma.done.wait [#allocation8], 12160  }
  0x13   :  { %6327 = vsyncadd [#allocation8], 4294955136  ;;  %v6333_v0 = vmov 0   ;;  %v118_v1 = vld [vmem:[#allocation7 + $0x2c8] sm:$0xff]  ;;  %v116_v2 = vld [vmem:[#allocation7 + $0x2b8] sm:$0xff]  ;;  %vm351_vm0 = vcmask 1043456  }
  0x14   :  { %6281 = vset.pattern.permute.xlu1 %v6333_v0  ;;  %6280 = vset.pattern.permute.xlu0 %v6333_v0  ;;  %v119_v3 = vld [vmem:[#allocation7 + $0x2d0] sm:$0xff]  ;;  %v117_v4 = vld [vmem:[#allocation7 + $0x2c0] sm:$0xff]  ;;  %v120_v6 = vld [vmem:[#allocation7 + $0x2d8] sm:$0xff]  ;;  %vm66_vm1 = vcmask 162816   ;;  %v6334_v16 = vmov 0.0   ;;  %vm88_vm2 = vcmask 156672  }
  0x15   :  { %136 = vperm.xlu1 %6281, %v118_v1   ;;  %126 = vperm.xlu0 %6280, %v116_v2   ;;  %v121_v5 = vld [vmem:[#allocation7 + $0x2e0] sm:$0xff]  ;;  %v123_v7 = vld [vmem:[#allocation7 + $0x2f0] sm:$0x3]  ;;  %v122_v8 = vld [vmem:[#allocation7 + $0x2e8] sm:$0xff]  ;;  %264 = vst.msk [vmem:[#allocation2 + $0x80] sm:$0xff] %vm66_vm1, %v6334_v16  ;;  %vm180_vm3 = vcmask 1042432  }
  0x16   :  { %v300_v9 = vld [vmem:[#allocation7 + $0x14] sm:$0xff]  ;;  %v301_v10 = vld [vmem:[#allocation7 + $0x1c] sm:$0xff]  ;;  %v302_v12 = vld [vmem:[#allocation7 + $0x24] sm:$0xf]  ;;  %vm205_vm4 = vcmask 1044480   ;;  %vm1930_vm5 = vcmask 97280  }
  0x17   :  { %v6049_v11 = vpack.c.bf16 %v301_v10, %v300_v9  ;;  %v281_v13 = vld [vmem:[#allocation7] sm:$0xff]  ;;  %v282_v14 = vld [vmem:[#allocation7 + $0x8] sm:$0xff]  ;;  %v6383_v17 = vld [vmem:[%s7418_s0] sm:$0xff]  ;;  %2006 = vst.msk [vmem:[#allocation4 + $0x20] sm:$0xff] %vm1930_vm5, %v6334_v16  ;;  %vm6336_vm6 = vmmov 1   ;;  %vm6337_vm8 = vmmov 0  }
  0x18   :  { %v6375_v15 = vpack.c.bf16 %v282_v14, %v281_v13  ;;  %v4961_v18 = vld [vmem:[%s7419_s1] ss:$0 sm:$0xff]  ;;  %v6392_v20 = vld [vmem:[%s7418_s0 + $0x10] sm:$0xff]  ;;  %v6397_v21 = vld [vmem:[%s7418_s0 + $0x8] sm:$0xff]  ;;  %2027 = vst.msk [vmem:[#allocation4 + $0x48] sm:$0xff] %vm1930_vm5, %v6334_v16  ;;  %vm3181_vm9 = vcmask 195584  }
  0x19   :  { %141 = vperm.xlu1 %6281, %v119_v3   ;;  %131 = vperm.xlu0 %6280, %v117_v4   ;;  %v50_v19 = vmul.f32 %v4961_v18, %v6383_v17  ;;  %v52_v23 = vmul.f32 %v4961_v18, %v6392_v20  ;;  %v51_v24 = vmul.f32 %v4961_v18, %v6397_v21  ;;  %v6405_v25 = vld [vmem:[%s7418_s0 + $0x18] sm:$0xff]  ;;  %v6410_v26 = vld [vmem:[%s7418_s0 + $0x20] sm:$0xff]  ;;  %v6419_v31 = vld [vmem:[%s7418_s0 + $0x28] sm:$0xff]  ;;  %vm3226_vm10 = vcmask 1040384   ;;  %s6338_s28 = smov [#allocation10]  }
  0x1a   :  { %6050 = vmatprep.subr.bf16.mxu0 %v6049_v11  ;;  %6171 = vmatprep.subr.bf16.mxu1 %v6049_v11  ;;  %v53_v28 = vmul.f32 %v4961_v18, %v6405_v25  ;;  %v54_v30 = vmul.f32 %v4961_v18, %v6410_v26  ;;  %v6424_v32 = vld [vmem:[%s7418_s0 + $0x30] sm:$0xff]  ;;  %v55_v34 = vmul.f32 %v4961_v18, %v6419_v31  ;;  %v6433_v37 = vld [vmem:[%s7418_s0 + $0x38] sm:$0x3]  ;;  %v6438_v38 = vld [vmem:[%s7418_s0 + $0x40] sm:$0xff]  ;;  %vm3219_vm11 = vcmask 191488   ;;  %s4952_s29 = sshll.u32 %s6338_s28, 4  ;;  %s4953_s29 = int_to_ptr.vmem [resolvable:$true] %s4952_s29 }
  0x1b   :  { %6052 = vmatpush3.bf16.msra.mxu0 %v6049_v11  ;;  %6173 = vmatpush3.bf16.msra.mxu1 %v6049_v11  ;;  %v67_v22 = vsel %vm66_vm1, %v50_v19, 0.0  ;;  %v73_v27 = vsel %vm66_vm1, %v52_v23, 0.0  ;;  %v70_v29 = vsel %vm66_vm1, %v51_v24, 0.0  ;;  %v56_v36 = vmul.f32 %v4961_v18, %v6424_v32  ;;  %v6447_v43 = vld [vmem:[%s7418_s0 + $0x48] sm:$0xff]  ;;  %v39_v44 = vld [vmem:[%s7418_s0 + $0x50] sm:$0xff]  ;;  %v40_v49 = vld [vmem:[%s7418_s0 + $0x58] sm:$0xff]  ;;  %p6309_p9 = scmp.lt.s32.totalorder %s4953_s29, %s4953_s29 }
  0x1c   :  { %5465 = vmatprep.subr.msk.mxu0 %vm351_vm0, %v302_v12  ;;  %6172 = vmatprep.subr.msk.mxu1 %vm351_vm0, %v302_v12  ;;  %v76_v33 = vsel %vm66_vm1, %v53_v28, 0.0  ;;  %v79_v35 = vsel %vm66_vm1, %v54_v30, 0.0  ;;  %v82_v39 = vsel %vm66_vm1, %v55_v34, 0.0  ;;  %v57_v40 = vmul.f32 %v4961_v18, %v6433_v37  ;;  %v6461_v50 = vld [vmem:[%s7418_s0 + $0x60] sm:$0xff]  ;;  %v6469_v55 = vld [vmem:[%s7418_s0 + $0x68] sm:$0xff]  ;;  %v6474_v56 = vld [vmem:[%s7418_s0 + $0x70] sm:$0xff] }
  0x1d   :  { %151 = vperm.xlu1 %6281, %v121_v5   ;;  %146 = vperm.xlu0 %6280, %v120_v6   ;;  %v85_v41 = vsel %vm66_vm1, %v56_v36, 0.0  ;;  %v58_v42 = vmul.f32 %v4961_v18, %v6438_v38  ;;  %v59_v46 = vmul.f32 %v4961_v18, %v6447_v43  ;;  %v60_v48 = vmul.f32 %v4961_v18, %v39_v44  ;;  %v6483_v61 = vld [vmem:[%s7418_s0 + $0x78] sm:$0x3]  ;;  %v5174_v2 = vld [vmem:[%s7419_s1 + $0xb] ss:$0 sm:$0xff]  ;;  %vm6790_vm7 = vmpackc.low %vm351_vm0, %vm6336_vm6  ;;  %s6304_s30 = scalar_lea.vmem %s4953_s29, 32 }
  0x1e   :  { %v89_v45 = vsel %vm88_vm2, %v57_v40, 0.0  ;;  %v61_v52 = vmul.f32 %v4961_v18, %v40_v49  ;;  %v62_v54 = vmul.f32 %v4961_v18, %v6461_v50  ;;  %v63_v58 = vmul.f32 %v4961_v18, %v6469_v55  ;;  %v5176_v3 = vld [vmem:[%s7419_s1 + $0xc] ss:$0 sm:$0xff]  ;;  %p6305_p8 = scmp.ne.s32.totalorder %s4953_s29, %s6304_s30  ;;  %p6310_p10 = scmp.lt.s32.totalorder %s6304_s30, %s6304_s30 }
  0x1f   :  { %5466 = vmatpush3.msk.msra.mxu0 %vm351_vm0, %v302_v12  ;;  %6174 = vmatpush3.msk.msra.mxu1 %vm351_vm0, %v302_v12  ;;  %v92_v47 = vsel %vm66_vm1, %v58_v42, 0.0  ;;  %v95_v51 = vsel %vm66_vm1, %v59_v46, 0.0  ;;  %v98_v53 = vsel %vm66_vm1, %v60_v48, 0.0  ;;  %v64_v60 = vmul.f32 %v4961_v18, %v6474_v56 }
  0x20   :  { %6054 = vmatprep.subr.bf16.mxu0 %v6375_v15  ;;  %v101_v57 = vsel %vm66_vm1, %v61_v52, 0.0  ;;  %v104_v59 = vsel %vm66_vm1, %v62_v54, 0.0  ;;  %v107_v62 = vsel %vm66_vm1, %v63_v58, 0.0  ;;  %v65_v63 = vmul.f32 %v4961_v18, %v6483_v61  ;;  %p6311_p11 = por %p6310_p10, %p6309_p9 }
  0x21   :  { %161 = vperm.xlu1 %6281, %v123_v7   ;;  %156 = vperm.xlu0 %6280, %v122_v8   ;;  %v110_v0 = vsel %vm66_vm1, %v64_v60, 0.0  ;;  %vm4627_vm12 = vcmask 130112   ;;  %vm4634_vm13 = vcmask 195712   ;;  %vm4641_vm14 = vcmask 261312  }
  0x22   :  { %v113_v1 = vsel %vm88_vm2, %v65_v63, 0.0  ;;  %vm4648_vm15 = vcmask 326912   ;;  %vm4669_vm2 = vcmask 523712   ;;  %vm4936_vm6 = vcmask 7168   ;;  %p6312_p12 = pnand %p6311_p11, %p6305_p8 }
  0x40   :  { %68 = vadd.xlane.f32.xlu0 %v67_v22 }
  0x44   :  { %74 = vadd.xlane.f32.xlu0 %v73_v27 }
  0x45   :  { %71 = vadd.xlane.f32.xlu1 %v70_v29 }
  0x48   :  { %77 = vadd.xlane.f32.xlu0 %v76_v33 }
  0x49   :  { %80 = vadd.xlane.f32.xlu1 %v79_v35 }
  0x4c   :  { %83 = vadd.xlane.f32.xlu0 %v82_v39 }
  0x4d   :  { %86 = vadd.xlane.f32.xlu1 %v85_v41 }
  0x50   :  { %90 = vadd.xlane.f32.xlu0 %v89_v45 }
  0x51   :  { %93 = vadd.xlane.f32.xlu1 %v92_v47 }
  0x54   :  { %96 = vadd.xlane.f32.xlu0 %v95_v51 }
  0x55   :  { %99 = vadd.xlane.f32.xlu1 %v98_v53 }
  0x58   :  { %102 = vadd.xlane.f32.xlu0 %v101_v57 }
  0x59   :  { %105 = vadd.xlane.f32.xlu1 %v104_v59 }
  0x5c   :  { %108 = vadd.xlane.f32.xlu0 %v107_v62 }
  0x5d   :  { %111 = vadd.xlane.f32.xlu1 %v110_v0 }
  0x60   :  { %114 = vadd.xlane.f32.xlu0 %v113_v1 }
  0x6e   :  { %4502 = vbcast.lane.b32.xlu1 %v5174_v2, 264 }
  0x72   :  { %4506 = vbcast.lane.b32.xlu1 %v5174_v2, 272 }
  0x76   :  { %4498 = vbcast.lane.b32.xlu0 %v5174_v2, 256  ;;  %4514 = vbcast.lane.b32.xlu1 %v5174_v2, 288 }
  0x7a   :  { %4510 = vbcast.lane.b32.xlu0 %v5174_v2, 280  ;;  %4738 = vbcast.lane.b32.xlu1 %v5176_v3, 264 }
  0x7e   :  { %4746 = vbcast.lane.b32.xlu1 %v5176_v3, 280  ;;  %4734 = vbcast.lane.b32.xlu0 %v5176_v3, 256 }
  0x82   :  { %4518 = vbcast.lane.b32.xlu1 %v5174_v2, 296  ;;  %4742 = vbcast.lane.b32.xlu0 %v5176_v3, 272 }
  0x86   :  { %4522 = vbcast.lane.b32.xlu1 %v5174_v2, 304  ;;  %4750 = vbcast.lane.b32.xlu0 %v5176_v3, 288 }
  0x8a   :  { %4526 = vbcast.lane.b32.xlu1 %v5174_v2, 312  ;;  %4754 = vbcast.lane.b32.xlu0 %v5176_v3, 296 }
  0x8e   :  { %4758 = vbcast.lane.b32.xlu0 %v5176_v3, 304 }
  0x92   :  { %4762 = vbcast.lane.b32.xlu0 %v5176_v3, 312  ;;  %v283_v3 = vld [vmem:[#allocation7 + $0x10] sm:$0xf] }
  0x94   :  { %v137_v4 = vpop.permute.xlu1 %136  ;;  %v127_v5 = vpop.permute.xlu0 %126 }
  0x95   :  { %v166_v6 = vmul.f32 %v137_v4, %v6392_v20  ;;  %v217_v7 = vmul.f32 %v137_v4, %v39_v44  ;;  %v164_v8 = vmul.f32 %v127_v5, %v6383_v17  ;;  %v215_v9 = vmul.f32 %v127_v5, %v6438_v38  ;;  %v712_v5 = vld [vmem:[#allocation7 + $0x28] sm:$0xff] }
  0x97   :  { %v181_v10 = vrot.slane %v164_v8, 5  ;;  %v231_v11 = vrot.slane %v215_v9, 5  ;;  %v184_v12 = vrot.slane %v166_v6, 5  ;;  %v234_v13 = vrot.slane %v217_v7, 5  ;;  %v713_v6 = vld [vmem:[#allocation7 + $0x30] sm:$0xff] }
  0x98   :  { %v142_v14 = vpop.permute.xlu1 %141  ;;  %v132_v18 = vpop.permute.xlu0 %131 }
  0x99   :  { %v204_v19 = vsel %vm180_vm3, 0.0, %v181_v10  ;;  %v254_v22 = vsel %vm180_vm3, 0.0, %v231_v11  ;;  %v167_v23 = vmul.f32 %v142_v14, %v6405_v25  ;;  %v218_v24 = vmul.f32 %v142_v14, %v40_v49 }
  0x9a   :  { %207 = vst.msk [vmem:[#allocation2] sm:$0xff] %vm66_vm1, %v204_v19  ;;  %256 = vst.msk [vmem:[#allocation2 + $0x40] sm:$0xff] %vm66_vm1, %v254_v22  ;;  %v165_v17 = vmul.f32 %v132_v18, %v6397_v21  ;;  %v216_v20 = vmul.f32 %v132_v18, %v6447_v43 }
  0x9b   :  { %v186_v27 = vrot.slane %v167_v23, 5  ;;  %v236_v28 = vrot.slane %v218_v24, 5 }
  0x9c   :  { %v182_v29 = vrot.slane %v165_v17, 5  ;;  %v232_v30 = vrot.slane %v216_v20, 5  ;;  %v152_v33 = vpop.permute.xlu1 %151  ;;  %v147_v34 = vpop.permute.xlu0 %146  ;;  %v714_v17 = vld [vmem:[#allocation7 + $0x38] sm:$0xf] }
  0x9d   :  { %v187_v35 = vsel %vm180_vm3, %v184_v12, %v186_v27  ;;  %v237_v36 = vsel %vm180_vm3, %v234_v13, %v236_v28  ;;  %v169_v25 = vmul.f32 %v152_v33, %v6419_v31  ;;  %v220_v38 = vmul.f32 %v152_v33, %v6469_v55 }
  0x9e   :  { %210 = vst.msk [vmem:[#allocation2 + $0x18] sm:$0xff] %vm66_vm1, %v187_v35  ;;  %259 = vst.msk [vmem:[#allocation2 + $0x58] sm:$0xff] %vm66_vm1, %v237_v36  ;;  %v183_v21 = vsel %vm180_vm3, %v181_v10, %v182_v29  ;;  %v185_v39 = vsel %vm180_vm3, %v182_v29, %v184_v12  ;;  %v233_v40 = vsel %vm180_vm3, %v231_v11, %v232_v30 }
  0x9f   :  { %v235_v41 = vsel %vm180_vm3, %v232_v30, %v234_v13  ;;  %208 = vst.msk [vmem:[#allocation2 + $0x8] sm:$0xff] %vm66_vm1, %v183_v21  ;;  %209 = vst.msk [vmem:[#allocation2 + $0x10] sm:$0xff] %vm66_vm1, %v185_v39  ;;  %v190_v31 = vrot.slane %v169_v25, 5  ;;  %v240_v42 = vrot.slane %v220_v38, 5  ;;  %v168_v43 = vmul.f32 %v147_v34, %v6410_v26 }
  0xa0   :  { %257 = vst.msk [vmem:[#allocation2 + $0x48] sm:$0xff] %vm66_vm1, %v233_v40  ;;  %258 = vst.msk [vmem:[#allocation2 + $0x50] sm:$0xff] %vm66_vm1, %v235_v41  ;;  %v219_v44 = vmul.f32 %v147_v34, %v6461_v50  ;;  %v162_v45 = vpop.permute.xlu1 %161  ;;  %v157_v46 = vpop.permute.xlu0 %156  ;;  %v6057_v10 = vpack.c.bf16 %v713_v6, %v712_v5 }
  0xa1   :  { %v188_v47 = vrot.slane %v168_v43, 5  ;;  %v171_v49 = vmul.f32 %v162_v45, %v6433_v37  ;;  %v222_v51 = vmul.f32 %v162_v45, %v6483_v61  ;;  %v170_v52 = vmul.f32 %v157_v46, %v6424_v32  ;;  %v265_v24 = vld [vmem:[#allocation2] sm:$0xff] }
  0xa2   :  { %v238_v48 = vrot.slane %v219_v44, 5  ;;  %v221_v53 = vmul.f32 %v157_v46, %v6474_v56  ;;  %v273_v38 = vld [vmem:[#allocation2 + $0x40] sm:$0xff] }
  0xa3   :  { %v189_v54 = vsel %vm180_vm3, %v186_v27, %v188_v47  ;;  %v191_v55 = vsel %vm180_vm3, %v188_v47, %v190_v31  ;;  %v194_v37 = vrot.slane %v171_v49, 5  ;;  %v244_v32 = vrot.slane %v222_v51, 5  ;;  %v943_v27 = vld [vmem:[#allocation7 + $0x3c] sm:$0xff] }
  0xa4   :  { %v239_v26 = vsel %vm180_vm3, %v236_v28, %v238_v48  ;;  %v241_v50 = vsel %vm180_vm3, %v238_v48, %v240_v42  ;;  %211 = vst.msk [vmem:[#allocation2 + $0x20] sm:$0xff] %vm66_vm1, %v189_v54  ;;  %212 = vst.msk [vmem:[#allocation2 + $0x28] sm:$0xff] %vm66_vm1, %v191_v55  ;;  %v192_v57 = vrot.slane %v170_v52, 5  ;;  %v242_v56 = vrot.slane %v221_v53, 5  ;;  %v944_v28 = vld [vmem:[#allocation7 + $0x44] sm:$0xff]  ;;  %v1174_v55 = vld [vmem:[#allocation7 + $0x50] sm:$0xff] }
  0xa5   :  { %260 = vst.msk [vmem:[#allocation2 + $0x60] sm:$0xff] %vm66_vm1, %v239_v26  ;;  %261 = vst.msk [vmem:[#allocation2 + $0x68] sm:$0xff] %vm66_vm1, %v241_v50  ;;  %v6061_v30 = vpack.c.bf16 %v944_v28, %v943_v27  ;;  %v268_v33 = vld [vmem:[#allocation2 + $0x18] sm:$0xff]  ;;  %v945_v53 = vld [vmem:[#allocation7 + $0x4c] sm:$0xf] }
  0xa6   :  { %v193_v58 = vsel %vm180_vm3, %v190_v31, %v192_v57  ;;  %v195_v59 = vsel %vm180_vm3, %v192_v57, %v194_v37  ;;  %v243_v60 = vsel %vm180_vm3, %v240_v42, %v242_v56  ;;  %v245_v61 = vsel %vm180_vm3, %v242_v56, %v244_v32  ;;  %v284_v62 = vld [vmem:[#allocation2 + $0x1] sm:$0xff]  ;;  %v285_v0 = vld [vmem:[#allocation2 + $0x9] sm:$0xff]  ;;  %v286_v4 = vld [vmem:[#allocation2 + $0x11] sm:$0xff] }
  0xa7   :  { %v294_v63 = vld [vmem:[#allocation2 + $0x51] sm:$0xff]  ;;  %v206_v1 = vsel %vm205_vm4, %v195_v59, 0.0  ;;  %213 = vst.msk [vmem:[#allocation2 + $0x30] sm:$0xff] %vm66_vm1, %v193_v58  ;;  %v255_v2 = vsel %vm205_vm4, %v245_v61, 0.0  ;;  %262 = vst.msk [vmem:[#allocation2 + $0x70] sm:$0xff] %vm66_vm1, %v243_v60  ;;  %5467 = vmatprep.mubr.msk.f32.mxu0 %vm66_vm1, %v284_v62  ;;  %v292_v22 = vld [vmem:[#allocation2 + $0x41] sm:$0xff] }
  0xa8   :  { %5482 = vmatprep.mubr.msk.f32.mxu1 %vm66_vm1, %v294_v63  ;;  %214 = vst.msk [vmem:[#allocation2 + $0x38] sm:$0xff] %vm66_vm1, %v206_v1  ;;  %263 = vst.msk [vmem:[#allocation2 + $0x78] sm:$0xff] %vm66_vm1, %v255_v2  ;;  %5468 = vmatmul.mubr.msk.f32.vlgmr.msra.gmra.mrb[0].mxu0 %vm66_vm1, %v285_v0  ;;  %v293_v23 = vld [vmem:[#allocation2 + $0x49] sm:$0xff]  ;;  %v276_v41 = vld [vmem:[#allocation2 + $0x58] sm:$0xff]  ;;  %vm4487_vm4 = vcmask 517120  }
  0xa9   :  { %5470 = vmatprep.mubr.msk.f32.mxu0 %vm66_vm1, %v286_v4  ;;  %6056 = vmatpush3.bf16.msra.mxu0 %v6375_v15  ;;  %v266_v20 = vld [vmem:[#allocation2 + $0x8] sm:$0xff]  ;;  %v267_v29 = vld [vmem:[#allocation2 + $0x10] sm:$0xff]  ;;  %v1175_v26 = vld [vmem:[#allocation7 + $0x58] sm:$0xff] }
  0xaa   :  { %5495 = vmatprep.subr.msk.mxu0 %vm351_vm0, %v283_v3  ;;  %v274_v21 = vld [vmem:[#allocation2 + $0x48] sm:$0xff]  ;;  %v275_v39 = vld [vmem:[#allocation2 + $0x50] sm:$0xff]  ;;  %v6065_v57 = vpack.c.bf16 %v1175_v26, %v1174_v55 }
  0xab   :  { %v287_v8 = vld [vmem:[#allocation2 + $0x19] sm:$0xff]  ;;  %v288_v11 = vld [vmem:[#allocation2 + $0x21] sm:$0xff]  ;;  %v697_v54 = vld [vmem:[#allocation2 + $0xa] sm:$0xff] }
  0xac   :  { %v295_v7 = vld [vmem:[#allocation2 + $0x59] sm:$0xff]  ;;  %v296_v9 = vld [vmem:[#allocation2 + $0x61] sm:$0xff]  ;;  %5471 = vmatmul.mubr.msk.f32.gmra.mrb[2].mxu0 %vm66_vm1, %v287_v8  ;;  %v705_v5 = vld [vmem:[#allocation2 + $0x4a] sm:$0xff] }
  0xad   :  { %5483 = vmatmul.mubr.msk.f32.vlgmr.msra.gmra.mrb[0].mxu1 %vm66_vm1, %v295_v7  ;;  %5473 = vmatprep.mubr.msk.f32.mxu0 %vm66_vm1, %v288_v11  ;;  %v269_v34 = vld [vmem:[#allocation2 + $0x20] sm:$0xff]  ;;  %v270_v35 = vld [vmem:[#allocation2 + $0x28] sm:$0xff]  ;;  %v698_v50 = vld [vmem:[#allocation2 + $0x12] sm:$0xff] }
  0xae   :  { %5485 = vmatprep.mubr.msk.f32.mxu1 %vm66_vm1, %v296_v9  ;;  %v297_v12 = vld [vmem:[#allocation2 + $0x69] sm:$0xff]  ;;  %5496 = vmatpush3.msk.msra.mxu0 %vm351_vm0, %v283_v3  ;;  %v277_v31 = vld [vmem:[#allocation2 + $0x60] sm:$0xff]  ;;  %v706_v6 = vld [vmem:[#allocation2 + $0x52] sm:$0xff] }
  0xaf   :  { %v289_v13 = vld [vmem:[#allocation2 + $0x29] sm:$0xff]  ;;  %v298_v15 = vld [vmem:[#allocation2 + $0x71] sm:$0xff]  ;;  %6058 = vmatprep.subr.bf16.mxu0 %v6057_v10  ;;  %v299_v18 = vld [vmem:[#allocation2 + $0x79] sm:$0xff] }
  0xb0   :  { %v290_v14 = vld [vmem:[#allocation2 + $0x31] sm:$0xff]  ;;  %5474 = vmatmul.mubr.msk.f32.gmra.mrb[4].mxu0 %vm66_vm1, %v289_v13  ;;  %v291_v19 = vld [vmem:[#allocation2 + $0x39] sm:$0xff]  ;;  %v278_v44 = vld [vmem:[#allocation2 + $0x68] sm:$0xff] }
  0xb1   :  { %5486 = vmatmul.mubr.msk.f32.gmra.mrb[2].mxu1 %vm66_vm1, %v297_v12  ;;  %5476 = vmatprep.mubr.msk.f32.mxu0 %vm66_vm1, %v290_v14  ;;  %v271_v36 = vld [vmem:[#allocation2 + $0x30] sm:$0xff]  ;;  %v272_v25 = vld [vmem:[#allocation2 + $0x38] sm:$0xff]  ;;  %v696_v49 = vld [vmem:[#allocation2 + $0x2] sm:$0xff] }
  0xb2   :  { %5488 = vmatprep.mubr.msk.f32.mxu1 %vm66_vm1, %v298_v15  ;;  %v279_v45 = vld [vmem:[#allocation2 + $0x70] sm:$0xff]  ;;  %v280_v48 = vld [vmem:[#allocation2 + $0x78] sm:$0xff]  ;;  %v700_v58 = vld [vmem:[#allocation2 + $0x22] sm:$0xff] }
  0xb3   :  { %v699_v56 = vld [vmem:[#allocation2 + $0x1a] sm:$0xff]  ;;  %v701_v61 = vld [vmem:[#allocation2 + $0x2a] sm:$0xff]  ;;  %v702_v62 = vld [vmem:[#allocation2 + $0x32] sm:$0xff] }
  0xb4   :  { %5477 = vmatmul.mubr.msk.f32.gmra.mrb[6].mxu0 %vm66_vm1, %v291_v19  ;;  %v703_v1 = vld [vmem:[#allocation2 + $0x3a] sm:$0xff]  ;;  %v704_v2 = vld [vmem:[#allocation2 + $0x42] sm:$0xff]  ;;  %v709_v14 = vld [vmem:[#allocation2 + $0x6a] sm:$0xff] }
  0xb5   :  { %5489 = vmatmul.mubr.msk.f32.gmra.mrb[4].mxu1 %vm66_vm1, %v299_v18  ;;  %5479 = vmatprep.mubr.msk.f32.mxu0 %vm66_vm1, %v292_v22  ;;  %v708_v11 = vld [vmem:[#allocation2 + $0x62] sm:$0xff]  ;;  %v710_v19 = vld [vmem:[#allocation2 + $0x72] sm:$0xff] }
  0xb6   :  { %v927_v27 = vld [vmem:[#allocation2 + $0x3] sm:$0xff]  ;;  %5675 = vmatprep.mubr.msk.f32.mxu1 %vm6337_vm8, %v6334_v16 }
  0xb8   :  { %5480 = vmatmul.mubr.msk.f32.gmra.mrb[8].mxu0 %vm66_vm1, %v293_v23 }
  0xb9   :  { %5497 = vmatprep.mubr.msk.f32.mxu0 %vm66_vm1, %v265_v24 }
  0xbc   :  { %5498 = vmatmul.mubr.msk.f32.vlgmr.msra.gmra.mrb[0].mxu0 %vm66_vm1, %v266_v20 }
  0xbd   :  { %5500 = vmatprep.mubr.msk.f32.mxu0 %vm66_vm1, %v267_v29  ;;  %6060 = vmatpush3.bf16.msra.mxu0 %v6057_v10  ;;  %v707_v10 = vld [vmem:[#allocation2 + $0x5a] sm:$0xff]  ;;  %v1176_v29 = vld [vmem:[#allocation7 + $0x60] sm:$0xf] }
  0xbe   :  { %5525 = vmatprep.subr.msk.mxu0 %vm351_vm0, %v714_v17 }
  0xc0   :  { %5501 = vmatmul.mubr.msk.f32.gmra.mrb[2].mxu0 %vm66_vm1, %v268_v33  ;;  %v1405_v33 = vld [vmem:[#allocation7 + $0x64] sm:$0xff] }
  0xc1   :  { %5503 = vmatprep.mubr.msk.f32.mxu0 %vm66_vm1, %v269_v34  ;;  %5526 = vmatpush3.msk.msra.mxu0 %vm351_vm0, %v714_v17  ;;  %v711_v17 = vld [vmem:[#allocation2 + $0x7a] sm:$0xff] }
  0xc2   :  { %6062 = vmatprep.subr.bf16.mxu0 %v6061_v30  ;;  %v1406_v34 = vld [vmem:[#allocation7 + $0x6c] sm:$0xff] }
  0xc4   :  { %5504 = vmatmul.mubr.msk.f32.gmra.mrb[4].mxu0 %vm66_vm1, %v270_v35  ;;  %v929_v35 = vld [vmem:[#allocation2 + $0x13] sm:$0xff] }
  0xc5   :  { %5506 = vmatprep.mubr.msk.f32.mxu0 %vm66_vm1, %v271_v36 }
  0xc8   :  { %5507 = vmatmul.mubr.msk.f32.gmra.mrb[6].mxu0 %vm66_vm1, %v272_v25  ;;  %v6653_v25 = vpack.c.bf16 %v1406_v34, %v1405_v33 }
  0xc9   :  { %5509 = vmatprep.mubr.msk.f32.mxu0 %vm66_vm1, %v273_v38  ;;  %v930_v38 = vld [vmem:[#allocation2 + $0x1b] sm:$0xff] }
  0xcc   :  { %5510 = vmatmul.mubr.msk.f32.gmra.mrb[8].mxu0 %vm66_vm1, %v274_v21  ;;  %v931_v21 = vld [vmem:[#allocation2 + $0x23] sm:$0xff] }
  0xcd   :  { %5512 = vmatprep.mubr.msk.f32.mxu0 %vm66_vm1, %v275_v39  ;;  %v6575_v40 = vpop.xlane.xlu0 %68 }
  0xd0   :  { %5513 = vmatmul.mubr.msk.f32.gmra.mrb[10].mxu0 %vm66_vm1, %v276_v41 }
  0xd1   :  { %5515 = vmatprep.mubr.msk.f32.mxu0 %vm66_vm1, %v277_v31  ;;  %v6579_v42 = vpop.xlane.xlu0 %74  ;;  %v932_v31 = vld [vmem:[#allocation2 + $0x2b] sm:$0xff] }
  0xd2   :  { %v6581_v43 = vpop.xlane.xlu1 %71 }
  0xd4   :  { %5516 = vmatmul.mubr.msk.f32.gmra.mrb[12].mxu0 %vm66_vm1, %v278_v44  ;;  %v933_v44 = vld [vmem:[#allocation2 + $0x33] sm:$0xff] }
  0xd5   :  { %5518 = vmatprep.mubr.msk.f32.mxu0 %vm66_vm1, %v279_v45  ;;  %v6585_v46 = vpop.xlane.xlu0 %77 }
  0xd6   :  { %v6587_v47 = vpop.xlane.xlu1 %80 }
  0xd8   :  { %5519 = vmatmul.mubr.msk.f32.gmra.mrb[14].mxu0 %vm66_vm1, %v280_v48 }
  0xd9   :  { %5527 = vmatprep.mubr.msk.f32.mxu0 %vm66_vm1, %v696_v49  ;;  %v6591_v51 = vpop.xlane.xlu0 %83  ;;  %v934_v49 = vld [vmem:[#allocation2 + $0x3b] sm:$0xff] }
  0xda   :  { %v6593_v52 = vpop.xlane.xlu1 %86 }
  0xdc   :  { %5528 = vmatmul.mubr.msk.f32.vlgmr.msra.gmra.mrb[0].mxu0 %vm66_vm1, %v697_v54 }
  0xdd   :  { %5530 = vmatprep.mubr.msk.f32.mxu0 %vm66_vm1, %v698_v50  ;;  %6064 = vmatpush3.bf16.msra.mxu0 %v6061_v30  ;;  %v6597_v37 = vpop.xlane.xlu0 %90  ;;  %v928_v30 = vld [vmem:[#allocation2 + $0xb] sm:$0xff] }
  0xde   :  { %v6599_v32 = vpop.xlane.xlu1 %93  ;;  %5555 = vmatprep.subr.msk.mxu0 %vm351_vm0, %v945_v53 }
  0xe0   :  { %5531 = vmatmul.mubr.msk.f32.gmra.mrb[2].mxu0 %vm66_vm1, %v699_v56  ;;  %v937_v56 = vld [vmem:[#allocation2 + $0x53] sm:$0xff] }
  0xe1   :  { %5533 = vmatprep.mubr.msk.f32.mxu0 %vm66_vm1, %v700_v58  ;;  %v6604_v59 = vpop.xlane.xlu0 %96  ;;  %5556 = vmatpush3.msk.msra.mxu0 %vm351_vm0, %v945_v53  ;;  %v935_v53 = vld [vmem:[#allocation2 + $0x43] sm:$0xff] }
  0xe2   :  { %v6607_v60 = vpop.xlane.xlu1 %99  ;;  %6066 = vmatprep.subr.bf16.mxu0 %v6065_v57 }
  0xe4   :  { %5534 = vmatmul.mubr.msk.f32.gmra.mrb[4].mxu0 %vm66_vm1, %v701_v61 }
  0xe5   :  { %5536 = vmatprep.mubr.msk.f32.mxu0 %vm66_vm1, %v702_v62  ;;  %v6611_v63 = vpop.xlane.xlu0 %102  ;;  %v938_v62 = vld [vmem:[#allocation2 + $0x5b] sm:$0xff] }
  0xe6   :  { %v6613_v0 = vpop.xlane.xlu1 %105 }
  0xe8   :  { %5537 = vmatmul.mubr.msk.f32.gmra.mrb[6].mxu0 %vm66_vm1, %v703_v1  ;;  %v939_v1 = vld [vmem:[#allocation2 + $0x63] sm:$0xff] }
  0xe9   :  { %5539 = vmatprep.mubr.msk.f32.mxu0 %vm66_vm1, %v704_v2  ;;  %v6617_v3 = vpop.xlane.xlu0 %108 }
  0xea   :  { %v6619_v4 = vpop.xlane.xlu1 %111 }
  0xec   :  { %5540 = vmatmul.mubr.msk.f32.gmra.mrb[8].mxu0 %vm66_vm1, %v705_v5 }
  0xed   :  { %5542 = vmatprep.mubr.msk.f32.mxu0 %vm66_vm1, %v706_v6  ;;  %v6623_v7 = vpop.xlane.xlu0 %114  ;;  %v940_v6 = vld [vmem:[#allocation2 + $0x6b] sm:$0xff] }
  0xee   :  { %v6625_v8 = vpop.permute.xlu1 %4502 }
  0xef   :  { %v4537_v9 = vmul.f32 %v6625_v8, %v6581_v43  ;;  %v4545_v61 = vmul.f32 %v6625_v8, %v6604_v59 }
  0xf0   :  { %5543 = vmatmul.mubr.msk.f32.gmra.mrb[10].mxu0 %vm66_vm1, %v707_v10 }
  0xf1   :  { %5545 = vmatprep.mubr.msk.f32.mxu0 %vm66_vm1, %v708_v11  ;;  %4572 = vperm.xlu0 %6280, %v4537_v9   ;;  %v4499_v12 = vpop.permute.xlu0 %4498  ;;  %v1158_v11 = vld [vmem:[#allocation2 + $0x4] sm:$0xff] }
  0xf2   :  { %v4536_v13 = vmul.f32 %v4499_v12, %v6575_v40  ;;  %v6632_v15 = vpop.permute.xlu1 %4506  ;;  %v4544_v54 = vmul.f32 %v4499_v12, %v6599_v32 }
  0xf3   :  { %v4538_v18 = vmul.f32 %v6632_v15, %v6579_v42  ;;  %v4546_v8 = vmul.f32 %v6632_v15, %v6607_v60  ;;  %v1160_v15 = vld [vmem:[#allocation2 + $0x14] sm:$0xff] }
  0xf4   :  { %5546 = vmatmul.mubr.msk.f32.gmra.mrb[12].mxu0 %vm66_vm1, %v709_v14  ;;  %4569 = vperm.xlu1 %6281, %v4536_v13   ;;  %v1159_v13 = vld [vmem:[#allocation2 + $0xc] sm:$0xff]  ;;  %v1407_v14 = vld [vmem:[#allocation7 + $0x74] sm:$0xf] }
  0xf5   :  { %5548 = vmatprep.mubr.msk.f32.mxu0 %vm66_vm1, %v710_v19  ;;  %v6638_v22 = vpop.permute.xlu0 %4510 }
  0xf6   :  { %v4539_v23 = vmul.f32 %v6638_v22, %v6585_v46  ;;  %v6642_v24 = vpop.permute.xlu1 %4514  ;;  %v4547_v19 = vmul.f32 %v6638_v22, %v6611_v63 }
  0xf7   :  { %v4540_v20 = vmul.f32 %v6642_v24, %v6587_v47  ;;  %v4548_v22 = vmul.f32 %v6642_v24, %v6613_v0  ;;  %v1165_v24 = vld [vmem:[#allocation2 + $0x3c] sm:$0xff] }
  0xf8   :  { %5549 = vmatmul.mubr.msk.f32.gmra.mrb[14].mxu0 %vm66_vm1, %v711_v17  ;;  %4575 = vperm.xlu1 %6281, %v4538_v18   ;;  %v1637_v18 = vld [vmem:[#allocation7 + $0x80] sm:$0xff] }
  0xf9   :  { %5557 = vmatprep.mubr.msk.f32.mxu0 %vm66_vm1, %v927_v27  ;;  %4578 = vperm.xlu0 %6280, %v4539_v23   ;;  %v4735_v26 = vpop.permute.xlu0 %4734  ;;  %v1162_v17 = vld [vmem:[#allocation2 + $0x24] sm:$0xff]  ;;  %v1163_v27 = vld [vmem:[#allocation2 + $0x2c] sm:$0xff] }
  0xfa   :  { %v4739_v28 = vpop.permute.xlu1 %4738  ;;  %v4772_v58 = vmul.f32 %v4735_v26, %v6575_v40  ;;  %v4780_v2 = vmul.f32 %v4735_v26, %v6599_v32  ;;  %v941_v40 = vld [vmem:[#allocation2 + $0x73] sm:$0xff]  ;;  %v942_v32 = vld [vmem:[#allocation2 + $0x7b] sm:$0xff] }
  0xfb   :  { %v4773_v5 = vmul.f32 %v4739_v28, %v6581_v43  ;;  %v4781_v9 = vmul.f32 %v4739_v28, %v6604_v59  ;;  %v1636_v59 = vld [vmem:[#allocation7 + $0x78] sm:$0xff]  ;;  %v1164_v28 = vld [vmem:[#allocation2 + $0x34] sm:$0xff] }
  0xfc   :  { %5558 = vmatmul.mubr.msk.f32.vlgmr.msra.gmra.mrb[0].mxu0 %vm66_vm1, %v928_v30  ;;  %4581 = vperm.xlu1 %6281, %v4540_v20   ;;  %v1391_v26 = vld [vmem:[#allocation2 + $0x15] sm:$0xff] }
  0xfd   :  { %5560 = vmatprep.mubr.msk.f32.mxu0 %vm66_vm1, %v929_v35  ;;  %6068 = vmatpush3.bf16.msra.mxu0 %v6065_v57  ;;  %v936_v57 = vld [vmem:[#allocation2 + $0x4b] sm:$0xff]  ;;  %v4743_v10 = vpop.permute.xlu0 %4742 }
  0xfe   :  { %v6650_v36 = vpop.permute.xlu1 %4746  ;;  %5585 = vmatprep.subr.msk.mxu0 %vm351_vm0, %v1176_v29  ;;  %v4774_v43 = vmul.f32 %v4743_v10, %v6579_v42  ;;  %v4782_v12 = vmul.f32 %v4743_v10, %v6607_v60  ;;  %v1161_v42 = vld [vmem:[#allocation2 + $0x1c] sm:$0xff]  ;;  %v6702_v60 = vpack.c.bf16 %v1637_v18, %v1636_v59  ;;  %v1624_v10 = vld [vmem:[#allocation2 + $0x26] sm:$0xff] }
  0xff   :  { %v4775_v23 = vmul.f32 %v6650_v36, %v6585_v46  ;;  %v4783_v46 = vmul.f32 %v6650_v36, %v6611_v63  ;;  %v1166_v63 = vld [vmem:[#allocation2 + $0x44] sm:$0xff]  ;;  %v1167_v36 = vld [vmem:[#allocation2 + $0x4c] sm:$0xff] }
 0x100   :  { %5561 = vmatmul.mubr.msk.f32.gmra.mrb[2].mxu0 %vm66_vm1, %v930_v38  ;;  %v1631_v59 = vld [vmem:[#allocation2 + $0x5e] sm:$0xff]  ;;  %v1632_v18 = vld [vmem:[#allocation2 + $0x66] sm:$0xff] }
 0x101   :  { %5563 = vmatprep.mubr.msk.f32.mxu0 %vm66_vm1, %v931_v21  ;;  %5586 = vmatpush3.msk.msra.mxu0 %vm351_vm0, %v1176_v29  ;;  %v4751_v20 = vpop.permute.xlu0 %4750  ;;  %v1169_v21 = vld [vmem:[#allocation2 + $0x5c] sm:$0xff] }
 0x102   :  { %v6658_v39 = vpop.permute.xlu1 %4518  ;;  %6070 = vmatprep.subr.bf16.mxu0 %v6653_v25  ;;  %v4776_v29 = vmul.f32 %v4751_v20, %v6587_v47  ;;  %v4784_v30 = vmul.f32 %v4751_v20, %v6613_v0  ;;  %v1168_v47 = vld [vmem:[#allocation2 + $0x54] sm:$0xff] }
 0x103   :  { %v4541_v41 = vmul.f32 %v6658_v39, %v6591_v51  ;;  %v4549_v34 = vmul.f32 %v6658_v39, %v6617_v3  ;;  %v1170_v39 = vld [vmem:[#allocation2 + $0x64] sm:$0xff] }
 0x104   :  { %5564 = vmatmul.mubr.msk.f32.gmra.mrb[4].mxu0 %vm66_vm1, %v932_v31  ;;  %v1171_v31 = vld [vmem:[#allocation2 + $0x6c] sm:$0xff] }
 0x105   :  { %5566 = vmatprep.mubr.msk.f32.mxu0 %vm66_vm1, %v933_v44  ;;  %4584 = vperm.xlu0 %6280, %v4541_v41   ;;  %v4755_v33 = vpop.permute.xlu0 %4754 }
 0x106   :  { %v6665_v45 = vpop.permute.xlu1 %4522  ;;  %v4777_v35 = vmul.f32 %v4755_v33, %v6591_v51  ;;  %v4785_v38 = vmul.f32 %v4755_v33, %v6617_v3 }
 0x107   :  { %v4542_v48 = vmul.f32 %v6665_v45, %v6593_v52 }
 0x108   :  { %5567 = vmatmul.mubr.msk.f32.gmra.mrb[6].mxu0 %vm66_vm1, %v934_v49  ;;  %v1173_v49 = vld [vmem:[#allocation2 + $0x7c] sm:$0xff] }
 0x109   :  { %5569 = vmatprep.mubr.msk.f32.mxu0 %vm66_vm1, %v935_v53  ;;  %4587 = vperm.xlu1 %6281, %v4542_v48   ;;  %v4759_v0 = vpop.permute.xlu0 %4758  ;;  %v1390_v53 = vld [vmem:[#allocation2 + $0xd] sm:$0xff] }
 0x10a   :  { %v6672_v55 = vpop.permute.xlu1 %4526  ;;  %v4778_v51 = vmul.f32 %v4759_v0, %v6593_v52  ;;  %v4786_v41 = vmul.f32 %v4759_v0, %v6619_v4  ;;  %v1389_v52 = vld [vmem:[#allocation2 + $0x5] sm:$0xff] }
 0x10b   :  { %v4543_v50 = vmul.f32 %v6672_v55, %v6597_v37  ;;  %v4551_v3 = vmul.f32 %v6672_v55, %v6623_v7  ;;  %v1393_v55 = vld [vmem:[#allocation2 + $0x25] sm:$0xff] }
 0x10c   :  { %5570 = vmatmul.mubr.msk.f32.gmra.mrb[8].mxu0 %vm66_vm1, %v936_v57  ;;  %v1396_v57 = vld [vmem:[#allocation2 + $0x3d] sm:$0xff] }
 0x10d   :  { %5572 = vmatprep.mubr.msk.f32.mxu0 %vm66_vm1, %v937_v56  ;;  %4593 = vperm.xlu1 %6281, %v4544_v54   ;;  %v4763_v44 = vpop.permute.xlu0 %4762  ;;  %v1638_v54 = vld [vmem:[#allocation7 + $0x88] sm:$0xf]  ;;  %v1397_v56 = vld [vmem:[#allocation2 + $0x45] sm:$0xff] }
 0x10e   :  { %4590 = vperm.xlu0 %6280, %v4543_v50   ;;  %v4779_v48 = vmul.f32 %v4763_v44, %v6597_v37  ;;  %v1392_v37 = vld [vmem:[#allocation2 + $0x1d] sm:$0xff]  ;;  %v1395_v50 = vld [vmem:[#allocation2 + $0x35] sm:$0xff] }
 0x110   :  { %5573 = vmatmul.mubr.msk.f32.gmra.mrb[10].mxu0 %vm66_vm1, %v938_v62  ;;  %v1400_v62 = vld [vmem:[#allocation2 + $0x5d] sm:$0xff] }
 0x111   :  { %5575 = vmatprep.mubr.msk.f32.mxu0 %vm66_vm1, %v939_v1  ;;  %4805 = vperm.xlu1 %6281, %v4772_v58   ;;  %v1398_v58 = vld [vmem:[#allocation2 + $0x4d] sm:$0xff]  ;;  %v1401_v1 = vld [vmem:[#allocation2 + $0x65] sm:$0xff] }
 0x112   :  { %4596 = vperm.xlu0 %6280, %v4545_v61   ;;  %v1399_v61 = vld [vmem:[#allocation2 + $0x55] sm:$0xff] }
 0x114   :  { %5576 = vmatmul.mubr.msk.f32.gmra.mrb[12].mxu0 %vm66_vm1, %v940_v6  ;;  %v1404_v6 = vld [vmem:[#allocation2 + $0x7d] sm:$0xff] }
 0x115   :  { %5578 = vmatprep.mubr.msk.f32.mxu0 %vm66_vm1, %v941_v40  ;;  %4829 = vperm.xlu1 %6281, %v4780_v2   ;;  %v1402_v2 = vld [vmem:[#allocation2 + $0x6d] sm:$0xff] }
 0x116   :  { %4808 = vperm.xlu0 %6280, %v4773_v5   ;;  %v1403_v5 = vld [vmem:[#allocation2 + $0x75] sm:$0xff]  ;;  %v1620_v40 = vld [vmem:[#allocation2 + $0x6] sm:$0xff] }
 0x118   :  { %5579 = vmatmul.mubr.msk.f32.gmra.mrb[14].mxu0 %vm66_vm1, %v942_v32  ;;  %v1623_v32 = vld [vmem:[#allocation2 + $0x1e] sm:$0xff] }
 0x119   :  { %5587 = vmatprep.mubr.msk.f32.mxu0 %vm66_vm1, %v1158_v11  ;;  %4599 = vperm.xlu1 %6281, %v4546_v8   ;;  %v1621_v8 = vld [vmem:[#allocation2 + $0xe] sm:$0xff] }
 0x11a   :  { %4832 = vperm.xlu0 %6280, %v4781_v9   ;;  %v1622_v9 = vld [vmem:[#allocation2 + $0x16] sm:$0xff]  ;;  %v1625_v11 = vld [vmem:[#allocation2 + $0x2e] sm:$0xff] }
 0x11c   :  { %5588 = vmatmul.mubr.msk.f32.vlgmr.msra.gmra.mrb[0].mxu0 %vm66_vm1, %v1159_v13  ;;  %v1628_v13 = vld [vmem:[#allocation2 + $0x46] sm:$0xff] }
 0x11d   :  { %5590 = vmatprep.mubr.msk.f32.mxu0 %vm66_vm1, %v1160_v15  ;;  %6072 = vmatpush3.bf16.msra.mxu0 %v6653_v25  ;;  %v4550_v25 = vmul.f32 %v6665_v45, %v6619_v4  ;;  %v1172_v45 = vld [vmem:[#allocation2 + $0x74] sm:$0xff]  ;;  %v4787_v4 = vmul.f32 %v4763_v44, %v6623_v7 }
 0x11e   :  { %4835 = vperm.xlu1 %6281, %v4782_v12   ;;  %4811 = vperm.xlu0 %6280, %v4774_v43   ;;  %v1394_v7 = vld [vmem:[#allocation2 + $0x2d] sm:$0xff]  ;;  %v1626_v43 = vld [vmem:[#allocation2 + $0x36] sm:$0xff]  ;;  %v1627_v12 = vld [vmem:[#allocation2 + $0x3e] sm:$0xff] }
 0x11f   :  { %5615 = vmatprep.subr.msk.mxu0 %vm351_vm0, %v1407_v14  ;;  %v1629_v15 = vld [vmem:[#allocation2 + $0x4e] sm:$0xff] }
 0x120   :  { %5591 = vmatmul.mubr.msk.f32.gmra.mrb[2].mxu0 %vm66_vm1, %v1161_v42  ;;  %v1635_v42 = vld [vmem:[#allocation2 + $0x7e] sm:$0xff] }
 0x121   :  { %5593 = vmatprep.mubr.msk.f32.mxu0 %vm66_vm1, %v1162_v17  ;;  %5616 = vmatpush3.msk.msra.mxu0 %vm351_vm0, %v1407_v14  ;;  %v1630_v14 = vld [vmem:[#allocation2 + $0x56] sm:$0xff] }
 0x122   :  { %4814 = vperm.xlu1 %6281, %v4775_v23   ;;  %4602 = vperm.xlu0 %6280, %v4547_v19   ;;  %v1633_v19 = vld [vmem:[#allocation2 + $0x6e] sm:$0xff]  ;;  %v1634_v23 = vld [vmem:[#allocation2 + $0x76] sm:$0xff] }
 0x123   :  { %6074 = vmatprep.subr.bf16.mxu0 %v6702_v60 }
 0x124   :  { %5594 = vmatmul.mubr.msk.f32.gmra.mrb[4].mxu0 %vm66_vm1, %v1163_v27 }
 0x125   :  { %5596 = vmatprep.mubr.msk.f32.mxu0 %vm66_vm1, %v1164_v28  ;;  %v2048_v28 = vld [vmem:[#allocation7 + $0x9c] sm:$0xff] }
 0x126   :  { %4605 = vperm.xlu1 %6281, %v4548_v22   ;;  %4838 = vperm.xlu0 %6280, %v4783_v46  }
 0x128   :  { %5597 = vmatmul.mubr.msk.f32.gmra.mrb[6].mxu0 %vm66_vm1, %v1165_v24 }
 0x129   :  { %5599 = vmatprep.mubr.msk.f32.mxu0 %vm66_vm1, %v1166_v63  ;;  %v6805_v63 = vld [vmem:[%s7419_s1 + $0x1] ss:$0 sm:$0xff] }
 0x12a   :  { %4841 = vperm.xlu1 %6281, %v4784_v30   ;;  %4817 = vperm.xlu0 %6280, %v4776_v29   ;;  %v2049_v29 = vld [vmem:[#allocation7 + $0xa4] sm:$0xf]  ;;  %v6335_v30 = vmov 0.0|0.0  }
 0x12b   :  { %6077 = vmatprep.subr.bf16.mxu1 %v6335_v30  ;;  %v6078_v24 = vpack.c.bf16 %v2049_v29, %v2048_v28 }
 0x12c   :  { %5600 = vmatmul.mubr.msk.f32.gmra.mrb[8].mxu0 %vm66_vm1, %v1167_v36 }
 0x12d   :  { %5602 = vmatprep.mubr.msk.f32.mxu0 %vm66_vm1, %v1168_v47  ;;  %6080 = vmatpush3.bf16.msk.msra.mxu1 %vm6790_vm7, %v6078_v24  ;;  %v6811_v47 = vld [vmem:[%s7419_s1 + $0x2] ss:$0 sm:$0xff] }
 0x12e   :  { %4608 = vperm.xlu0 %6280, %v4549_v34   ;;  %4820 = vperm.xlu1 %6281, %v4777_v35  }
 0x12f   :  { %6081 = vmatprep.subr.bf16.mxu1 %v6335_v30 }
 0x130   :  { %5603 = vmatmul.mubr.msk.f32.gmra.mrb[10].mxu0 %vm66_vm1, %v1169_v21 }
 0x131   :  { %5605 = vmatprep.mubr.msk.f32.mxu0 %vm66_vm1, %v1170_v39 }
 0x132   :  { %4844 = vperm.xlu0 %6280, %v4785_v38   ;;  %4611 = vperm.xlu1 %6281, %v4550_v25   ;;  %v6817_v38 = vld [vmem:[%s7419_s1 + $0x3] ss:$0 sm:$0xff] }
 0x134   :  { %5606 = vmatmul.mubr.msk.f32.gmra.mrb[12].mxu0 %vm66_vm1, %v1171_v31 }
 0x135   :  { %5608 = vmatprep.mubr.msk.f32.mxu0 %vm66_vm1, %v1172_v45 }
 0x136   :  { %4847 = vperm.xlu1 %6281, %v4786_v41   ;;  %4823 = vperm.xlu0 %6280, %v4778_v51  }
 0x138   :  { %5609 = vmatmul.mubr.msk.f32.gmra.mrb[14].mxu0 %vm66_vm1, %v1173_v49 }
 0x139   :  { %5617 = vmatprep.mubr.msk.f32.mxu0 %vm66_vm1, %v1389_v52 }
 0x13a   :  { %4614 = vperm.xlu0 %6280, %v4551_v3   ;;  %4826 = vperm.xlu1 %6281, %v4779_v48  }
 0x13c   :  { %5618 = vmatmul.mubr.msk.f32.vlgmr.msra.gmra.mrb[0].mxu0 %vm66_vm1, %v1390_v53 }
 0x13d   :  { %5620 = vmatprep.mubr.msk.f32.mxu0 %vm66_vm1, %v1391_v26  ;;  %6076 = vmatpush3.bf16.msra.mxu0 %v6702_v60 }
 0x13e   :  { %4850 = vperm.xlu0 %6280, %v4787_v4   ;;  %5645 = vmatprep.subr.msk.mxu0 %vm351_vm0, %v1638_v54 }
 0x140   :  { %5621 = vmatmul.mubr.msk.f32.gmra.mrb[2].mxu0 %vm66_vm1, %v1392_v37 }
 0x141   :  { %5623 = vmatprep.mubr.msk.f32.mxu0 %vm66_vm1, %v1393_v55  ;;  %5646 = vmatpush3.msk.msra.mxu0 %vm351_vm0, %v1638_v54  ;;  %vm4655_vm0 = vcmask 392512  }
 0x142   :  { %6105 = vmatprep.subr.bf16.mxu0 %v6335_v30 }
 0x144   :  { %5624 = vmatmul.mubr.msk.f32.gmra.mrb[4].mxu0 %vm66_vm1, %v1394_v7 }
 0x145   :  { %5626 = vmatprep.mubr.msk.f32.mxu0 %vm66_vm1, %v1395_v50 }
 0x148   :  { %5627 = vmatmul.mubr.msk.f32.gmra.mrb[6].mxu0 %vm66_vm1, %v1396_v57 }
 0x149   :  { %5629 = vmatprep.mubr.msk.f32.mxu0 %vm66_vm1, %v1397_v56 }
 0x14c   :  { %5630 = vmatmul.mubr.msk.f32.gmra.mrb[8].mxu0 %vm66_vm1, %v1398_v58 }
 0x14d   :  { %5632 = vmatprep.mubr.msk.f32.mxu0 %vm66_vm1, %v1399_v61 }
 0x150   :  { %5633 = vmatmul.mubr.msk.f32.gmra.mrb[10].mxu0 %vm66_vm1, %v1400_v62 }
 0x151   :  { %5635 = vmatprep.mubr.msk.f32.mxu0 %vm66_vm1, %v1401_v1 }
 0x154   :  { %5636 = vmatmul.mubr.msk.f32.gmra.mrb[12].mxu0 %vm66_vm1, %v1402_v2 }
 0x155   :  { %5638 = vmatprep.mubr.msk.f32.mxu0 %vm66_vm1, %v1403_v5 }
 0x158   :  { %5639 = vmatmul.mubr.msk.f32.gmra.mrb[14].mxu0 %vm66_vm1, %v1404_v6 }
 0x159   :  { %5647 = vmatprep.mubr.msk.f32.mxu0 %vm66_vm1, %v1620_v40 }
 0x15c   :  { %5648 = vmatmul.mubr.msk.f32.vlgmr.msra.gmra.mrb[0].mxu0 %vm66_vm1, %v1621_v8 }
 0x15d   :  { %5650 = vmatprep.mubr.msk.f32.mxu0 %vm66_vm1, %v1622_v9 }
 0x160   :  { %5651 = vmatmul.mubr.msk.f32.gmra.mrb[2].mxu0 %vm66_vm1, %v1623_v32 }
 0x161   :  { %5653 = vmatprep.mubr.msk.f32.mxu0 %vm66_vm1, %v1624_v10 }
 0x164   :  { %5654 = vmatmul.mubr.msk.f32.gmra.mrb[4].mxu0 %vm66_vm1, %v1625_v11 }
 0x165   :  { %5656 = vmatprep.mubr.msk.f32.mxu0 %vm66_vm1, %v1626_v43 }
 0x168   :  { %5657 = vmatmul.mubr.msk.f32.gmra.mrb[6].mxu0 %vm66_vm1, %v1627_v12 }
 0x169   :  { %5659 = vmatprep.mubr.msk.f32.mxu0 %vm66_vm1, %v1628_v13 }
 0x16c   :  { %5660 = vmatmul.mubr.msk.f32.gmra.mrb[8].mxu0 %vm66_vm1, %v1629_v15 }
 0x16d   :  { %5662 = vmatprep.mubr.msk.f32.mxu0 %vm66_vm1, %v1630_v14 }
 0x170   :  { %5663 = vmatmul.mubr.msk.f32.gmra.mrb[10].mxu0 %vm66_vm1, %v1631_v59 }
 0x171   :  { %5665 = vmatprep.mubr.msk.f32.mxu0 %vm66_vm1, %v1632_v18 }
 0x174   :  { %5666 = vmatmul.mubr.msk.f32.gmra.mrb[12].mxu0 %vm66_vm1, %v1633_v19 }
 0x175   :  { %5668 = vmatprep.mubr.msk.f32.mxu0 %vm66_vm1, %v1634_v23 }
 0x178   :  { %5669 = vmatmul.mubr.msk.f32.gmra.mrb[14].mxu0 %vm66_vm1, %v1635_v42  ;;  %vm4662_vm1 = vcmask 458112  }
 0x179   :  { %5894 = vmatprep.mubr.msk.f32.mxu0 %vm6337_vm8, %v6334_v16 }
 0x180   :  { %v6772_v60 = vpop.f32.mrb[0].mxu1 }
 0x181   :  { %v6774_v17 = vpop.f32.mrb[1].mxu1 }
 0x184   :  { %v6776_v20 = vpop.f32.mrb[2].mxu1 }
 0x185   :  { %v6778_v22 = vpop.f32.mrb[3].mxu1 }
 0x188   :  { %v6780_v46 = vpop.f32.mrb[4].mxu1 }
 0x189   :  { %v6782_v27 = vpop.f32.mrb[5].mxu1 }
 0x22f   :  { %v5649_v34 = vpop.f32.mrb[0].mxu0 }
 0x230   :  { %v1857_v35 = vadd.f32 %v5649_v34, %v6805_v63  ;;  %v1756_v36 = vpop.f32.mrb[1].mxu0 }
 0x231   :  { %v1856_v0 = vadd.f32 %v6805_v63, %v1756_v36 }
 0x232   :  { %v1873_v25 = vmax.f32 %v1857_v35, 0.0 }
 0x233   :  { %v1872_v21 = vmax.f32 %v1856_v0, 0.0  ;;  %v5652_v39 = vpop.f32.mrb[2].mxu0 }
 0x234   :  { %v1894_v51 = vmul.f32 %v6811_v47, %v1873_v25  ;;  %v1859_v41 = vadd.f32 %v5652_v39, %v6805_v63  ;;  %v1766_v31 = vpop.f32.mrb[3].mxu0 }
 0x235   :  { %v1893_v44 = vmul.f32 %v6811_v47, %v1872_v21  ;;  %v1858_v45 = vadd.f32 %v6805_v63, %v1766_v31 }
 0x236   :  { %v1915_v3 = vadd.f32 %v6817_v38, %v1894_v51  ;;  %v1875_v48 = vmax.f32 %v1859_v41, 0.0 }
 0x237   :  { %v1914_v49 = vadd.f32 %v6817_v38, %v1893_v44  ;;  %v1874_v52 = vmax.f32 %v1858_v45, 0.0  ;;  %v5655_v4 = vpop.f32.mrb[4].mxu0 }
 0x238   :  { %1932 = vst.msk [vmem:[#allocation3 + $0x8] sm:$0xff] %vm1930_vm5, %v1915_v3  ;;  %v1896_v53 = vmul.f32 %v6811_v47, %v1875_v48  ;;  %v1861_v54 = vadd.f32 %v5655_v4, %v6805_v63  ;;  %v1776_v26 = vpop.f32.mrb[5].mxu0 }
 0x239   :  { %1931 = vst.msk [vmem:[#allocation3] sm:$0xff] %vm1930_vm5, %v1914_v49  ;;  %v1895_v37 = vmul.f32 %v6811_v47, %v1874_v52  ;;  %v1860_v55 = vadd.f32 %v6805_v63, %v1776_v26 }
 0x23a   :  { %v1917_v7 = vadd.f32 %v6817_v38, %v1896_v53  ;;  %v1877_v50 = vmax.f32 %v1861_v54, 0.0 }
 0x23b   :  { %v1916_v57 = vadd.f32 %v6817_v38, %v1895_v37  ;;  %v1876_v56 = vmax.f32 %v1860_v55, 0.0  ;;  %v5658_v58 = vpop.f32.mrb[6].mxu0 }
 0x23c   :  { %1934 = vst.msk [vmem:[#allocation3 + $0x18] sm:$0xff] %vm1930_vm5, %v1917_v7  ;;  %v1898_v61 = vmul.f32 %v6811_v47, %v1877_v50  ;;  %v1863_v62 = vadd.f32 %v5658_v58, %v6805_v63  ;;  %v1786_v1 = vpop.f32.mrb[7].mxu0  ;;  %v2038_v58 = vld [vmem:[#allocation7 + $0x98] sm:$0xf] }
 0x23d   :  { %1933 = vst.msk [vmem:[#allocation3 + $0x10] sm:$0xff] %vm1930_vm5, %v1916_v57  ;;  %v1897_v2 = vmul.f32 %v6811_v47, %v1876_v56  ;;  %v1862_v5 = vadd.f32 %v6805_v63, %v1786_v1  ;;  %v2037_v56 = vld [vmem:[#allocation7 + $0x90] sm:$0xff] }
 0x23e   :  { %v1919_v6 = vadd.f32 %v6817_v38, %v1898_v61  ;;  %v1879_v40 = vmax.f32 %v1863_v62, 0.0 }
 0x23f   :  { %v1918_v8 = vadd.f32 %v6817_v38, %v1897_v2  ;;  %v1878_v9 = vmax.f32 %v1862_v5, 0.0  ;;  %v5661_v32 = vpop.f32.mrb[8].mxu0 }
 0x240   :  { %v1947_v10 = vld [vmem:[#allocation3] ss:$2 sm:$0xff]  ;;  %v1963_v11 = vld [vmem:[#allocation3 + $0x1] ss:$2 sm:$0xff]  ;;  %1936 = vst.msk [vmem:[#allocation3 + $0x28] sm:$0xff] %vm1930_vm5, %v1919_v6  ;;  %v1900_v43 = vmul.f32 %v6811_v47, %v1879_v40  ;;  %v1865_v12 = vadd.f32 %v5661_v32, %v6805_v63  ;;  %v1796_v13 = vpop.f32.mrb[9].mxu0 }
 0x241   :  { %v1978_v15 = vmax.f32 %v1947_v10, %v1963_v11  ;;  %1935 = vst.msk [vmem:[#allocation3 + $0x20] sm:$0xff] %vm1930_vm5, %v1918_v8  ;;  %v1899_v14 = vmul.f32 %v6811_v47, %v1878_v9  ;;  %v1864_v59 = vadd.f32 %v6805_v63, %v1796_v13  ;;  %v6082_v13 = vpack.c.bf16 %v2038_v58, %v2037_v56 }
 0x242   :  { %v1921_v18 = vadd.f32 %v6817_v38, %v1900_v43  ;;  %v1881_v19 = vmax.f32 %v1865_v12, 0.0 }
 0x243   :  { %v1990_v23 = vrot.slane %v1978_v15, 5  ;;  %v1920_v42 = vadd.f32 %v6817_v38, %v1899_v14  ;;  %v1880_v28 = vmax.f32 %v1864_v59, 0.0  ;;  %v5664_v29 = vpop.f32.mrb[10].mxu0 }
 0x244   :  { %v1949_v24 = vld [vmem:[#allocation3 + $0x10] ss:$2 sm:$0xff]  ;;  %v1965_v34 = vld [vmem:[#allocation3 + $0x11] ss:$2 sm:$0xff]  ;;  %1938 = vst.msk [vmem:[#allocation3 + $0x38] sm:$0xff] %vm1930_vm5, %v1921_v18  ;;  %v1902_v35 = vmul.f32 %v6811_v47, %v1881_v19  ;;  %v6175_v36 = vadd.f32 %v5664_v29, %v6772_v60  ;;  %v1806_v0 = vpop.f32.mrb[11].mxu0 }
 0x245   :  { %v1979_v25 = vmax.f32 %v1949_v24, %v1965_v34  ;;  %1937 = vst.msk [vmem:[#allocation3 + $0x30] sm:$0xff] %vm1930_vm5, %v1920_v42  ;;  %v1901_v21 = vmul.f32 %v6811_v47, %v1880_v28  ;;  %v6176_v39 = vadd.f32 %v1806_v0, %v6774_v17  ;;  %v2001_v51 = vsel %vm180_vm3, 0.0, %v1990_v23 }
 0x246   :  { %v1923_v41 = vadd.f32 %v6817_v38, %v1902_v35  ;;  %v1867_v31 = vadd.f32 %v6175_v36, %v6805_v63  ;;  %2002 = vst.msk [vmem:[#allocation4] sm:$0xff] %vm1930_vm5, %v2001_v51 }
 0x247   :  { %v1991_v44 = vrot.slane %v1979_v25, 5  ;;  %v1922_v45 = vadd.f32 %v6817_v38, %v1901_v21  ;;  %v1866_v60 = vadd.f32 %v6176_v39, %v6805_v63  ;;  %v5667_v3 = vpop.f32.mrb[12].mxu0 }
 0x248   :  { %v1951_v48 = vld [vmem:[#allocation3 + $0x20] ss:$2 sm:$0xff]  ;;  %v1967_v49 = vld [vmem:[#allocation3 + $0x21] ss:$2 sm:$0xff]  ;;  %1940 = vst.msk [vmem:[#allocation3 + $0x48] sm:$0xff] %vm1930_vm5, %v1923_v41  ;;  %v1883_v52 = vmax.f32 %v1867_v31, 0.0  ;;  %v6177_v17 = vadd.f32 %v5667_v3, %v6776_v20 }
 0x249   :  { %v1816_v4 = vpop.f32.mrb[13].mxu0  ;;  %v1980_v53 = vmax.f32 %v1951_v48, %v1967_v49  ;;  %1939 = vst.msk [vmem:[#allocation3 + $0x40] sm:$0xff] %vm1930_vm5, %v1922_v45  ;;  %v1882_v54 = vmax.f32 %v1866_v60, 0.0  ;;  %v1992_v37 = vsel %vm180_vm3, %v1990_v23, %v1991_v44 }
 0x24a   :  { %v6178_v26 = vadd.f32 %v1816_v4, %v6778_v22  ;;  %v1904_v55 = vmul.f32 %v6811_v47, %v1883_v52  ;;  %v1869_v7 = vadd.f32 %v6177_v17, %v6805_v63  ;;  %2003 = vst.msk [vmem:[#allocation4 + $0x8] sm:$0xff] %vm1930_vm5, %v1992_v37 }
 0x24b   :  { %v1903_v50 = vmul.f32 %v6811_v47, %v1882_v54  ;;  %v5670_v20 = vpop.f32.mrb[14].mxu0  ;;  %v1993_v61 = vrot.slane %v1980_v53, 5 }
 0x24c   :  { %v1868_v57 = vadd.f32 %v6178_v26, %v6805_v63  ;;  %v1953_v62 = vld [vmem:[#allocation3 + $0x30] ss:$2 sm:$0xff]  ;;  %v1969_v1 = vld [vmem:[#allocation3 + $0x31] ss:$2 sm:$0xff]  ;;  %v1925_v22 = vadd.f32 %v6817_v38, %v1904_v55  ;;  %v1885_v2 = vmax.f32 %v1869_v7, 0.0  ;;  %v6179_v5 = vadd.f32 %v5670_v20, %v6780_v46  ;;  %v1826_v6 = vpop.f32.mrb[15].mxu0 }
 0x24d   :  { %v1981_v40 = vmax.f32 %v1953_v62, %v1969_v1  ;;  %v1924_v8 = vadd.f32 %v6817_v38, %v1903_v50  ;;  %v6180_v32 = vadd.f32 %v1826_v6, %v6782_v27  ;;  %v1994_v43 = vsel %vm180_vm3, %v1991_v44, %v1993_v61  ;;  %v2339_v7 = vld [vmem:[#allocation7 + $0xa8] sm:$0xff]  ;;  %v2340_v50 = vld [vmem:[#allocation7 + $0xb0] sm:$0xf]  ;;  %v2028_v56 = vld [vmem:[#allocation4] sm:$0xff] }
 0x24e   :  { %v1884_v9 = vmax.f32 %v1868_v57, 0.0  ;;  %1942 = vst.msk [vmem:[#allocation3 + $0x58] sm:$0xff] %vm1930_vm5, %v1925_v22  ;;  %v1906_v10 = vmul.f32 %v6811_v47, %v1885_v2  ;;  %v1871_v11 = vadd.f32 %v6179_v5, %v6805_v63  ;;  %2004 = vst.msk [vmem:[#allocation4 + $0x10] sm:$0xff] %vm1930_vm5, %v1994_v43  ;;  %v6086_v20 = vpack.c.bf16 %v2340_v50, %v2339_v7  ;;  %v2032_v1 = vld [vmem:[#allocation4 + $0x20] sm:$0xff]  ;;  %v2499_v6 = vld [vmem:[#allocation7 + $0xb4] sm:$0xff] }
 0x24f   :  { %1941 = vst.msk [vmem:[#allocation3 + $0x50] sm:$0xff] %vm1930_vm5, %v1924_v8  ;;  %v1870_v46 = vadd.f32 %v6180_v32, %v6805_v63  ;;  %v1995_v15 = vrot.slane %v1981_v40, 5  ;;  %v2500_v40 = vld [vmem:[#allocation7 + $0xbc] sm:$0xf] }
 0x250   :  { %v1905_v12 = vmul.f32 %v6811_v47, %v1884_v9  ;;  %v1927_v27 = vadd.f32 %v6817_v38, %v1906_v10  ;;  %v1887_v14 = vmax.f32 %v1871_v11, 0.0  ;;  %v1955_v59 = vld [vmem:[#allocation3 + $0x40] ss:$2 sm:$0xff]  ;;  %v1971_v18 = vld [vmem:[#allocation3 + $0x41] ss:$2 sm:$0xff]  ;;  %v6090_v9 = vpack.c.bf16 %v2500_v40, %v2499_v6 }
 0x251   :  { %v1886_v23 = vmax.f32 %v1870_v46, 0.0  ;;  %v2039_v42 = vld [vmem:[#allocation4 + $0x1] sm:$0xff]  ;;  %v1996_v28 = vsel %vm180_vm3, %v1993_v61, %v1995_v15  ;;  %v1982_v29 = vmax.f32 %v1955_v59, %v1971_v18 }
 0x252   :  { %v1926_v19 = vadd.f32 %v6817_v38, %v1905_v12  ;;  %1944 = vst.msk [vmem:[#allocation3 + $0x68] sm:$0xff] %vm1930_vm5, %v1927_v27  ;;  %v1908_v63 = vmul.f32 %v6811_v47, %v1887_v14  ;;  %5676 = vmatmul.mubr.msk.f32.vlgmr.msra.gmra.mrb[6].mxu1 %vm1930_vm5, %v2039_v42  ;;  %2005 = vst.msk [vmem:[#allocation4 + $0x18] sm:$0xff] %vm1930_vm5, %v1996_v28  ;;  %v2029_v58 = vld [vmem:[#allocation4 + $0x8] sm:$0xff]  ;;  %v2659_v27 = vld [vmem:[#allocation7 + $0xc0] sm:$0xff] }
 0x253   :  { %v1907_v24 = vmul.f32 %v6811_v47, %v1886_v23  ;;  %6084 = vmatpush3.bf16.msk.msra.mxu1 %vm6790_vm7, %v6082_v13  ;;  %5678 = vmatprep.mubr.msk.f32.mxu1 %vm6337_vm8, %v6334_v16  ;;  %v2011_v34 = vrot.slane %v1982_v29, 5  ;;  %v2330_v32 = vld [vmem:[#allocation4 + $0x2] sm:$0xff] }
 0x254   :  { %1943 = vst.msk [vmem:[#allocation3 + $0x60] sm:$0xff] %vm1930_vm5, %v1926_v19  ;;  %v1929_v35 = vadd.f32 %v6817_v38, %v1908_v63  ;;  %6085 = vmatprep.subr.bf16.mxu1 %v6335_v30  ;;  %v2660_v14 = vld [vmem:[#allocation7 + $0xc8] sm:$0xf] }
 0x255   :  { %v1928_v36 = vadd.f32 %v6817_v38, %v1907_v24  ;;  %v2022_v0 = vsel %vm180_vm3, 0.0, %v2011_v34  ;;  %v2040_v47 = vld [vmem:[#allocation4 + $0x9] sm:$0xff]  ;;  %v6094_v18 = vpack.c.bf16 %v2660_v14, %v2659_v27 }
 0x256   :  { %v1957_v25 = vld [vmem:[#allocation3 + $0x50] ss:$2 sm:$0xff]  ;;  %v1973_v21 = vld [vmem:[#allocation3 + $0x51] ss:$2 sm:$0xff]  ;;  %1946 = vst.msk [vmem:[#allocation3 + $0x78] sm:$0xff] %vm1930_vm5, %v1929_v35  ;;  %2023 = vst.msk [vmem:[#allocation4 + $0x28] sm:$0xff] %vm1930_vm5, %v2022_v0  ;;  %5679 = vmatmul.mubr.msk.f32.gmra.mrb[8].mxu1 %vm1930_vm5, %v2040_v47 }
 0x257   :  { %1945 = vst.msk [vmem:[#allocation3 + $0x70] sm:$0xff] %vm1930_vm5, %v1928_v36  ;;  %v1983_v39 = vmax.f32 %v1957_v25, %v1973_v21  ;;  %5681 = vmatprep.mubr.msk.f32.mxu1 %vm6337_vm8, %v6334_v16  ;;  %v2030_v61 = vld [vmem:[#allocation4 + $0x10] sm:$0xff]  ;;  %v2490_v19 = vld [vmem:[#allocation4 + $0x3] sm:$0xff] }
 0x258   :  { %v2331_v10 = vld [vmem:[#allocation4 + $0xa] sm:$0xff]  ;;  %v2820_v36 = vld [vmem:[#allocation7 + $0xd4] sm:$0xf] }
 0x259   :  { %v2041_v51 = vld [vmem:[#allocation4 + $0x11] sm:$0xff]  ;;  %v2012_v41 = vrot.slane %v1983_v39, 5  ;;  %v2042_v49 = vld [vmem:[#allocation4 + $0x19] sm:$0xff]  ;;  %v2650_v21 = vld [vmem:[#allocation4 + $0x4] sm:$0xff] }
 0x25a   :  { %5682 = vmatmul.mubr.msk.f32.gmra.mrb[10].mxu1 %vm1930_vm5, %v2041_v51  ;;  %v2031_v62 = vld [vmem:[#allocation4 + $0x18] sm:$0xff]  ;;  %v2491_v23 = vld [vmem:[#allocation4 + $0xb] sm:$0xff] }
 0x25b   :  { %v1959_v38 = vld [vmem:[#allocation3 + $0x60] ss:$2 sm:$0xff]  ;;  %v1975_v31 = vld [vmem:[#allocation3 + $0x61] ss:$2 sm:$0xff]  ;;  %v2013_v44 = vsel %vm180_vm3, %v2011_v34, %v2012_v41  ;;  %5684 = vmatprep.mubr.msk.f32.mxu1 %vm6337_vm8, %v6334_v16  ;;  %v2332_v11 = vld [vmem:[#allocation4 + $0x12] sm:$0xff] }
 0x25c   :  { %v1984_v45 = vmax.f32 %v1959_v38, %v1975_v31  ;;  %2024 = vst.msk [vmem:[#allocation4 + $0x30] sm:$0xff] %vm1930_vm5, %v2013_v44  ;;  %v2333_v43 = vld [vmem:[#allocation4 + $0x1a] sm:$0xff]  ;;  %v2819_v35 = vld [vmem:[#allocation7 + $0xcc] sm:$0xff] }
 0x25d   :  { %v2043_v53 = vld [vmem:[#allocation4 + $0x21] sm:$0xff]  ;;  %v2492_v42 = vld [vmem:[#allocation4 + $0x13] sm:$0xff]  ;;  %v6098_v25 = vpack.c.bf16 %v2820_v36, %v2819_v35 }
 0x25e   :  { %v2014_v60 = vrot.slane %v1984_v45, 5  ;;  %v1961_v3 = vld [vmem:[#allocation3 + $0x70] ss:$2 sm:$0xff]  ;;  %v1977_v48 = vld [vmem:[#allocation3 + $0x71] ss:$2 sm:$0xff]  ;;  %5685 = vmatmul.mubr.msk.f32.gmra.mrb[12].mxu1 %vm1930_vm5, %v2042_v49  ;;  %v2033_v22 = vld [vmem:[#allocation4 + $0x28] sm:$0xff] }
 0x25f   :  { %v1985_v17 = vmax.f32 %v1961_v3, %v1977_v48  ;;  %5687 = vmatprep.mubr.msk.f32.mxu1 %vm6337_vm8, %v6334_v16  ;;  %v2334_v12 = vld [vmem:[#allocation4 + $0x22] sm:$0xff]  ;;  %v2651_v47 = vld [vmem:[#allocation4 + $0xc] sm:$0xff]  ;;  %v2652_v39 = vld [vmem:[#allocation4 + $0x14] sm:$0xff] }
 0x260   :  { %v2015_v52 = vsel %vm180_vm3, %v2012_v41, %v2014_v60  ;;  %v2493_v28 = vld [vmem:[#allocation4 + $0x1b] sm:$0xff]  ;;  %v2494_v29 = vld [vmem:[#allocation4 + $0x23] sm:$0xff] }
 0x261   :  { %2025 = vst.msk [vmem:[#allocation4 + $0x38] sm:$0xff] %vm1930_vm5, %v2015_v52  ;;  %v2016_v4 = vrot.slane %v1985_v17, 5  ;;  %v2653_v51 = vld [vmem:[#allocation4 + $0x1c] sm:$0xff]  ;;  %v2654_v41 = vld [vmem:[#allocation4 + $0x24] sm:$0xff]  ;;  %v2811_v52 = vld [vmem:[#allocation4 + $0xd] sm:$0xff] }
 0x262   :  { %5688 = vmatmul.mubr.msk.f32.gmra.mrb[14].mxu1 %vm1930_vm5, %v2043_v53  ;;  %v2979_v45 = vld [vmem:[#allocation7 + $0xd8] sm:$0xff]  ;;  %v2810_v49 = vld [vmem:[#allocation4 + $0x5] sm:$0xff] }
 0x263   :  { %v2017_v54 = vsel %vm180_vm3, %v2014_v60, %v2016_v4  ;;  %5690 = vmatprep.mubr.msk.f32.mxu1 %vm6337_vm8, %v6334_v16  ;;  %v2044_v26 = vld [vmem:[#allocation4 + $0x29] sm:$0xff]  ;;  %v2980_v60 = vld [vmem:[#allocation7 + $0xe0] sm:$0xf]  ;;  %v2812_v17 = vld [vmem:[#allocation4 + $0x15] sm:$0xff]  ;;  %vm4710_vm3 = vcmask 1041409  }
 0x264   :  { %2026 = vst.msk [vmem:[#allocation4 + $0x40] sm:$0xff] %vm1930_vm5, %v2017_v54  ;;  %v2034_v2 = vld [vmem:[#allocation4 + $0x30] sm:$0xff]  ;;  %v6102_v48 = vpack.c.bf16 %v2980_v60, %v2979_v45  ;;  %v2813_v4 = vld [vmem:[#allocation4 + $0x1d] sm:$0xff]  ;;  %v2814_v33 = vld [vmem:[#allocation4 + $0x25] sm:$0xff] }
 0x265   :  { %v2335_v46 = vld [vmem:[#allocation4 + $0x2a] sm:$0xff] }
 0x266   :  { %5691 = vmatmul.mubr.msk.f32.gmra.mrb[16].mxu1 %vm1930_vm5, %v2044_v26  ;;  %v2495_v63 = vld [vmem:[#allocation4 + $0x2b] sm:$0xff] }
 0x267   :  { %5693 = vmatprep.mubr.msk.f32.mxu1 %vm6337_vm8, %v6334_v16  ;;  %v2655_v38 = vld [vmem:[#allocation4 + $0x2c] sm:$0xff] }
 0x268   :  { %v2045_v37 = vld [vmem:[#allocation4 + $0x31] sm:$0xff] }
 0x269   :  { %v2035_v5 = vld [vmem:[#allocation4 + $0x38] sm:$0xff]  ;;  %v2815_v53 = vld [vmem:[#allocation4 + $0x2d] sm:$0xff] }
 0x26a   :  { %5694 = vmatmul.mubr.msk.f32.gmra.mrb[18].mxu1 %vm1930_vm5, %v2045_v37  ;;  %v2336_v13 = vld [vmem:[#allocation4 + $0x32] sm:$0xff] }
 0x26b   :  { %5696 = vmatprep.mubr.msk.f32.mxu1 %vm6337_vm8, %v6334_v16  ;;  %v2046_v55 = vld [vmem:[#allocation4 + $0x39] sm:$0xff]  ;;  %v2047_v57 = vld [vmem:[#allocation4 + $0x41] sm:$0xff] }
 0x26c   :  { %v2036_v8 = vld [vmem:[#allocation4 + $0x40] sm:$0xff]  ;;  %v2496_v24 = vld [vmem:[#allocation4 + $0x33] sm:$0xff] }
 0x26d   :  { %v2337_v15 = vld [vmem:[#allocation4 + $0x3a] sm:$0xff]  ;;  %v2338_v59 = vld [vmem:[#allocation4 + $0x42] sm:$0xff] }
 0x26e   :  { %5697 = vmatmul.mubr.msk.f32.gmra.mrb[20].mxu1 %vm1930_vm5, %v2046_v55  ;;  %v2497_v34 = vld [vmem:[#allocation4 + $0x3b] sm:$0xff]  ;;  %v2498_v0 = vld [vmem:[#allocation4 + $0x43] sm:$0xff] }
 0x26f   :  { %5699 = vmatprep.mubr.msk.f32.mxu1 %vm6337_vm8, %v6334_v16  ;;  %v2656_v31 = vld [vmem:[#allocation4 + $0x34] sm:$0xff]  ;;  %v2657_v44 = vld [vmem:[#allocation4 + $0x3c] sm:$0xff]  ;;  %v2658_v3 = vld [vmem:[#allocation4 + $0x44] sm:$0xff] }
 0x270   :  { %v2816_v54 = vld [vmem:[#allocation4 + $0x35] sm:$0xff]  ;;  %v2817_v26 = vld [vmem:[#allocation4 + $0x3d] sm:$0xff]  ;;  %v2818_v7 = vld [vmem:[#allocation4 + $0x45] sm:$0xff] }
 0x272   :  { %5700 = vmatmul.mubr.msk.f32.gmra.mrb[22].mxu1 %vm1930_vm5, %v2047_v57  ;;  %v2970_v57 = vld [vmem:[#allocation4 + $0x6] sm:$0xff] }
 0x273   :  { %5706 = vmatprep.mubr.msk.f32.mxu1 %vm6337_vm8, %v6334_v16 }
 0x276   :  { %5707 = vmatmul.mubr.msk.f32.vlgmr.msra.gmra.mrb[24].mxu1 %vm1930_vm5, %v2028_v56 }
 0x277   :  { %6088 = vmatpush3.bf16.msk.msra.mxu1 %vm6790_vm7, %v6086_v20  ;;  %5709 = vmatprep.mubr.msk.f32.mxu1 %vm6337_vm8, %v6334_v16 }
 0x278   :  { %6089 = vmatprep.subr.bf16.mxu1 %v6335_v30 }
 0x27a   :  { %5710 = vmatmul.mubr.msk.f32.gmra.mrb[26].mxu1 %vm1930_vm5, %v2029_v58  ;;  %v2971_v58 = vld [vmem:[#allocation4 + $0xe] sm:$0xff] }
 0x27b   :  { %5712 = vmatprep.mubr.msk.f32.mxu1 %vm6337_vm8, %v6334_v16 }
 0x27e   :  { %5713 = vmatmul.mubr.msk.f32.gmra.mrb[28].mxu1 %vm1930_vm5, %v2030_v61 }
 0x27f   :  { %5715 = vmatprep.mubr.msk.f32.mxu1 %vm6337_vm8, %v6334_v16 }
 0x282   :  { %5716 = vmatmul.mubr.msk.f32.gmra.mrb[30].mxu1 %vm1930_vm5, %v2031_v62 }
 0x283   :  { %5718 = vmatprep.mubr.msk.f32.mxu1 %vm6337_vm8, %v6334_v16 }
 0x286   :  { %5719 = vmatmul.mubr.msk.f32.gmra.mrb[32].mxu1 %vm1930_vm5, %v2032_v1  ;;  %v2972_v1 = vld [vmem:[#allocation4 + $0x16] sm:$0xff] }
 0x287   :  { %5721 = vmatprep.mubr.msk.f32.mxu1 %vm6337_vm8, %v6334_v16 }
 0x28a   :  { %5722 = vmatmul.mubr.msk.f32.gmra.mrb[34].mxu1 %vm1930_vm5, %v2033_v22 }
 0x28b   :  { %5724 = vmatprep.mubr.msk.f32.mxu1 %vm6337_vm8, %v6334_v16 }
 0x28e   :  { %5725 = vmatmul.mubr.msk.f32.gmra.mrb[36].mxu1 %vm1930_vm5, %v2034_v2 }
 0x28f   :  { %5727 = vmatprep.mubr.msk.f32.mxu1 %vm6337_vm8, %v6334_v16 }
 0x292   :  { %5728 = vmatmul.mubr.msk.f32.gmra.mrb[38].mxu1 %vm1930_vm5, %v2035_v5  ;;  %v2973_v5 = vld [vmem:[#allocation4 + $0x1e] sm:$0xff] }
 0x293   :  { %5730 = vmatprep.mubr.msk.f32.mxu1 %vm6337_vm8, %v6334_v16 }
 0x296   :  { %5731 = vmatmul.mubr.msk.f32.gmra.mrb[40].mxu1 %vm1930_vm5, %v2036_v8  ;;  %v2974_v8 = vld [vmem:[#allocation4 + $0x26] sm:$0xff] }
 0x297   :  { %5737 = vmatprep.mubr.msk.f32.mxu1 %vm6337_vm8, %v6334_v16 }
 0x29a   :  { %5738 = vmatmul.mubr.msk.f32.vlgmr.msra.gmra.mrb[42].mxu1 %vm1930_vm5, %v2330_v32 }
 0x29b   :  { %6092 = vmatpush3.bf16.msk.msra.mxu1 %vm6790_vm7, %v6090_v9  ;;  %5740 = vmatprep.mubr.msk.f32.mxu1 %vm6337_vm8, %v6334_v16 }
 0x29c   :  { %6093 = vmatprep.subr.bf16.mxu1 %v6335_v30 }
 0x29e   :  { %5741 = vmatmul.mubr.msk.f32.gmra.mrb[44].mxu1 %vm1930_vm5, %v2331_v10  ;;  %v2975_v10 = vld [vmem:[#allocation4 + $0x2e] sm:$0xff] }
 0x29f   :  { %5743 = vmatprep.mubr.msk.f32.mxu1 %vm6337_vm8, %v6334_v16 }
 0x2a2   :  { %5744 = vmatmul.mubr.msk.f32.gmra.mrb[46].mxu1 %vm1930_vm5, %v2332_v11 }
 0x2a3   :  { %5746 = vmatprep.mubr.msk.f32.mxu1 %vm6337_vm8, %v6334_v16 }
 0x2a6   :  { %5747 = vmatmul.mubr.msk.f32.gmra.mrb[48].mxu1 %vm1930_vm5, %v2333_v43 }
 0x2a7   :  { %5749 = vmatprep.mubr.msk.f32.mxu1 %vm6337_vm8, %v6334_v16 }
 0x2aa   :  { %5750 = vmatmul.mubr.msk.f32.gmra.mrb[50].mxu1 %vm1930_vm5, %v2334_v12  ;;  %v2976_v12 = vld [vmem:[#allocation4 + $0x36] sm:$0xff] }
 0x2ab   :  { %5752 = vmatprep.mubr.msk.f32.mxu1 %vm6337_vm8, %v6334_v16 }
 0x2ae   :  { %5753 = vmatmul.mubr.msk.f32.gmra.mrb[52].mxu1 %vm1930_vm5, %v2335_v46 }
 0x2af   :  { %5755 = vmatprep.mubr.msk.f32.mxu1 %vm6337_vm8, %v6334_v16 }
 0x2b2   :  { %5756 = vmatmul.mubr.msk.f32.gmra.mrb[54].mxu1 %vm1930_vm5, %v2336_v13 }
 0x2b3   :  { %5758 = vmatprep.mubr.msk.f32.mxu1 %vm6337_vm8, %v6334_v16 }
 0x2b6   :  { %5759 = vmatmul.mubr.msk.f32.gmra.mrb[56].mxu1 %vm1930_vm5, %v2337_v15  ;;  %v2977_v15 = vld [vmem:[#allocation4 + $0x3e] sm:$0xff] }
 0x2b7   :  { %5761 = vmatprep.mubr.msk.f32.mxu1 %vm6337_vm8, %v6334_v16 }
 0x2ba   :  { %5762 = vmatmul.mubr.msk.f32.gmra.mrb[58].mxu1 %vm1930_vm5, %v2338_v59  ;;  %v2978_v59 = vld [vmem:[#allocation4 + $0x46] sm:$0xff] }
 0x2bb   :  { %5768 = vmatprep.mubr.msk.f32.mxu1 %vm6337_vm8, %v6334_v16 }
 0x2be   :  { %5769 = vmatmul.mubr.msk.f32.vlgmr.msra.gmra.mrb[60].mxu1 %vm1930_vm5, %v2490_v19 }
 0x2bf   :  { %6096 = vmatpush3.bf16.msk.msra.mxu1 %vm6790_vm7, %v6094_v18  ;;  %5771 = vmatprep.mubr.msk.f32.mxu1 %vm6337_vm8, %v6334_v16 }
 0x2c0   :  { %6097 = vmatprep.subr.bf16.mxu1 %v6335_v30 }
 0x2c2   :  { %5772 = vmatmul.mubr.msk.f32.gmra.mrb[62].mxu1 %vm1930_vm5, %v2491_v23 }
 0x2c3   :  { %5774 = vmatprep.mubr.msk.f32.mxu1 %vm6337_vm8, %v6334_v16 }
 0x2c6   :  { %5775 = vmatmul.mubr.msk.f32.gmra.mrb[64].mxu1 %vm1930_vm5, %v2492_v42 }
 0x2c7   :  { %5777 = vmatprep.mubr.msk.f32.mxu1 %vm6337_vm8, %v6334_v16 }
 0x2ca   :  { %5778 = vmatmul.mubr.msk.f32.gmra.mrb[66].mxu1 %vm1930_vm5, %v2493_v28 }
 0x2cb   :  { %5780 = vmatprep.mubr.msk.f32.mxu1 %vm6337_vm8, %v6334_v16 }
 0x2ce   :  { %5781 = vmatmul.mubr.msk.f32.gmra.mrb[68].mxu1 %vm1930_vm5, %v2494_v29 }
 0x2cf   :  { %5783 = vmatprep.mubr.msk.f32.mxu1 %vm6337_vm8, %v6334_v16 }
 0x2d2   :  { %5784 = vmatmul.mubr.msk.f32.gmra.mrb[70].mxu1 %vm1930_vm5, %v2495_v63 }
 0x2d3   :  { %5786 = vmatprep.mubr.msk.f32.mxu1 %vm6337_vm8, %v6334_v16 }
 0x2d6   :  { %5787 = vmatmul.mubr.msk.f32.gmra.mrb[72].mxu1 %vm1930_vm5, %v2496_v24 }
 0x2d7   :  { %5789 = vmatprep.mubr.msk.f32.mxu1 %vm6337_vm8, %v6334_v16 }
 0x2da   :  { %5790 = vmatmul.mubr.msk.f32.gmra.mrb[74].mxu1 %vm1930_vm5, %v2497_v34 }
 0x2db   :  { %5792 = vmatprep.mubr.msk.f32.mxu1 %vm6337_vm8, %v6334_v16 }
 0x2de   :  { %5793 = vmatmul.mubr.msk.f32.gmra.mrb[76].mxu1 %vm1930_vm5, %v2498_v0 }
 0x2df   :  { %5799 = vmatprep.mubr.msk.f32.mxu1 %vm6337_vm8, %v6334_v16 }
 0x2e2   :  { %5800 = vmatmul.mubr.msk.f32.vlgmr.msra.gmra.mrb[78].mxu1 %vm1930_vm5, %v2650_v21 }
 0x2e3   :  { %6100 = vmatpush3.bf16.msk.msra.mxu1 %vm6790_vm7, %v6098_v25  ;;  %5802 = vmatprep.mubr.msk.f32.mxu1 %vm6337_vm8, %v6334_v16 }
 0x2e4   :  { %6101 = vmatprep.subr.bf16.mxu1 %v6335_v30 }
 0x2e6   :  { %5803 = vmatmul.mubr.msk.f32.gmra.mrb[80].mxu1 %vm1930_vm5, %v2651_v47 }
 0x2e7   :  { %5805 = vmatprep.mubr.msk.f32.mxu1 %vm6337_vm8, %v6334_v16 }
 0x2ea   :  { %5806 = vmatmul.mubr.msk.f32.gmra.mrb[82].mxu1 %vm1930_vm5, %v2652_v39 }
 0x2eb   :  { %5808 = vmatprep.mubr.msk.f32.mxu1 %vm6337_vm8, %v6334_v16 }
 0x2ee   :  { %5809 = vmatmul.mubr.msk.f32.gmra.mrb[84].mxu1 %vm1930_vm5, %v2653_v51 }
 0x2ef   :  { %5811 = vmatprep.mubr.msk.f32.mxu1 %vm6337_vm8, %v6334_v16 }
 0x2f2   :  { %5812 = vmatmul.mubr.msk.f32.gmra.mrb[86].mxu1 %vm1930_vm5, %v2654_v41 }
 0x2f3   :  { %5814 = vmatprep.mubr.msk.f32.mxu1 %vm6337_vm8, %v6334_v16 }
 0x2f6   :  { %5815 = vmatmul.mubr.msk.f32.gmra.mrb[88].mxu1 %vm1930_vm5, %v2655_v38 }
 0x2f7   :  { %5817 = vmatprep.mubr.msk.f32.mxu1 %vm6337_vm8, %v6334_v16 }
 0x2fa   :  { %5818 = vmatmul.mubr.msk.f32.gmra.mrb[90].mxu1 %vm1930_vm5, %v2656_v31 }
 0x2fb   :  { %5820 = vmatprep.mubr.msk.f32.mxu1 %vm6337_vm8, %v6334_v16 }
 0x2fe   :  { %5821 = vmatmul.mubr.msk.f32.gmra.mrb[92].mxu1 %vm1930_vm5, %v2657_v44 }
 0x2ff   :  { %5823 = vmatprep.mubr.msk.f32.mxu1 %vm6337_vm8, %v6334_v16 }
 0x302   :  { %5824 = vmatmul.mubr.msk.f32.gmra.mrb[94].mxu1 %vm1930_vm5, %v2658_v3 }
 0x303   :  { %5830 = vmatprep.mubr.msk.f32.mxu1 %vm6337_vm8, %v6334_v16 }
 0x306   :  { %5831 = vmatmul.mubr.msk.f32.vlgmr.msra.gmra.mrb[96].mxu1 %vm1930_vm5, %v2810_v49 }
 0x307   :  { %6104 = vmatpush3.bf16.msk.msra.mxu1 %vm6790_vm7, %v6102_v48  ;;  %5833 = vmatprep.mubr.msk.f32.mxu1 %vm6337_vm8, %v6334_v16  ;;  %vm4944_vm7 = vcmask 9216  }
 0x308   :  { %6120 = vmatprep.subr.bf16.mxu1 %v6335_v30 }
 0x30a   :  { %5834 = vmatmul.mubr.msk.f32.gmra.mrb[98].mxu1 %vm1930_vm5, %v2811_v52 }
 0x30b   :  { %5836 = vmatprep.mubr.msk.f32.mxu1 %vm6337_vm8, %v6334_v16 }
 0x30e   :  { %5837 = vmatmul.mubr.msk.f32.gmra.mrb[100].mxu1 %vm1930_vm5, %v2812_v17 }
 0x30f   :  { %5839 = vmatprep.mubr.msk.f32.mxu1 %vm6337_vm8, %v6334_v16 }
 0x312   :  { %5840 = vmatmul.mubr.msk.f32.gmra.mrb[102].mxu1 %vm1930_vm5, %v2813_v4 }
 0x313   :  { %5842 = vmatprep.mubr.msk.f32.mxu1 %vm6337_vm8, %v6334_v16 }
 0x316   :  { %5843 = vmatmul.mubr.msk.f32.gmra.mrb[104].mxu1 %vm1930_vm5, %v2814_v33 }
 0x317   :  { %5845 = vmatprep.mubr.msk.f32.mxu1 %vm6337_vm8, %v6334_v16 }
 0x31a   :  { %5846 = vmatmul.mubr.msk.f32.gmra.mrb[106].mxu1 %vm1930_vm5, %v2815_v53 }
 0x31b   :  { %5848 = vmatprep.mubr.msk.f32.mxu1 %vm6337_vm8, %v6334_v16 }
 0x31e   :  { %5849 = vmatmul.mubr.msk.f32.gmra.mrb[108].mxu1 %vm1930_vm5, %v2816_v54 }
 0x31f   :  { %5851 = vmatprep.mubr.msk.f32.mxu1 %vm6337_vm8, %v6334_v16 }
 0x322   :  { %5852 = vmatmul.mubr.msk.f32.gmra.mrb[110].mxu1 %vm1930_vm5, %v2817_v26 }
 0x323   :  { %5854 = vmatprep.mubr.msk.f32.mxu1 %vm6337_vm8, %v6334_v16 }
 0x325   :  { %v2146_v37 = vpop.f32.mrb[6].mxu1 }
 0x326   :  { %v5677_v55 = vpop.f32.mrb[7].mxu1  ;;  %5855 = vmatmul.mubr.msk.f32.gmra.mrb[112].mxu1 %vm1930_vm5, %v2818_v7 }
 0x327   :  { %5861 = vmatprep.mubr.msk.f32.mxu1 %vm6337_vm8, %v6334_v16 }
 0x329   :  { %v2151_v50 = vpop.f32.mrb[8].mxu1 }
 0x32a   :  { %v5680_v20 = vpop.f32.mrb[9].mxu1  ;;  %5862 = vmatmul.mubr.msk.f32.vlgmr.msra.gmra.mrb[114].mxu1 %vm1930_vm5, %v2970_v57 }
 0x32b   :  { %5864 = vmatprep.mubr.msk.f32.mxu1 %vm6337_vm8, %v6334_v16 }
 0x32d   :  { %v2156_v56 = vpop.f32.mrb[10].mxu1 }
 0x32e   :  { %v5683_v61 = vpop.f32.mrb[11].mxu1  ;;  %5865 = vmatmul.mubr.msk.f32.gmra.mrb[116].mxu1 %vm1930_vm5, %v2971_v58 }
 0x32f   :  { %5867 = vmatprep.mubr.msk.f32.mxu1 %vm6337_vm8, %v6334_v16 }
 0x331   :  { %v2161_v62 = vpop.f32.mrb[12].mxu1 }
 0x332   :  { %v5686_v22 = vpop.f32.mrb[13].mxu1  ;;  %5868 = vmatmul.mubr.msk.f32.gmra.mrb[118].mxu1 %vm1930_vm5, %v2972_v1 }
 0x333   :  { %5870 = vmatprep.mubr.msk.f32.mxu1 %vm6337_vm8, %v6334_v16 }
 0x335   :  { %v2166_v2 = vpop.f32.mrb[14].mxu1 }
 0x336   :  { %v5689_v6 = vpop.f32.mrb[15].mxu1  ;;  %5871 = vmatmul.mubr.msk.f32.gmra.mrb[120].mxu1 %vm1930_vm5, %v2973_v5 }
 0x337   :  { %5873 = vmatprep.mubr.msk.f32.mxu1 %vm6337_vm8, %v6334_v16 }
 0x339   :  { %v2171_v40 = vpop.f32.mrb[16].mxu1 }
 0x33a   :  { %v5692_v9 = vpop.f32.mrb[17].mxu1  ;;  %5874 = vmatmul.mubr.msk.f32.gmra.mrb[122].mxu1 %vm1930_vm5, %v2974_v8 }
 0x33b   :  { %5876 = vmatprep.mubr.msk.f32.mxu1 %vm6337_vm8, %v6334_v16 }
 0x33d   :  { %v2176_v32 = vpop.f32.mrb[18].mxu1 }
 0x33e   :  { %v5695_v11 = vpop.f32.mrb[19].mxu1  ;;  %5877 = vmatmul.mubr.msk.f32.gmra.mrb[124].mxu1 %vm1930_vm5, %v2975_v10 }
 0x33f   :  { %5879 = vmatprep.mubr.msk.f32.mxu1 %vm6337_vm8, %v6334_v16 }
 0x341   :  { %v2181_v43 = vpop.f32.mrb[20].mxu1 }
 0x342   :  { %v5698_v46 = vpop.f32.mrb[21].mxu1  ;;  %5880 = vmatmul.mubr.msk.f32.gmra.mrb[126].mxu1 %vm1930_vm5, %v2976_v12 }
 0x343   :  { %5882 = vmatprep.mubr.msk.f32.mxu1 %vm6337_vm8, %v6334_v16 }
 0x345   :  { %v2186_v13 = vpop.f32.mrb[22].mxu1 }
 0x346   :  { %v5701_v27 = vpop.f32.mrb[23].mxu1  ;;  %5883 = vmatmul.mubr.msk.f32.gmra.mrb[128].mxu1 %vm1930_vm5, %v2977_v15 }
 0x347   :  { %5885 = vmatprep.mubr.msk.f32.mxu1 %vm6337_vm8, %v6334_v16 }
 0x349   :  { %v2286_v14 = vpop.f32.mrb[24].mxu1 }
 0x34a   :  { %v2287_v18 = vadd.f32 %v2286_v14, %v2146_v37  ;;  %v5708_v19 = vpop.f32.mrb[25].mxu1  ;;  %5886 = vmatmul.mubr.msk.f32.gmra.mrb[130].mxu1 %vm1930_vm5, %v2978_v59  ;;  %vm4713_vm5 = vcmask 467968  }
 0x34b   :  { %5939 = vmatprep.mubr.msk.f32.mxu1 %vm6337_vm8, %v6334_v16 }
 0x34d   :  { %v2291_v23 = vpop.f32.mrb[26].mxu1 }
 0x34e   :  { %v2292_v42 = vadd.f32 %v2291_v23, %v2151_v50  ;;  %v5711_v28 = vpop.f32.mrb[27].mxu1 }
 0x351   :  { %v2296_v29 = vpop.f32.mrb[28].mxu1 }
 0x352   :  { %v2297_v63 = vadd.f32 %v2296_v29, %v2156_v56  ;;  %v5714_v24 = vpop.f32.mrb[29].mxu1 }
 0x355   :  { %v2301_v34 = vpop.f32.mrb[30].mxu1 }
 0x356   :  { %v2302_v35 = vadd.f32 %v2301_v34, %v2161_v62  ;;  %v5717_v36 = vpop.f32.mrb[31].mxu1 }
 0x357   :  { %v3238_v36 = vld [vmem:[#allocation7 + $0x108] sm:$0xff] }
 0x359   :  { %v2306_v0 = vpop.f32.mrb[32].mxu1 }
 0x35a   :  { %v2307_v25 = vadd.f32 %v2306_v0, %v2166_v2  ;;  %v5720_v21 = vpop.f32.mrb[33].mxu1 }
 0x35d   :  { %v2311_v47 = vpop.f32.mrb[34].mxu1 }
 0x35e   :  { %v2312_v39 = vadd.f32 %v2311_v47, %v2171_v40  ;;  %v5723_v51 = vpop.f32.mrb[35].mxu1 }
 0x361   :  { %v2316_v41 = vpop.f32.mrb[36].mxu1 }
 0x362   :  { %v2317_v38 = vadd.f32 %v2316_v41, %v2176_v32  ;;  %v5726_v31 = vpop.f32.mrb[37].mxu1 }
 0x363   :  { %v3641_v31 = vld [vmem:[#allocation7 + $0x160] sm:$0xff] }
 0x365   :  { %v2321_v44 = vpop.f32.mrb[38].mxu1 }
 0x366   :  { %v2322_v45 = vadd.f32 %v2321_v44, %v2181_v43  ;;  %v5729_v60 = vpop.f32.mrb[39].mxu1  ;;  %v3642_v44 = vld [vmem:[#allocation7 + $0x168] sm:$0xff] }
 0x367   :  { %v6121_v60 = vpack.c.bf16 %v3642_v44, %v3641_v31  ;;  %v7121_v31 = vld [vmem:[%s7419_s1 + $0x4] ss:$0 sm:$0xff] }
 0x369   :  { %v2326_v3 = vpop.f32.mrb[40].mxu1  ;;  %6122 = vmatpush3.bf16.msra.mxu1 %v6121_v60 }
 0x36a   :  { %v2327_v48 = vadd.f32 %v2326_v3, %v2186_v13  ;;  %v5732_v49 = vpop.f32.mrb[41].mxu1  ;;  %5937 = vmatprep.subr.mxu1 %v6334_v16 }
 0x36d   :  { %v2437_v52 = vpop.f32.mrb[42].mxu1 }
 0x36e   :  { %v2481_v17 = vadd.f32 %v2437_v52, %v2287_v18  ;;  %v5739_v4 = vpop.f32.mrb[43].mxu1 }
 0x36f   :  { %v3643_v4 = vld [vmem:[#allocation7 + $0x170] sm:$0xff] }
 0x370   :  { %5938 = vmatpush3.msra.mxu1 %v3643_v4  ;;  %v7132_v4 = vld [vmem:[%s7419_s1 + $0x6] ss:$0 sm:$0xff] }
 0x371   :  { %v2442_v33 = vpop.f32.mrb[44].mxu1  ;;  %6126 = vmatprep.subr.bf16.mxu1 %v6335_v30 }
 0x372   :  { %v2482_v53 = vadd.f32 %v2442_v33, %v2292_v42  ;;  %v5742_v54 = vpop.f32.mrb[45].mxu1 }
 0x375   :  { %v2447_v26 = vpop.f32.mrb[46].mxu1 }
 0x376   :  { %v2483_v37 = vadd.f32 %v2447_v26, %v2297_v63  ;;  %v5745_v55 = vpop.f32.mrb[47].mxu1 }
 0x379   :  { %v2452_v7 = vpop.f32.mrb[48].mxu1 }
 0x37a   :  { %v2484_v50 = vadd.f32 %v2452_v7, %v2302_v35  ;;  %v5748_v57 = vpop.f32.mrb[49].mxu1  ;;  %v3237_v35 = vld [vmem:[#allocation7 + $0x100] sm:$0xff] }
 0x37b   :  { %v6106_v0 = vpack.c.bf16 %v3238_v36, %v3237_v35 }
 0x37d   :  { %v2457_v20 = vpop.f32.mrb[50].mxu1  ;;  %6107 = vmatpush3.bf16.msra.mxu0 %v6106_v0 }
 0x37e   :  { %v2485_v56 = vadd.f32 %v2457_v20, %v2307_v25  ;;  %v5751_v58 = vpop.f32.mrb[51].mxu1  ;;  %5892 = vmatprep.subr.mxu0 %v6334_v16 }
 0x381   :  { %v2462_v61 = vpop.f32.mrb[52].mxu1 }
 0x382   :  { %v2486_v62 = vadd.f32 %v2462_v61, %v2312_v39  ;;  %v5754_v1 = vpop.f32.mrb[53].mxu1 }
 0x385   :  { %v2467_v22 = vpop.f32.mrb[54].mxu1 }
 0x386   :  { %v2487_v2 = vadd.f32 %v2467_v22, %v2317_v38  ;;  %v5757_v5 = vpop.f32.mrb[55].mxu1  ;;  %v3239_v38 = vld [vmem:[#allocation7 + $0x110] sm:$0xff] }
 0x387   :  { %5893 = vmatpush3.msra.mxu0 %v3239_v38 }
 0x388   :  { %6108 = vmatprep.subr.bf16.mxu0 %v6335_v30 }
 0x389   :  { %v2472_v6 = vpop.f32.mrb[56].mxu1 }
 0x38a   :  { %v2488_v40 = vadd.f32 %v2472_v6, %v2322_v45  ;;  %v5760_v8 = vpop.f32.mrb[57].mxu1 }
 0x38d   :  { %v2477_v9 = vpop.f32.mrb[58].mxu1 }
 0x38e   :  { %v2489_v32 = vadd.f32 %v2477_v9, %v2327_v48  ;;  %v5763_v10 = vpop.f32.mrb[59].mxu1 }
 0x391   :  { %v2597_v11 = vpop.f32.mrb[60].mxu1 }
 0x392   :  { %v2641_v43 = vadd.f32 %v2597_v11, %v2481_v17  ;;  %v5770_v12 = vpop.f32.mrb[61].mxu1 }
 0x395   :  { %v2602_v46 = vpop.f32.mrb[62].mxu1 }
 0x396   :  { %v2642_v13 = vadd.f32 %v2602_v46, %v2482_v53  ;;  %v5773_v15 = vpop.f32.mrb[63].mxu1 }
 0x399   :  { %v2607_v27 = vpop.f32.mrb[64].mxu1 }
 0x39a   :  { %v2643_v14 = vadd.f32 %v2607_v27, %v2483_v37  ;;  %v5776_v59 = vpop.f32.mrb[65].mxu1 }
 0x39d   :  { %v2612_v18 = vpop.f32.mrb[66].mxu1 }
 0x39e   :  { %v2644_v19 = vadd.f32 %v2612_v18, %v2484_v50  ;;  %v5779_v23 = vpop.f32.mrb[67].mxu1 }
 0x3a1   :  { %v2617_v42 = vpop.f32.mrb[68].mxu1 }
 0x3a2   :  { %v2645_v28 = vadd.f32 %v2617_v42, %v2485_v56  ;;  %v5782_v29 = vpop.f32.mrb[69].mxu1 }
 0x3a5   :  { %v2622_v63 = vpop.f32.mrb[70].mxu1 }
 0x3a6   :  { %v2646_v24 = vadd.f32 %v2622_v63, %v2486_v62  ;;  %v5785_v34 = vpop.f32.mrb[71].mxu1 }
 0x3a9   :  { %v2627_v25 = vpop.f32.mrb[72].mxu1 }
 0x3aa   :  { %v2647_v21 = vadd.f32 %v2627_v25, %v2487_v2  ;;  %v5788_v47 = vpop.f32.mrb[73].mxu1 }
 0x3ad   :  { %v2632_v39 = vpop.f32.mrb[74].mxu1 }
 0x3ae   :  { %v2648_v51 = vadd.f32 %v2632_v39, %v2488_v40  ;;  %v5791_v41 = vpop.f32.mrb[75].mxu1 }
 0x3b1   :  { %v2637_v45 = vpop.f32.mrb[76].mxu1 }
 0x3b2   :  { %v2649_v3 = vadd.f32 %v2637_v45, %v2489_v32  ;;  %v5794_v48 = vpop.f32.mrb[77].mxu1 }
 0x3b5   :  { %v2757_v49 = vpop.f32.mrb[78].mxu1 }
 0x3b6   :  { %v2801_v52 = vadd.f32 %v2757_v49, %v2641_v43  ;;  %v5801_v17 = vpop.f32.mrb[79].mxu1 }
 0x3b9   :  { %v2762_v33 = vpop.f32.mrb[80].mxu1 }
 0x3ba   :  { %v2802_v53 = vadd.f32 %v2762_v33, %v2642_v13  ;;  %v5804_v54 = vpop.f32.mrb[81].mxu1 }
 0x3bd   :  { %v2767_v26 = vpop.f32.mrb[82].mxu1 }
 0x3be   :  { %v2803_v37 = vadd.f32 %v2767_v26, %v2643_v14  ;;  %v5807_v55 = vpop.f32.mrb[83].mxu1 }
 0x3c1   :  { %v2772_v7 = vpop.f32.mrb[84].mxu1 }
 0x3c2   :  { %v2804_v50 = vadd.f32 %v2772_v7, %v2644_v19  ;;  %v5810_v57 = vpop.f32.mrb[85].mxu1 }
 0x3c5   :  { %v2777_v20 = vpop.f32.mrb[86].mxu1 }
 0x3c6   :  { %v2805_v56 = vadd.f32 %v2777_v20, %v2645_v28  ;;  %v5813_v58 = vpop.f32.mrb[87].mxu1 }
 0x3c9   :  { %v2782_v61 = vpop.f32.mrb[88].mxu1 }
 0x3ca   :  { %v2806_v62 = vadd.f32 %v2782_v61, %v2646_v24  ;;  %v5816_v1 = vpop.f32.mrb[89].mxu1 }
 0x3cd   :  { %v2787_v22 = vpop.f32.mrb[90].mxu1 }
 0x3ce   :  { %v2807_v2 = vadd.f32 %v2787_v22, %v2647_v21  ;;  %v5819_v5 = vpop.f32.mrb[91].mxu1 }
 0x3d1   :  { %v2792_v6 = vpop.f32.mrb[92].mxu1 }
 0x3d2   :  { %v2808_v40 = vadd.f32 %v2792_v6, %v2648_v51  ;;  %v5822_v8 = vpop.f32.mrb[93].mxu1 }
 0x3d5   :  { %v2797_v9 = vpop.f32.mrb[94].mxu1 }
 0x3d6   :  { %v2809_v32 = vadd.f32 %v2797_v9, %v2649_v3  ;;  %v5825_v10 = vpop.f32.mrb[95].mxu1  ;;  %v7127_v3 = vld [vmem:[%s7419_s1 + $0x5] ss:$0 sm:$0xff] }
 0x3d9   :  { %v2917_v11 = vpop.f32.mrb[96].mxu1 }
 0x3da   :  { %v2961_v43 = vadd.f32 %v2917_v11, %v2801_v52  ;;  %v5832_v12 = vpop.f32.mrb[97].mxu1 }
 0x3dd   :  { %v2922_v46 = vpop.f32.mrb[98].mxu1 }
 0x3de   :  { %v2962_v13 = vadd.f32 %v2922_v46, %v2802_v53  ;;  %v5835_v15 = vpop.f32.mrb[99].mxu1 }
 0x3e1   :  { %v2927_v27 = vpop.f32.mrb[100].mxu1 }
 0x3e2   :  { %v2963_v14 = vadd.f32 %v2927_v27, %v2803_v37  ;;  %v5838_v59 = vpop.f32.mrb[101].mxu1 }
 0x3e5   :  { %v2932_v18 = vpop.f32.mrb[102].mxu1 }
 0x3e6   :  { %v2964_v19 = vadd.f32 %v2932_v18, %v2804_v50  ;;  %v5841_v23 = vpop.f32.mrb[103].mxu1 }
 0x3e9   :  { %v2937_v42 = vpop.f32.mrb[104].mxu1 }
 0x3ea   :  { %v2965_v28 = vadd.f32 %v2937_v42, %v2805_v56  ;;  %v5844_v29 = vpop.f32.mrb[105].mxu1 }
 0x3ed   :  { %v2942_v63 = vpop.f32.mrb[106].mxu1 }
 0x3ee   :  { %v2966_v24 = vadd.f32 %v2942_v63, %v2806_v62  ;;  %v5847_v34 = vpop.f32.mrb[107].mxu1 }
 0x3f1   :  { %v2947_v35 = vpop.f32.mrb[108].mxu1 }
 0x3f2   :  { %v2967_v36 = vadd.f32 %v2947_v35, %v2807_v2  ;;  %v5850_v0 = vpop.f32.mrb[109].mxu1 }
 0x3f5   :  { %v2952_v25 = vpop.f32.mrb[110].mxu1 }
 0x3f6   :  { %v7114_v21 = vadd.f32 %v2952_v25, %v2808_v40  ;;  %v5853_v47 = vpop.f32.mrb[111].mxu1 }
 0x3f9   :  { %v2957_v39 = vpop.f32.mrb[112].mxu1 }
 0x3fa   :  { %v7116_v51 = vadd.f32 %v2957_v39, %v2809_v32  ;;  %v5856_v41 = vpop.f32.mrb[113].mxu1 }
 0x3fd   :  { %v3077_v38 = vpop.f32.mrb[114].mxu1 }
 0x3fe   :  { %v3121_v44 = vadd.f32 %v3077_v38, %v2961_v43  ;;  %v5863_v45 = vpop.f32.mrb[115].mxu1 }
 0x400   :  { %v3135_v60 = vadd.f32 %v7121_v31, %v3121_v44 }
 0x401   :  { %v3082_v48 = vpop.f32.mrb[116].mxu1 }
 0x402   :  { %v3144_v49 = vmax.f32 %v3135_v60, 0.0  ;;  %v3122_v52 = vadd.f32 %v3082_v48, %v2962_v13  ;;  %v5866_v17 = vpop.f32.mrb[117].mxu1 }
 0x404   :  { %v3158_v33 = vmul.f32 %v7127_v3, %v3144_v49  ;;  %v3136_v53 = vadd.f32 %v7121_v31, %v3122_v52 }
 0x405   :  { %v3087_v54 = vpop.f32.mrb[118].mxu1 }
 0x406   :  { %v3172_v26 = vadd.f32 %v7132_v4, %v3158_v33  ;;  %v3145_v37 = vmax.f32 %v3136_v53, 0.0  ;;  %v3123_v55 = vadd.f32 %v3087_v54, %v2963_v14  ;;  %v5869_v7 = vpop.f32.mrb[119].mxu1 }
 0x408   :  { %3182 = vst.msk [vmem:[#allocation5] sm:$0xff] %vm3181_vm9, %v3172_v26  ;;  %v3159_v50 = vmul.f32 %v7127_v3, %v3145_v37  ;;  %v3137_v57 = vadd.f32 %v7121_v31, %v3123_v55  ;;  %v3228_v55 = vld [vmem:[#allocation7 + $0xe8] sm:$0xff] }
 0x409   :  { %v3092_v20 = vpop.f32.mrb[120].mxu1 }
 0x40a   :  { %v3173_v56 = vadd.f32 %v7132_v4, %v3159_v50  ;;  %v3146_v58 = vmax.f32 %v3137_v57, 0.0  ;;  %v3124_v61 = vadd.f32 %v3092_v20, %v2964_v19  ;;  %v5872_v62 = vpop.f32.mrb[121].mxu1 }
 0x40c   :  { %3183 = vst.msk [vmem:[#allocation5 + $0x8] sm:$0xff] %vm3181_vm9, %v3173_v56  ;;  %v3160_v1 = vmul.f32 %v7127_v3, %v3146_v58  ;;  %v3138_v22 = vadd.f32 %v7121_v31, %v3124_v61 }
 0x40d   :  { %v3097_v2 = vpop.f32.mrb[122].mxu1 }
 0x40e   :  { %v3174_v5 = vadd.f32 %v7132_v4, %v3160_v1  ;;  %v3147_v6 = vmax.f32 %v3138_v22, 0.0  ;;  %v3125_v40 = vadd.f32 %v3097_v2, %v2965_v28  ;;  %v5875_v8 = vpop.f32.mrb[123].mxu1  ;;  %v3392_v2 = vld [vmem:[#allocation7 + $0x118] sm:$0xff] }
 0x40f   :  { %v3807_v8 = vld [vmem:[#allocation7 + $0x190] sm:$0xff] }
 0x410   :  { %3184 = vst.msk [vmem:[#allocation5 + $0x10] sm:$0xff] %vm3181_vm9, %v3174_v5  ;;  %v3161_v9 = vmul.f32 %v7127_v3, %v3147_v6  ;;  %v3139_v32 = vadd.f32 %v7121_v31, %v3125_v40  ;;  %v3393_v5 = vld [vmem:[#allocation7 + $0x120] sm:$0xff]  ;;  %v3230_v40 = vld [vmem:[#allocation7 + $0xf8] sm:$0xff] }
 0x411   :  { %v3102_v10 = vpop.f32.mrb[124].mxu1 }
 0x412   :  { %v3175_v11 = vadd.f32 %v7132_v4, %v3161_v9  ;;  %v3148_v43 = vmax.f32 %v3139_v32, 0.0  ;;  %v3126_v12 = vadd.f32 %v3102_v10, %v2966_v24  ;;  %v5878_v46 = vpop.f32.mrb[125].mxu1  ;;  %v3808_v9 = vld [vmem:[#allocation7 + $0x198] sm:$0xff]  ;;  %v6112_v32 = vpack.c.bf16 %v3393_v5, %v3392_v2  ;;  %v3891_v5 = vld [vmem:[#allocation7 + $0x1b0] sm:$0xff] }
 0x413   :  { %v3191_v13 = vld [vmem:[#allocation5] ss:$2 sm:$0xff]  ;;  %v3201_v15 = vld [vmem:[#allocation5 + $0x1] ss:$2 sm:$0xff] }
 0x414   :  { %v3210_v27 = vmax.f32 %v3191_v13, %v3201_v15  ;;  %3185 = vst.msk [vmem:[#allocation5 + $0x18] sm:$0xff] %vm3181_vm9, %v3175_v11  ;;  %v3162_v14 = vmul.f32 %v7127_v3, %v3148_v43  ;;  %v3140_v59 = vadd.f32 %v7121_v31, %v3126_v12  ;;  %v6127_v13 = vpack.c.bf16 %v3808_v9, %v3807_v8  ;;  %v3475_v15 = vld [vmem:[#allocation7 + $0x130] sm:$0xff]  ;;  %v3726_v9 = vld [vmem:[#allocation7 + $0x188] sm:$0xff] }
 0x415   :  { %v3107_v18 = vpop.f32.mrb[126].mxu1 }
 0x416   :  { %3215 = vst.msk [vmem:[#allocation6] sm:$0xff] %vm3181_vm9, %v3210_v27  ;;  %v3176_v19 = vadd.f32 %v7132_v4, %v3162_v14  ;;  %v3149_v23 = vmax.f32 %v3140_v59, 0.0  ;;  %v3127_v42 = vadd.f32 %v3107_v18, %v2967_v36  ;;  %v5881_v28 = vpop.f32.mrb[127].mxu1  ;;  %v3476_v14 = vld [vmem:[#allocation7 + $0x138] sm:$0xff] }
 0x417   :  { %v3974_v28 = vld [vmem:[#allocation7 + $0x1c8] sm:$0xff] }
 0x418   :  { %3186 = vst.msk [vmem:[#allocation5 + $0x20] sm:$0xff] %vm3181_vm9, %v3176_v19  ;;  %v3163_v29 = vmul.f32 %v7127_v3, %v3149_v23  ;;  %v3141_v63 = vadd.f32 %v7121_v31, %v3127_v42  ;;  %v3394_v23 = vld [vmem:[#allocation7 + $0x128] sm:$0xff]  ;;  %v3973_v42 = vld [vmem:[#allocation7 + $0x1c0] sm:$0xff] }
 0x419   :  { %v3112_v24 = vpop.f32.mrb[128].mxu1 }
 0x41a   :  { %v3177_v34 = vadd.f32 %v7132_v4, %v3163_v29  ;;  %v3150_v35 = vmax.f32 %v3141_v63, 0.0  ;;  %v3128_v0 = vadd.f32 %v3112_v24, %v7114_v21  ;;  %v5884_v25 = vpop.f32.mrb[129].mxu1  ;;  %v6115_v29 = vpack.c.bf16 %v3476_v14, %v3475_v15  ;;  %v4056_v15 = vld [vmem:[#allocation7 + $0x1d8] sm:$0xff] }
 0x41b   :  { %v3193_v47 = vld [vmem:[#allocation5 + $0x10] ss:$2 sm:$0xff]  ;;  %v3203_v39 = vld [vmem:[#allocation5 + $0x11] ss:$2 sm:$0xff]  ;;  %v6133_v25 = vpack.c.bf16 %v3974_v28, %v3973_v42 }
 0x41c   :  { %3187 = vst.msk [vmem:[#allocation5 + $0x28] sm:$0xff] %vm3181_vm9, %v3177_v34  ;;  %v3164_v36 = vmul.f32 %v7127_v3, %v3150_v35  ;;  %v3142_v41 = vadd.f32 %v7121_v31, %v3128_v0  ;;  %v3211_v38 = vmax.f32 %v3193_v47, %v3203_v39  ;;  %v3809_v34 = vld [vmem:[#allocation7 + $0x1a0] sm:$0xff]  ;;  %v3558_v47 = vld [vmem:[#allocation7 + $0x148] sm:$0xff] }
 0x41d   :  { %v3117_v44 = vpop.f32.mrb[130].mxu1  ;;  %v3231_v56 = vld [vmem:[#allocation6 + $0x1] sm:$0x1]  ;;  %v3221_v10 = vld [vmem:[#allocation6] sm:$0x1] }
 0x41e   :  { %v3178_v45 = vadd.f32 %v7132_v4, %v3164_v36  ;;  %v3151_v60 = vmax.f32 %v3142_v41, 0.0  ;;  %v3129_v48 = vadd.f32 %v3117_v44, %v7116_v51  ;;  %v5887_v49 = vpop.f32.mrb[131].mxu1  ;;  %3216 = vst.msk [vmem:[#allocation6 + $0x8] sm:$0xff] %vm3181_vm9, %v3211_v38  ;;  %v3635_v27 = vld [vmem:[#allocation6 + $0x5] sm:$0x1]  ;;  %v3559_v36 = vld [vmem:[#allocation7 + $0x150] sm:$0xff] }
 0x41f   :  { %v3386_v24 = vld [vmem:[#allocation6 + $0x2] sm:$0x1]  ;;  %v3801_v39 = vld [vmem:[#allocation6 + $0x7] sm:$0x1]  ;;  %v6118_v49 = vpack.c.bf16 %v3559_v36, %v3558_v47 }
 0x420   :  { %3188 = vst.msk [vmem:[#allocation5 + $0x30] sm:$0xff] %vm3181_vm9, %v3178_v45  ;;  %v3165_v21 = vmul.f32 %v7127_v3, %v3151_v60  ;;  %v3143_v52 = vadd.f32 %v7121_v31, %v3129_v48  ;;  %v3229_v31 = vld [vmem:[#allocation7 + $0xf0] sm:$0xff]  ;;  %v3477_v45 = vld [vmem:[#allocation7 + $0x140] sm:$0xff]  ;;  %v4140_v48 = vld [vmem:[#allocation7 + $0x1f8] sm:$0xff] }
 0x421   :  { %v6109_v61 = vpack.c.bf16 %v3229_v31, %v3228_v55  ;;  %v4139_v60 = vld [vmem:[#allocation7 + $0x1f0] sm:$0xff]  ;;  %v3560_v31 = vld [vmem:[#allocation7 + $0x158] sm:$0xff] }
 0x422   :  { %v3179_v17 = vadd.f32 %v7132_v4, %v3165_v21  ;;  %v3152_v33 = vmax.f32 %v3143_v52, 0.0  ;;  %v3469_v52 = vld [vmem:[#allocation6 + $0x3] sm:$0x1] }
 0x423   :  { %v3195_v53 = vld [vmem:[#allocation5 + $0x20] ss:$2 sm:$0xff]  ;;  %v3205_v54 = vld [vmem:[#allocation5 + $0x21] ss:$2 sm:$0xff] }
 0x424   :  { %v3212_v26 = vmax.f32 %v3195_v53, %v3205_v54  ;;  %3189 = vst.msk [vmem:[#allocation5 + $0x38] sm:$0xff] %vm3181_vm9, %v3179_v17  ;;  %v3166_v37 = vmul.f32 %v7127_v3, %v3152_v33  ;;  %v3975_v17 = vld [vmem:[#allocation7 + $0x1d0] sm:$0xff]  ;;  %v6139_v54 = vpack.c.bf16 %v4140_v48, %v4139_v60  ;;  %v4224_v36 = vld [vmem:[#allocation7 + $0x218] sm:$0xff]  ;;  %v4391_v48 = vld [vmem:[#allocation7 + $0x248] sm:$0xff] }
 0x425   :  { %v4133_v2 = vld [vmem:[#allocation6 + $0xb] sm:$0x1] }
 0x426   :  { %3217 = vst.msk [vmem:[#allocation6 + $0x10] sm:$0xff] %vm3181_vm9, %v3212_v26  ;;  %v3180_v51 = vadd.f32 %v7132_v4, %v3166_v37  ;;  %v3724_v26 = vld [vmem:[#allocation7 + $0x178] sm:$0xff]  ;;  %v3967_v37 = vld [vmem:[#allocation6 + $0x9] sm:$0x1] }
 0x428   :  { %3190 = vst.msk [vmem:[#allocation5 + $0x40] sm:$0xff] %vm3181_vm9, %v3180_v51  ;;  %v3725_v51 = vld [vmem:[#allocation7 + $0x180] sm:$0xff] }
 0x42b   :  { %v3197_v7 = vld [vmem:[#allocation5 + $0x30] ss:$2 sm:$0xff]  ;;  %v3207_v50 = vld [vmem:[#allocation5 + $0x31] ss:$2 sm:$0xff] }
 0x42c   :  { %v3213_v57 = vmax.f32 %v3197_v7, %v3207_v50 }
 0x42d   :  { %v3232_v20 = vld [vmem:[#allocation6 + $0x15] sm:$0x1]  ;;  %v3222_v62 = vld [vmem:[#allocation6 + $0x14] sm:$0x1]  ;;  %v3387_v43 = vld [vmem:[#allocation6 + $0x16] sm:$0x1] }
 0x42e   :  { %3218 = vst.msk [vmem:[#allocation6 + $0x18] sm:$0xff] %vm3181_vm9, %v3213_v57  ;;  %v3234_v58 = vrot.slane %v3232_v20, 7  ;;  %v3224_v6 = vrot.slane %v3222_v62, 7  ;;  %v3389_v19 = vrot.slane %v3387_v43, 7  ;;  %v3470_v35 = vld [vmem:[#allocation6 + $0x17] sm:$0x1] }
 0x42f   :  { %v3199_v3 = vld [vmem:[#allocation5 + $0x40] ss:$2 sm:$0xf]  ;;  %v3209_v1 = vld [vmem:[#allocation5 + $0x41] ss:$2 sm:$0xf] }
 0x430   :  { %v3214_v22 = vmax.f32 %v3199_v3, %v3209_v1  ;;  %v3236_v4 = vsel %vm3226_vm10, %v3231_v56, %v3234_v58  ;;  %v3227_v12 = vsel %vm3226_vm10, %v3221_v10, %v3224_v6  ;;  %v3391_v0 = vsel %vm3226_vm10, %v3386_v24, %v3389_v19  ;;  %v4305_v57 = vld [vmem:[#allocation7 + $0x220] sm:$0xff]  ;;  %v4306_v20 = vld [vmem:[#allocation7 + $0x228] sm:$0xff]  ;;  %v4307_v43 = vld [vmem:[#allocation7 + $0x230] sm:$0xff] }
 0x431   :  { %5895 = vmatmul.mubr.msk.f32.vlgmr.msra.gmra.mrb[16].mxu0 %vm3181_vm9, %v3236_v4  ;;  %v3472_v44 = vrot.slane %v3470_v35, 7  ;;  %v6124_v56 = vpack.c.bf16 %v3725_v51, %v3724_v26  ;;  %v4141_v62 = vld [vmem:[#allocation7 + $0x200] sm:$0xff]  ;;  %v3890_v4 = vld [vmem:[#allocation7 + $0x1a8] sm:$0xff] }
 0x432   :  { %6110 = vmatpush3.bf16.msra.mxu0 %v6109_v61  ;;  %5903 = vmatprep.mubr.msk.f32.mxu0 %vm6337_vm8, %v6334_v16  ;;  %3220 = vst.msk [vmem:[#allocation6 + $0x20] sm:$0xf] %vm3219_vm11, %v3214_v22  ;;  %v3552_v61 = vld [vmem:[#allocation6 + $0x4] sm:$0x1]  ;;  %v6145_v22 = vpack.c.bf16 %v4306_v20, %v4305_v57  ;;  %v4399_v51 = vld [vmem:[#allocation7 + $0x288] sm:$0xff]  ;;  %v4402_v57 = vld [vmem:[#allocation7 + $0x2a0] sm:$0xff] }
 0x433   :  { %5901 = vmatprep.subr.mxu0 %v6334_v16  ;;  %v3474_v53 = vsel %vm3226_vm10, %v3469_v52, %v3472_v44  ;;  %v4389_v44 = vld [vmem:[#allocation7 + $0x238] sm:$0xff]  ;;  %v4403_v20 = vld [vmem:[#allocation7 + $0x2a8] sm:$0xff] }
 0x434   :  { %v4393_v52 = vld [vmem:[#allocation7 + $0x258] sm:$0xff] }
 0x435   :  { %v3636_v11 = vld [vmem:[#allocation6 + $0x19] sm:$0x1]  ;;  %v3802_v59 = vld [vmem:[#allocation6 + $0x1b] sm:$0x1]  ;;  %v3968_v41 = vld [vmem:[#allocation6 + $0x1d] sm:$0x1] }
 0x436   :  { %5902 = vmatpush3.msra.mxu0 %v3230_v40  ;;  %v3638_v46 = vrot.slane %v3636_v11, 7  ;;  %v3804_v63 = vrot.slane %v3802_v59, 7  ;;  %v3970_v21 = vrot.slane %v3968_v41, 7  ;;  %v3553_v33 = vld [vmem:[#allocation6 + $0x18] sm:$0x1] }
 0x437   :  { %5904 = vmatmul.mubr.msk.f32.vlgmr.msra.gmra.mrb[18].mxu0 %vm3181_vm9, %v3227_v12  ;;  %6111 = vmatprep.subr.bf16.mxu0 %v6335_v30  ;;  %v4134_v55 = vld [vmem:[#allocation6 + $0x1f] sm:$0x1]  ;;  %v3555_v50 = vrot.slane %v3553_v33, 7  ;;  %v3719_v3 = vld [vmem:[#allocation6 + $0x1a] sm:$0x1] }
 0x438   :  { %6113 = vmatpush3.bf16.msra.mxu0 %v6112_v32  ;;  %v3640_v18 = vsel %vm3226_vm10, %v3635_v27, %v3638_v46  ;;  %5912 = vmatprep.mubr.msk.f32.mxu0 %vm6337_vm8, %v6334_v16  ;;  %v3806_v38 = vsel %vm3226_vm10, %v3801_v39, %v3804_v63  ;;  %v3972_v7 = vsel %vm3226_vm10, %v3967_v37, %v3970_v21  ;;  %v4136_v58 = vrot.slane %v4134_v55, 7  ;;  %v3718_v11 = vld [vmem:[#allocation6 + $0x6] sm:$0x1]  ;;  %v3885_v12 = vld [vmem:[#allocation6 + $0x1c] sm:$0x1]  ;;  %v4057_v27 = vld [vmem:[#allocation7 + $0x1e0] sm:$0xff] }
 0x439   :  { %5940 = vmatmul.mubr.msk.f32.vlgmr.msra.gmra.mrb[132].mxu1 %vm3181_vm9, %v3640_v18  ;;  %5910 = vmatprep.subr.mxu0 %v6334_v16  ;;  %v3557_v1 = vsel %vm3226_vm10, %v3552_v61, %v3555_v50  ;;  %v4300_v6 = vld [vmem:[#allocation6 + $0x21] sm:$0x1]  ;;  %v3721_v8 = vrot.slane %v3719_v3, 7  ;;  %v6130_v32 = vpack.c.bf16 %v3891_v5, %v3890_v4  ;;  %v3887_v59 = vrot.slane %v3885_v12, 7  ;;  %v4051_v42 = vld [vmem:[#allocation6 + $0x1e] sm:$0x1] }
 0x43a   :  { %6128 = vmatpush3.bf16.msra.mxu1 %v6127_v13  ;;  %5957 = vmatprep.mubr.msk.f32.mxu1 %vm6337_vm8, %v6334_v16  ;;  %v4138_v40 = vsel %vm3226_vm10, %v4133_v2, %v4136_v58  ;;  %v4302_v10 = vrot.slane %v4300_v6, 7  ;;  %v4299_v13 = vld [vmem:[#allocation6 + $0xd] sm:$0x1]  ;;  %v3892_v18 = vld [vmem:[#allocation7 + $0x1b8] sm:$0xff]  ;;  %v6136_v19 = vpack.c.bf16 %v4057_v27, %v4056_v15  ;;  %v4223_v63 = vld [vmem:[#allocation7 + $0x210] sm:$0xff]  ;;  %v4053_v24 = vrot.slane %v4051_v42, 7 }
 0x43b   :  { %5955 = vmatprep.subr.mxu1 %v6334_v16  ;;  %v3723_v46 = vsel %vm3226_vm10, %v3718_v11, %v3721_v8  ;;  %v4216_v41 = vld [vmem:[#allocation6 + $0xc] sm:$0x1]  ;;  %v4404_v58 = vld [vmem:[#allocation7 + $0x2b0] sm:$0xff] }
 0x43c   :  { %5911 = vmatpush3.msra.mxu0 %v3394_v23  ;;  %v4304_v14 = vsel %vm3226_vm10, %v4299_v13, %v4302_v10  ;;  %v3884_v23 = vld [vmem:[#allocation6 + $0x8] sm:$0x1]  ;;  %v6169_v61 = vpack.c.bf16 %v4404_v58, %v4403_v20 }
 0x43d   :  { %5913 = vmatmul.mubr.msk.f32.vlgmr.msra.gmra.mrb[20].mxu0 %vm3181_vm9, %v3391_v0  ;;  %6114 = vmatprep.subr.bf16.mxu0 %v6335_v30  ;;  %v3889_v28 = vsel %vm3226_vm10, %v3884_v23, %v3887_v59  ;;  %v4050_v0 = vld [vmem:[#allocation6 + $0xa] sm:$0x1] }
 0x43e   :  { %6116 = vmatpush3.bf16.msra.mxu0 %v6115_v29  ;;  %5956 = vmatpush3.msra.mxu1 %v3809_v34  ;;  %v4222_v29 = vld [vmem:[#allocation7 + $0x208] sm:$0xff]  ;;  %v4055_v47 = vsel %vm3226_vm10, %v4050_v0, %v4053_v24  ;;  %v4398_v37 = vld [vmem:[#allocation7 + $0x280] sm:$0xff] }
 0x43f   :  { %5958 = vmatmul.mubr.msk.f32.vlgmr.msra.gmra.mrb[134].mxu1 %vm3181_vm9, %v3806_v38  ;;  %6132 = vmatprep.subr.bf16.mxu1 %v6335_v30  ;;  %v4058_v34 = vld [vmem:[#allocation7 + $0x1e8] sm:$0xff]  ;;  %v6142_v35 = vpack.c.bf16 %v4223_v63, %v4222_v29 }
 0x440   :  { %6134 = vmatpush3.bf16.msra.mxu1 %v6133_v25  ;;  %5919 = vmatprep.subr.mxu0 %v6334_v16  ;;  %v4217_v25 = vld [vmem:[#allocation6 + $0x20] sm:$0x1] }
 0x441   :  { %5921 = vmatprep.mubr.msk.f32.mxu0 %vm6337_vm8, %v6334_v16  ;;  %5973 = vmatprep.subr.mxu1 %v6334_v16  ;;  %v4219_v39 = vrot.slane %v4217_v25, 7 }
 0x442   :  { %5920 = vmatpush3.msra.mxu0 %v3477_v45  ;;  %5975 = vmatprep.mubr.msk.f32.mxu1 %vm6337_vm8, %v6334_v16  ;;  %v4390_v45 = vld [vmem:[#allocation7 + $0x240] sm:$0xff] }
 0x443   :  { %5922 = vmatmul.mubr.msk.f32.vlgmr.msra.gmra.mrb[22].mxu0 %vm3181_vm9, %v3474_v53  ;;  %6117 = vmatprep.subr.bf16.mxu0 %v6335_v30  ;;  %v4221_v38 = vsel %vm3226_vm10, %v4216_v41, %v4219_v39  ;;  %v6148_v60 = vpack.c.bf16 %v4390_v45, %v4389_v44  ;;  %v4395_v53 = vld [vmem:[#allocation7 + $0x268] sm:$0xff]  ;;  %v5171_v44 = vld [vmem:[%s7419_s1 + $0x7] ss:$0 sm:$0xff] }
 0x444   :  { %6119 = vmatpush3.bf16.msra.mxu0 %v6118_v49  ;;  %5974 = vmatpush3.msra.mxu1 %v3975_v17  ;;  %v4392_v49 = vld [vmem:[#allocation7 + $0x250] sm:$0xff]  ;;  %v4394_v17 = vld [vmem:[#allocation7 + $0x260] sm:$0xff] }
 0x445   :  { %5976 = vmatmul.mubr.msk.f32.vlgmr.msra.gmra.mrb[136].mxu1 %vm3181_vm9, %v3972_v7  ;;  %6138 = vmatprep.subr.bf16.mxu1 %v6335_v30  ;;  %v6151_v21 = vpack.c.bf16 %v4392_v49, %v4391_v48  ;;  %v6154_v33 = vpack.c.bf16 %v4394_v17, %v4393_v52  ;;  %v4400_v7 = vld [vmem:[#allocation7 + $0x290] sm:$0xff]  ;;  %v4570_v49 = vpop.permute.xlu1 %4569 }
 0x446   :  { %6140 = vmatpush3.bf16.msra.mxu1 %v6139_v54  ;;  %5928 = vmatprep.subr.mxu0 %v6334_v16  ;;  %v4396_v54 = vld [vmem:[#allocation7 + $0x270] sm:$0xff]  ;;  %v6163_v50 = vpack.c.bf16 %v4400_v7, %v4399_v51 }
 0x447   :  { %5930 = vmatprep.mubr.msk.f32.mxu0 %vm6337_vm8, %v6334_v16  ;;  %5991 = vmatprep.subr.mxu1 %v6334_v16  ;;  %v6157_v26 = vpack.c.bf16 %v4396_v54, %v4395_v53 }
 0x448   :  { %5929 = vmatpush3.msra.mxu0 %v3560_v31  ;;  %5993 = vmatprep.mubr.msk.f32.mxu1 %vm6337_vm8, %v6334_v16  ;;  %v4401_v31 = vld [vmem:[#allocation7 + $0x298] sm:$0xff] }
 0x449   :  { %5931 = vmatmul.mubr.msk.f32.vlgmr.msra.gmra.mrb[24].mxu0 %vm3181_vm9, %v3557_v1  ;;  %6123 = vmatprep.subr.bf16.mxu0 %v6335_v30  ;;  %v4576_v52 = vpop.permute.xlu1 %4575 }
 0x44a   :  { %6125 = vmatpush3.bf16.msra.mxu0 %v6124_v56  ;;  %5992 = vmatpush3.msra.mxu1 %v4141_v62  ;;  %v6166_v56 = vpack.c.bf16 %v4402_v57, %v4401_v31 }
 0x44b   :  { %5994 = vmatmul.mubr.msk.f32.vlgmr.msra.gmra.mrb[138].mxu1 %vm3181_vm9, %v4138_v40  ;;  %6144 = vmatprep.subr.bf16.mxu1 %v6335_v30 }
 0x44c   :  { %6146 = vmatpush3.bf16.msra.mxu1 %v6145_v22  ;;  %5946 = vmatprep.subr.mxu0 %v6334_v16 }
 0x44d   :  { %5948 = vmatprep.mubr.msk.f32.mxu0 %vm6337_vm8, %v6334_v16  ;;  %6009 = vmatprep.subr.mxu1 %v6334_v16  ;;  %v4582_v53 = vpop.permute.xlu1 %4581 }
 0x44e   :  { %5947 = vmatpush3.msra.mxu0 %v3726_v9  ;;  %6011 = vmatprep.mubr.msk.f32.mxu1 %vm6337_vm8, %v6334_v16 }
 0x44f   :  { %5949 = vmatmul.mubr.msk.f32.vlgmr.msra.gmra.mrb[26].mxu0 %vm3181_vm9, %v3723_v46  ;;  %6129 = vmatprep.subr.bf16.mxu0 %v6335_v30 }
 0x450   :  { %6131 = vmatpush3.bf16.msra.mxu0 %v6130_v32  ;;  %6010 = vmatpush3.msra.mxu1 %v4307_v43 }
 0x451   :  { %6012 = vmatmul.mubr.msk.f32.vlgmr.msra.gmra.mrb[140].mxu1 %vm3181_vm9, %v4304_v14  ;;  %5964 = vmatprep.subr.mxu0 %v6334_v16 }
 0x452   :  { %5966 = vmatprep.mubr.msk.f32.mxu0 %vm6337_vm8, %v6334_v16 }
 0x454   :  { %5965 = vmatpush3.msra.mxu0 %v3892_v18 }
 0x455   :  { %5967 = vmatmul.mubr.msk.f32.vlgmr.msra.gmra.mrb[28].mxu0 %vm3181_vm9, %v3889_v28  ;;  %6135 = vmatprep.subr.bf16.mxu0 %v6335_v30 }
 0x456   :  { %6137 = vmatpush3.bf16.msra.mxu0 %v6136_v19  ;;  %5984 = vmatprep.mubr.msk.f32.mxu0 %vm6337_vm8, %v6334_v16 }
 0x457   :  { %5982 = vmatprep.subr.mxu0 %v6334_v16 }
 0x45a   :  { %5983 = vmatpush3.msra.mxu0 %v4058_v34 }
 0x45b   :  { %5985 = vmatmul.mubr.msk.f32.vlgmr.msra.gmra.mrb[30].mxu0 %vm3181_vm9, %v4055_v47  ;;  %6141 = vmatprep.subr.bf16.mxu0 %v6335_v30 }
 0x45c   :  { %6143 = vmatpush3.bf16.msra.mxu0 %v6142_v35  ;;  %6002 = vmatprep.mubr.msk.f32.mxu0 %vm6337_vm8, %v6334_v16 }
 0x45d   :  { %6000 = vmatprep.subr.mxu0 %v6334_v16 }
 0x460   :  { %6001 = vmatpush3.msra.mxu0 %v4224_v36 }
 0x461   :  { %6003 = vmatmul.mubr.msk.f32.vlgmr.msra.gmra.mrb[32].mxu0 %vm3181_vm9, %v4221_v38  ;;  %6147 = vmatprep.subr.bf16.mxu0 %v6335_v30 }
 0x462   :  { %6046 = vmatprep.mubr.msk.f32.mxu0 %vm6337_vm8, %v6334_v16  ;;  %6149 = vmatpush3.bf16.msra.mxu0 %v6148_v60  ;;  %v4397_v16 = vld [vmem:[#allocation7 + $0x278] sm:$0xff] }
 0x463   :  { %6150 = vmatprep.subr.bf16.mxu0 %v6335_v30  ;;  %v6160_v55 = vpack.c.bf16 %v4398_v37, %v4397_v16 }
 0x466   :  { %6152 = vmatpush3.bf16.msra.mxu0 %v6151_v21  ;;  %v4573_v21 = vpop.permute.xlu0 %4572 }
 0x467   :  { %6153 = vmatprep.subr.bf16.mxu0 %v6335_v30 }
 0x46a   :  { %6155 = vmatpush3.bf16.msra.mxu0 %v6154_v33  ;;  %v4579_v17 = vpop.permute.xlu0 %4578 }
 0x46b   :  { %6156 = vmatprep.subr.bf16.mxu0 %v6335_v30 }
 0x46e   :  { %6158 = vmatpush3.bf16.msra.mxu0 %v6157_v26  ;;  %v7262_v33 = vpop.permute.xlu0 %4584  ;;  %v7266_v26 = vpop.permute.xlu1 %4587 }
 0x46f   :  { %6159 = vmatprep.subr.bf16.mxu0 %v6335_v30 }
 0x472   :  { %6161 = vmatpush3.bf16.msra.mxu0 %v6160_v55  ;;  %v7264_v54 = vpop.permute.xlu0 %4590  ;;  %v7270_v37 = vpop.permute.xlu1 %4593 }
 0x473   :  { %6162 = vmatprep.subr.bf16.mxu0 %v6335_v30 }
 0x476   :  { %6164 = vmatpush3.bf16.msra.mxu0 %v6163_v50  ;;  %v7268_v16 = vpop.permute.xlu0 %4596  ;;  %v7274_v55 = vpop.permute.xlu1 %4805 }
 0x477   :  { %6165 = vmatprep.subr.bf16.mxu0 %v6335_v30 }
 0x47a   :  { %6167 = vmatpush3.bf16.msra.mxu0 %v6166_v56  ;;  %v7272_v51 = vpop.permute.xlu0 %4808  ;;  %v7278_v50 = vpop.permute.xlu1 %4829 }
 0x47b   :  { %6168 = vmatprep.subr.bf16.mxu0 %v6335_v30 }
 0x47e   :  { %6170 = vmatpush3.bf16.msra.mxu0 %v6169_v61  ;;  %v7276_v7 = vpop.permute.xlu0 %4832  ;;  %v7282_v57 = vpop.permute.xlu1 %4599 }
 0x482   :  { %v7280_v31 = vpop.permute.xlu0 %4811  ;;  %v7286_v56 = vpop.permute.xlu1 %4835 }
 0x486   :  { %v7284_v20 = vpop.permute.xlu0 %4602  ;;  %v7290_v61 = vpop.permute.xlu1 %4814 }
 0x48a   :  { %v7288_v58 = vpop.permute.xlu0 %4838 }
 0x504   :  { %v3309_v62 = vpop.f32.mrb[16].mxu0 }
 0x505   :  { %v5896_v3 = vpop.f32.mrb[17].mxu0 }
 0x506   :  { %v4616_v3 = vlaneseq }
 0x50a   :  { %v3382_v1 = vpop.f32.mrb[18].mxu0 }
 0x50b   :  { %v3383_v22 = vadd.f32 %v3382_v1, %v3309_v62  ;;  %v5905_v4 = vpop.f32.mrb[19].mxu0  ;;  %v7292_v62 = vpop.permute.xlu0 %4817 }
 0x50c   :  { %v3713_v2 = vpop.f32.mrb[132].mxu1  ;;  %v7294_v1 = vpop.permute.xlu1 %4605 }
 0x50d   :  { %v5941_v5 = vpop.f32.mrb[133].mxu1 }
 0x50f   :  { %v7296_v4 = vpop.permute.xlu0 %4608 }
 0x510   :  { %v3464_v6 = vpop.f32.mrb[20].mxu0 }
 0x511   :  { %v3468_v40 = vadd.f32 %v3464_v6, %v3383_v22  ;;  %v5914_v8 = vpop.f32.mrb[21].mxu0  ;;  %v4617_v22 = vand.u32 127, %v4616_v3  ;;  %v4619_v6 = vshrl.u32 %v4616_v3, 7 }
 0x512   :  { %v3879_v9 = vpop.f32.mrb[134].mxu1 }
 0x513   :  { %v5959_v32 = vpop.f32.mrb[135].mxu1  ;;  %v4629_v5 = vadd.s32 4294967280, %v4617_v22  ;;  %v4620_v8 = vsub.s32 %v4617_v22, %v4619_v6 }
 0x514   :  { %v7300_v32 = vpop.permute.xlu0 %4844 }
 0x516   :  { %v3547_v10 = vpop.f32.mrb[22].mxu0 }
 0x517   :  { %v3551_v11 = vadd.f32 %v3547_v10, %v3468_v40  ;;  %v5923_v43 = vpop.f32.mrb[23].mxu0  ;;  %v4622_v40 = vadd.s32 4294967288, %v4617_v22  ;;  %v4632_v10 = vsub.s32 %v4629_v5, %v4619_v6 }
 0x518   :  { %v4045_v12 = vpop.f32.mrb[136].mxu1 }
 0x519   :  { %v5977_v46 = vpop.f32.mrb[137].mxu1  ;;  %v4625_v43 = vsub.s32 %v4622_v40, %v4619_v6 }
 0x51c   :  { %v3630_v13 = vpop.f32.mrb[24].mxu0 }
 0x51d   :  { %v3634_v30 = vadd.f32 %v3630_v13, %v3551_v11  ;;  %v5932_v15 = vpop.f32.mrb[25].mxu0  ;;  %v4643_v11 = vadd.s32 4294967264, %v4617_v22  ;;  %v4621_v13 = vrot.slane %v4570_v49, %v4620_v8 }
 0x51e   :  { %v4211_v27 = vpop.f32.mrb[138].mxu1  ;;  %v4633_v15 = vrot.slane %v4576_v52, %v4632_v10  ;;  %v4894_v52 = vrot.slane %v7278_v50, %v4620_v8 }
 0x51f   :  { %v5995_v14 = vpop.f32.mrb[139].mxu1  ;;  %v3717_v59 = vadd.f32 %v3713_v2, %v3634_v30  ;;  %v7298_v2 = vpop.permute.xlu1 %4841 }
 0x520   :  { %v4626_v14 = vrot.slane %v4573_v21, %v4625_v43  ;;  %v4855_v21 = vrot.slane %v7274_v55, %v4620_v8 }
 0x522   :  { %v3796_v18 = vpop.f32.mrb[26].mxu0 }
 0x523   :  { %v3800_v19 = vadd.f32 %v3796_v18, %v3717_v59  ;;  %v5950_v23 = vpop.f32.mrb[27].mxu0  ;;  %v7302_v46 = vpop.permute.xlu1 %4820 }
 0x524   :  { %v4377_v42 = vpop.f32.mrb[140].mxu1  ;;  %v7310_v18 = vpop.permute.xlu0 %4823 }
 0x525   :  { %v6013_v28 = vpop.f32.mrb[141].mxu1  ;;  %v3883_v29 = vadd.f32 %v3879_v9, %v3800_v19  ;;  %v4636_v9 = vadd.s32 4294967272, %v4617_v22  ;;  %v4628_v19 = vsel %vm4627_vm12, %v4626_v14, %v4621_v13 }
 0x526   :  { %v4664_v28 = vadd.s32 4294967240, %v4617_v22 }
 0x527   :  { %v7304_v30 = vsub.s32 %v4636_v9, %v4619_v6 }
 0x528   :  { %v3962_v63 = vpop.f32.mrb[28].mxu0 }
 0x529   :  { %v3966_v24 = vadd.f32 %v3962_v63, %v3883_v29  ;;  %v5968_v34 = vpop.f32.mrb[29].mxu0  ;;  %v4640_v23 = vrot.slane %v4579_v17, %v7304_v30  ;;  %v7314_v29 = vpop.permute.xlu1 %4611  ;;  %v4635_v63 = vsel %vm4634_vm13, %v4633_v15, %v4628_v19  ;;  %v4903_v17 = vrot.slane %v7286_v56, %v4632_v10  ;;  %v5173_v15 = vld [vmem:[%s7419_s1 + $0x9] ss:$0 sm:$0xff] }
 0x52b   :  { %v4049_v35 = vadd.f32 %v4045_v12, %v3966_v24  ;;  %v4650_v12 = vadd.s32 4294967256, %v4617_v22 }
 0x52d   :  { %v7308_v59 = vsub.s32 %v4650_v12, %v4619_v6  ;;  %v4848_v49 = vpop.permute.xlu1 %4847 }
 0x52e   :  { %v4128_v0 = vpop.f32.mrb[30].mxu0 }
 0x52f   :  { %v4132_v25 = vadd.f32 %v4128_v0, %v4049_v35  ;;  %v5986_v47 = vpop.f32.mrb[31].mxu0  ;;  %v4654_v34 = vrot.slane %v7262_v33, %v7308_v59  ;;  %v4642_v35 = vsel %vm4641_vm14, %v4640_v23, %v4635_v63  ;;  %v4869_v33 = vrot.slane %v7290_v61, %v7304_v30  ;;  %v5172_v61 = vld [vmem:[%s7419_s1 + $0x8] ss:$0 sm:$0xff] }
 0x530   :  { %v4678_v47 = vrot.slane %v7268_v16, %v4625_v43 }
 0x531   :  { %v4215_v39 = vadd.f32 %v4211_v27, %v4132_v25  ;;  %v7306_v27 = vsub.s32 %v4643_v11, %v4619_v6  ;;  %v7323_v25 = vsub.s32 %v4664_v28, %v4619_v6  ;;  %v4827_v40 = vpop.permute.xlu1 %4826 }
 0x533   :  { %v4647_v24 = vrot.slane %v4582_v53, %v7306_v27  ;;  %v4668_v16 = vrot.slane %v7264_v54, %v7323_v25  ;;  %v4693_v54 = vrot.slane %v7294_v1, %v7306_v27  ;;  %v4918_v1 = vrot.slane %v7300_v32, %v7308_v59 }
 0x534   :  { %v4294_v36 = vpop.f32.mrb[32].mxu0 }
 0x535   :  { %v4298_v41 = vadd.f32 %v4294_v36, %v4215_v39  ;;  %v6004_v38 = vpop.f32.mrb[33].mxu0  ;;  %v7326_v39 = vpop.permute.xlu0 %4614  ;;  %v4649_v36 = vsel %vm4648_vm15, %v4647_v24, %v4642_v35 }
 0x536   :  { %v4683_v38 = vrot.slane %v7282_v57, %v4632_v10  ;;  %v4913_v57 = vrot.slane %v7298_v2, %v7306_v27 }
 0x537   :  { %v4381_v45 = vadd.f32 %v4377_v42, %v4298_v41  ;;  %v4657_v42 = vadd.s32 4294967248, %v4617_v22  ;;  %v4859_v41 = vrot.slane %v7272_v51, %v4625_v43  ;;  %v4688_v51 = vrot.slane %v7284_v20, %v7304_v30 }
 0x538   :  { %v4874_v20 = vrot.slane %v7292_v62, %v7306_v27  ;;  %v4698_v22 = vrot.slane %v7296_v4, %v7308_v59  ;;  %v4879_v62 = vrot.slane %v7302_v46, %v7308_v59  ;;  %v4708_v4 = vrot.slane %v7326_v39, %v7323_v25 }
 0x539   :  { %v4387_v60 = vadd.f32 %v5171_v44, %v4381_v45  ;;  %v7321_v0 = vsub.s32 %v4657_v42, %v4619_v6  ;;  %v4898_v44 = vrot.slane %v7276_v7, %v4625_v43  ;;  %v4656_v45 = vsel %vm4655_vm0, %v4654_v34, %v4649_v36  ;;  %v4851_v56 = vpop.permute.xlu0 %4850 }
 0x53a   :  { %v4860_v55 = vsel %vm4627_vm12, %v4859_v41, %v4855_v21  ;;  %v4889_v59 = vrot.slane %v4827_v40, %v7323_v25 }
 0x53b   :  { %v4388_v48 = vmax.f32 %v4387_v60, 0.0  ;;  %v4674_v60 = vrot.slane %v7270_v37, %v4620_v8  ;;  %v4661_v53 = vrot.slane %v7266_v26, %v7321_v0  ;;  %v4899_v50 = vsel %vm4627_vm12, %v4898_v44, %v4894_v52  ;;  %v5177_v52 = vld [vmem:[%s7419_s1 + $0xd] ss:$0 sm:$0xff] }
 0x53c   :  { %v4904_v3 = vsel %vm4634_vm13, %v4903_v17, %v4899_v50  ;;  %v4703_v5 = vrot.slane %v7314_v29, %v7321_v0  ;;  %v4923_v6 = vrot.slane %v4848_v49, %v7321_v0  ;;  %v4884_v13 = vrot.slane %v7310_v18, %v7321_v0 }
 0x53d   :  { %6047 = vmatmul.mubr.f32.vlgmr.msra.gmra.mrb[34].mxu0 %v4388_v48  ;;  %v4864_v48 = vrot.slane %v7280_v31, %v4632_v10  ;;  %v4679_v37 = vsel %vm4627_vm12, %v4678_v47, %v4674_v60  ;;  %v4908_v31 = vrot.slane %v7288_v58, %v7304_v30  ;;  %v4928_v10 = vrot.slane %v4851_v56, %v7323_v25  ;;  %v5175_v30 = vld [vmem:[%s7419_s1 + $0xa] ss:$0 sm:$0xff] }
 0x53e   :  { %v4684_v7 = vsel %vm4634_vm13, %v4683_v38, %v4679_v37  ;;  %v4663_v34 = vsel %vm4662_vm1, %v4661_v53, %v4656_v45 }
 0x53f   :  { %v4865_v26 = vsel %vm4634_vm13, %v4864_v48, %v4860_v55  ;;  %v4689_v2 = vsel %vm4641_vm14, %v4688_v51, %v4684_v7  ;;  %v4909_v9 = vsel %vm4641_vm14, %v4908_v31, %v4904_v3  ;;  %v4670_v47 = vsel %vm4669_vm2, %v4668_v16, %v4663_v34 }
 0x540   :  { %v4870_v58 = vsel %vm4641_vm14, %v4869_v33, %v4865_v26  ;;  %v4694_v43 = vsel %vm4648_vm15, %v4693_v54, %v4689_v2  ;;  %v4914_v12 = vsel %vm4648_vm15, %v4913_v57, %v4909_v9 }
 0x541   :  { %v4875_v46 = vsel %vm4648_vm15, %v4874_v20, %v4870_v58  ;;  %v4699_v27 = vsel %vm4655_vm0, %v4698_v22, %v4694_v43  ;;  %v4919_v14 = vsel %vm4655_vm0, %v4918_v1, %v4914_v12 }
 0x542   :  { %v4880_v23 = vsel %vm4655_vm0, %v4879_v62, %v4875_v46  ;;  %v4704_v42 = vsel %vm4662_vm1, %v4703_v5, %v4699_v27  ;;  %v4924_v18 = vsel %vm4662_vm1, %v4923_v6, %v4919_v14 }
 0x543   :  { %v4709_v63 = vsel %vm4669_vm2, %v4708_v4, %v4704_v42  ;;  %v4929_v24 = vsel %vm4669_vm2, %v4928_v10, %v4924_v18  ;;  %v4885_v35 = vsel %vm4662_vm1, %v4884_v13, %v4880_v23 }
 0x544   :  { %v4890_v39 = vsel %vm4669_vm2, %v4889_v59, %v4885_v35  ;;  %v4711_v36 = vsel %vm4710_vm3, %v4709_v63, %v4670_v47 }
 0x545   :  { %v4930_v41 = vsel %vm4710_vm3, %v4929_v24, %v4890_v39  ;;  %v4714_v38 = vsel %vm4713_vm5, %v4711_v36, 0.0 }
 0x546   :  { %v4932_v44 = vsel %vm4713_vm5, %v4930_v41, 0.0 }
 0x610   :  { %v4476_v8 = vpop.f32.mrb[34].mxu0 }
 0x611   :  { %v4477_v32 = vadd.f32 %v5172_v61, %v4476_v8  ;;  %v6048_v11 = vpop.f32.mrb[35].mxu0 }
 0x613   :  { %v4480_v19 = vmax.f32 %v4477_v32, 0.0 }
 0x615   :  { %v4723_v28 = vmul.f32 %v5175_v30, %v4480_v19  ;;  %v4486_v29 = vmul.f32 %v5173_v15, %v4480_v19 }
 0x617   :  { %v4724_v0 = vsel %vm4487_vm4, %v4723_v28, 0.0  ;;  %v4488_v25 = vsel %vm4487_vm4, %v4486_v29, 0.0 }
 0x618   :  { %4725 = vadd.xlane.f32.xlu0 %v4724_v0  ;;  %4489 = vadd.xlane.f32.xlu1 %v4488_v25 }
 0x61c   :  { %4715 = vadd.xlane.f32.xlu1 %v4714_v38  ;;  %4933 = vadd.xlane.f32.xlu0 %v4932_v44 }
 0x6a5   :  { %v4490_v45 = vpop.xlane.xlu1 %4489  ;;  %v4726_v60 = vpop.xlane.xlu0 %4725 }
 0x6a9   :  { %v4716_v48 = vpop.xlane.xlu1 %4715  ;;  %v4934_v49 = vpop.xlane.xlu0 %4933 }
 0x6aa   :  { %v4717_v21 = vadd.f32 %v4716_v48, %v4490_v45  ;;  %v4935_v17 = vadd.f32 %v4934_v49, %v4726_v60 }
 0x6ac   :  { %v4937_v33 = vsel %vm4936_vm6, %v4717_v21, %v4935_v17 }
 0x6ad   :  { %v4943_v53 = vadd.f32 %v5177_v52, %v4937_v33 }
 0x6af   :  { %4945 = vst.msk [vmem:[#allocation10] sm:$0x3] %vm4944_vm7, %v4943_v53 }
 0x6b0   :  { %6315 = shalt.err (!%p6312_p12)
}
 0x6b1   :  { %s6316_s0 = scalar_lea.hbm %s7421_s3, 32 }
 0x6b2   :  { %p6317_p13 = scmp.ne.s32.totalorder %s7421_s3, %s6316_s0  ;;  %p6320_p0 = scmp.lt.u32.totalorder %s6316_s0, %s7421_s3 }
 0x6b4   :  { %p6322_p1 = pnand %p6320_p0, %p6317_p13 }
 0x6b6   :  { %6325 = shalt.err (!%p6322_p1)
}
 0x6b7   :  { %4955 = dma.vmem_to_hbm [thread:$0]  %s4953_s29, 32, %s7421_s3, [#allocation9]  }
 0x6b8   :  { %6328 = dma.done.wait [#allocation9], 32  }
 0x6b9   :  { %6329 = vsyncadd [#allocation9], 4294967264 }
 0x6ba   :  { %4959 = vsyncpa [#allocation8], 1 }
 0x6bb   :  { %4960 = vsyncpa [#allocation9], 1 }

</bundles_post_ra>
